<compile_context>
chip_gen: v7x
topology: tpu7x:2x2x1
jax: 0.10.0
libtpu: 0.0.40
codegen_flags: <defaults>
</compile_context>

<pallas_src>
import jax
import jax.numpy as jnp
import numpy as np
from jax.experimental import pallas as pl
from jax.experimental.pallas import tpu as pltpu


def _round_up(x, m):
    return (x + m - 1) // m * m


# ----------------------------------------------------------------------------
# Fused Pallas kernel
# ----------------------------------------------------------------------------
def _make_fused_kernel(H, W, Wp):
    HW = H * W
    f32 = jnp.float32
    bf16 = jnp.bfloat16

    def kernel(x_ref,     # (1, HW, Kpad) bf16   [corr | flow 7x7 im2col]
               w01_ref,   # (Kpad, 256)   bf16   convc1 -> cols 0:96, convf1 -> 128:192
               b01_ref,   # (1, 256)      f32
               w2_ref,    # (576, 128)    bf16   convf2 im2col weight, out cols 96:128
               b2_ref,    # (1, 128)      f32
               wcv_ref,   # (1152, 128)   bf16   final conv im2col weight, out cols 0:80
               bcv_ref,   # (1, 128)      f32
               o_ref,     # (1, HW, 128)  f32    cols 0:80 = conv output
               pad1_sc,   # VMEM (H+2, Wp, 64)  f32  zero-ring padded flo1
               pad2_sc,   # VMEM (H+2, Wp, 128) f32  zero-ring padded [cor | flo2]
               col1_sc,   # VMEM (HW, 576)      bf16 im2col for convf2
               col2_sc):  # VMEM (HW, 1152)     bf16 im2col for final conv
        # --- ring-only zeroing (interior is fully rewritten every grid step;
        #     padded cols beyond W+1 are never read by the 3x3 tap slices) ---
        pad1_sc[0:1, :, :] = jnp.zeros((1, Wp, 64), f32)
        pad1_sc[H + 1:H + 2, :, :] = jnp.zeros((1, Wp, 64), f32)
        pad1_sc[:, 0:1, :] = jnp.zeros((H + 2, 1, 64), f32)
        pad1_sc[:, W + 1:W + 2, :] = jnp.zeros((H + 2, 1, 64), f32)
        pad2_sc[0:1, :, :] = jnp.zeros((1, Wp, 128), f32)
        pad2_sc[H + 1:H + 2, :, :] = jnp.zeros((1, Wp, 128), f32)
        pad2_sc[:, 0:1, :] = jnp.zeros((H + 2, 1, 128), f32)
        pad2_sc[:, W + 1:W + 2, :] = jnp.zeros((H + 2, 1, 128), f32)

        # --- fused convc1 (1x1) + convf1 (7x7 via im2col): one (HW,Kpad)@(Kpad,256)
        xb = jnp.dot(x_ref[0], w01_ref[...], preferred_element_type=f32)
        xb = jnp.maximum(xb + b01_ref[...], 0.0)           # (HW, 256), bias+ReLU once
        cor = xb[:, 0:128]                                  # lanes 96:128 are zero
        flo1 = xb[:, 128:192]                                # (HW, 64)

        pad1_sc[1:1 + H, 1:1 + W, :] = flo1.reshape(H, W, 64)

        # --- convf2 (3x3): build im2col in VMEM, single (HW,576)@(576,128) matmul
        for kh in range(3):
            for kw in range(3):
                t = kh * 3 + kw
                patch = pad1_sc[kh:kh + H, kw:kw + W, :].reshape(HW, 64)
                col1_sc[:, t * 64:(t + 1) * 64] = patch.astype(bf16)
        flo2 = jnp.maximum(
            jnp.dot(col1_sc[...], w2_ref[...], preferred_element_type=f32)
            + b2_ref[...], 0.0)                              # (HW, 128), real at 96:128

        # channel concat cat([cor, flo]): disjoint lane ranges -> one add + one store
        pad2_sc[1:1 + H, 1:1 + W, :] = (cor + flo2).reshape(H, W, 128)

        # --- final conv (3x3): im2col + single (HW,1152)@(1152,128) matmul
        for kh in range(3):
            for kw in range(3):
                t = kh * 3 + kw
                patch = pad2_sc[kh:kh + H, kw:kw + W, :].reshape(HW, 128)
                col2_sc[:, t * 128:(t + 1) * 128] = patch.astype(bf16)
        out = jnp.maximum(
            jnp.dot(col2_sc[...], wcv_ref[...], preferred_element_type=f32)
            + bcv_ref[...], 0.0)                             # (HW, 128), real at 0:80

        o_ref[0] = out

    return kernel


# ----------------------------------------------------------------------------
# Parameters (deterministic synthetic init; shapes follow the nn.Module)
# ----------------------------------------------------------------------------
def init_params(key, cor_planes):
    ks = jax.random.split(key, 8)

    def w(k, shape, fan_in):
        return jax.random.normal(k, shape, jnp.float32) / np.sqrt(float(fan_in))

    return {
        "convc1_w": w(ks[0], (96, cor_planes, 1, 1), cor_planes),
        "convc1_b": 0.1 * w(ks[1], (96,), 1),
        "convf1_w": w(ks[2], (64, 2, 7, 7), 2 * 49),
        "convf1_b": 0.1 * w(ks[3], (64,), 1),
        "convf2_w": w(ks[4], (32, 64, 3, 3), 64 * 9),
        "convf2_b": 0.1 * w(ks[5], (32,), 1),
        "conv_w":   w(ks[6], (80, 128, 3, 3), 128 * 9),
        "conv_b":   0.1 * w(ks[7], (80,), 1),
    }


# ----------------------------------------------------------------------------
# Pallas forward (matches SmallMotionEncoder.forward)
# ----------------------------------------------------------------------------
def small_motion_encoder_pallas(params, flow_nchw, corr_nchw):
    N, _, H, W = flow_nchw.shape
    Cp = corr_nchw.shape[1]
    HW = H * W
    Wp = _round_up(W + 2, 8)
    K01 = Cp + 98                      # fused K: corr channels + 7x7x2 im2col
    Kpad = _round_up(K01, 128)
    f32, bf16 = jnp.float32, jnp.bfloat16

    def kkio(wt):  # OIHW (Cout,Cin,KH,KW) -> (KH*KW*Cin, Cout), tap-major row order
        Cout, Cin, KH, KW = wt.shape
        return jnp.transpose(wt, (2, 3, 1, 0)).reshape(KH * KW * Cin, Cout)

    # fused convc1 + convf1 block-diagonal weight / bias
    w01 = jnp.zeros((Kpad, 256), f32)
    w01 = w01.at[:Cp, 0:96].set(jnp.transpose(params["convc1_w"][:, :, 0, 0], (1, 0)))
    w01 = w01.at[Cp:Cp + 98, 128:192].set(kkio(params["convf1_w"]))
    b01 = jnp.zeros((1, 256), f32)
    b01 = b01.at[0, 0:96].set(params["convc1_b"]).at[0, 128:192].set(params["convf1_b"])

    # convf2 im2col weight (rows t*64+c), output lanes 96:128
    w2 = jnp.zeros((9 * 64, 128), f32).at[:, 96:128].set(kkio(params["convf2_w"]))
    b2 = jnp.zeros((1, 128), f32).at[0, 96:128].set(params["convf2_b"])

    # final conv im2col weight (rows t*128+c), output lanes 0:80
    wcv = jnp.zeros((9 * 128, 128), f32).at[:, 0:80].set(kkio(params["conv_w"]))
    bcv = jnp.zeros((1, 128), f32).at[0, 0:80].set(params["conv_b"])

    # activations: ONE fused lane-dense LHS = [corr | 7x7 im2col of flow], bf16
    corr_nhwc = jnp.transpose(corr_nchw, (0, 2, 3, 1))                  # (N,H,W,Cp)
    flow_nhwc = jnp.transpose(flow_nchw, (0, 2, 3, 1))                  # (N,H,W,2)
    fp = jnp.pad(flow_nhwc, ((0, 0), (3, 3), (3, 3), (0, 0)))
    taps = [fp[:, kh:kh + H, kw:kw + W, :] for kh in range(7) for kw in range(7)]
    x = jnp.concatenate([corr_nhwc] + taps, axis=-1)                    # (N,H,W,Cp+98)
    x = jnp.pad(x, ((0, 0), (0, 0), (0, 0), (0, Kpad - K01)))
    x = x.reshape(N, HW, Kpad).astype(bf16)

    # explicit VMEM budget: double-buffered blocks + weights + scratches + temps
    vmem_est = (
        2 * HW * Kpad * 2                                   # x block (bf16, dbl-buf)
        + 2 * HW * 128 * 4                                  # out block (f32, dbl-buf)
        + 2 * (Kpad * 256 + 576 * 128 + 1152 * 128) * 2     # weights (bf16, dbl-buf)
        + 2 * (256 + 128 + 128) * 4                         # biases (f32)
        + (H + 2) * Wp * (64 + 128) * 4                     # padded scratches (f32)
        + HW * (576 + 1152) * 2                             # im2col scratches (bf16)
        + 8 * HW * 256 * 4                                  # f32 temporaries headroom
    )
    vmem_limit = int(min(100 * 2 ** 20, max(32 * 2 ** 20, 2 * vmem_est)))

    kernel = _make_fused_kernel(H, W, Wp)
    out128 = pl.pallas_call(
        kernel,
        out_shape=jax.ShapeDtypeStruct((N, HW, 128), f32),
        grid_spec=pltpu.PrefetchScalarGridSpec(
            num_scalar_prefetch=0,
            grid=(N,),
            in_specs=[
                pl.BlockSpec((1, HW, Kpad), lambda n: (n, 0, 0)),
                pl.BlockSpec((Kpad, 256), lambda n: (0, 0)),
                pl.BlockSpec((1, 256), lambda n: (0, 0)),
                pl.BlockSpec((576, 128), lambda n: (0, 0)),
                pl.BlockSpec((1, 128), lambda n: (0, 0)),
                pl.BlockSpec((1152, 128), lambda n: (0, 0)),
                pl.BlockSpec((1, 128), lambda n: (0, 0)),
            ],
            out_specs=pl.BlockSpec((1, HW, 128), lambda n: (n, 0, 0)),
            scratch_shapes=[
                pltpu.VMEM((H + 2, Wp, 64), jnp.float32),
                pltpu.VMEM((H + 2, Wp, 128), jnp.float32),
                pltpu.VMEM((HW, 576), jnp.bfloat16),
                pltpu.VMEM((HW, 1152), jnp.bfloat16),
            ]),
        compiler_params=pltpu.CompilerParams(
            dimension_semantics=("parallel",),
            vmem_limit_bytes=vmem_limit),
    )(x, w01.astype(bf16), b01, w2.astype(bf16), b2, wcv.astype(bf16), bcv)

    # cols 0:80 = conv output; flow passthrough is an exact wrapper-side concat
    out = out128.reshape(N, H, W, 128)[..., :80]
    out = jnp.transpose(out, (0, 3, 1, 2))                               # (N,80,H,W)
    return jnp.concatenate([out, flow_nchw], axis=1)                     # (N,82,H,W)


# ----------------------------------------------------------------------------
# Pure-JAX reference (mirrors the PyTorch forward exactly)
# ----------------------------------------------------------------------------
def _ref_conv(x, w, b, pad):
    y = jax.lax.conv_general_dilated(
        x, w, window_strides=(1, 1), padding=[(pad, pad), (pad, pad)],
        dimension_numbers=("NCHW", "OIHW", "NCHW"),
        precision=jax.lax.Precision.HIGHEST)
    return y + b[None, :, None, None]


def small_motion_encoder_ref(params, flow, corr):
    cor = jax.nn.relu(_ref_conv(corr, params["convc1_w"], params["convc1_b"], 0))
    flo = jax.nn.relu(_ref_conv(flow, params["convf1_w"], params["convf1_b"], 3))
    flo = jax.nn.relu(_ref_conv(flo, params["convf2_w"], params["convf2_b"], 1))
    cor_flo = jnp.concatenate([cor, flo], axis=1)
    out = jax.nn.relu(_ref_conv(cor_flo, params["conv_w"], params["conv_b"], 1))
    return jnp.concatenate([out, flow], axis=1)


if __name__ == "__main__":
    corr_levels, corr_radius = 1, 1
    cor_planes = corr_levels * (2 * corr_radius + 1) ** 2                # 9
    N, H, W = 2, 16, 16

    key = jax.random.PRNGKey(0)
    kf, kc, kp = jax.random.split(key, 3)
    flow = jax.random.normal(kf, (N, 2, H, W), jnp.float32)
    corr = jax.random.normal(kc, (N, cor_planes, H, W), jnp.float32)
    params = init_params(kp, cor_planes)

    fwd = jax.jit(small_motion_encoder_pallas)
    out = jax.block_until_ready(fwd(params, flow, corr))
    ref = jax.block_until_ready(small_motion_encoder_ref(params, flow, corr))

    assert out.shape == (N, 80 + 2, H, W), out.shape
    np.testing.assert_allclose(np.asarray(out), np.asarray(ref), rtol=2e-2, atol=2e-2)
    print("KERNEL_OK")
</pallas_src>

<mosaic_0001>
module attributes {stable_mosaic.version = 11 : i64} {
  func.func @kernel(%arg0: i32, %arg1: memref<1x256x128xbf16, #tpu.memory_space<vmem>>, %arg2: memref<128x256xbf16, #tpu.memory_space<vmem>>, %arg3: memref<1x256xf32, #tpu.memory_space<vmem>>, %arg4: memref<576x128xbf16, #tpu.memory_space<vmem>>, %arg5: memref<1x128xf32, #tpu.memory_space<vmem>>, %arg6: memref<1152x128xbf16, #tpu.memory_space<vmem>>, %arg7: memref<1x128xf32, #tpu.memory_space<vmem>>, %arg8: memref<1x256x128xf32, #tpu.memory_space<vmem>>, %arg9: memref<18x24x64xf32, #tpu.memory_space<vmem>>, %arg10: memref<18x24x128xf32, #tpu.memory_space<vmem>>, %arg11: memref<256x576xbf16, #tpu.memory_space<vmem>>, %arg12: memref<256x1152xbf16, #tpu.memory_space<vmem>>) attributes {dimension_semantics = [#tpu.dimension_semantics<parallel>], iteration_bounds = array<i64: 2>, scalar_prefetch = 0 : i64, scratch_operands = 4 : i64, tpu.core_type = #tpu.core_type<tc>, window_params = [{transform_indices = @transform_0, window_bounds = array<i64: 1, 256, 128>}, {pipeline_mode = #tpu.pipeline_mode<synchronous>, transform_indices = @transform_1, window_bounds = array<i64: 128, 256>}, {pipeline_mode = #tpu.pipeline_mode<synchronous>, transform_indices = @transform_2, window_bounds = array<i64: 1, 256>}, {pipeline_mode = #tpu.pipeline_mode<synchronous>, transform_indices = @transform_3, window_bounds = array<i64: 576, 128>}, {pipeline_mode = #tpu.pipeline_mode<synchronous>, transform_indices = @transform_4, window_bounds = array<i64: 1, 128>}, {pipeline_mode = #tpu.pipeline_mode<synchronous>, transform_indices = @transform_5, window_bounds = array<i64: 1152, 128>}, {pipeline_mode = #tpu.pipeline_mode<synchronous>, transform_indices = @transform_6, window_bounds = array<i64: 1, 128>}, {transform_indices = @transform_7, window_bounds = array<i64: 1, 256, 128>}]} {
    %cst = arith.constant 0.000000e+00 : f32
    %0 = vector.broadcast %cst : f32 to vector<1x24x64xf32>
    %c0 = arith.constant 0 : index
    %c0_0 = arith.constant 0 : index
    %c0_1 = arith.constant 0 : index
    %1 = vector.load %arg9[%c0, %c0_0, %c0_1] : memref<18x24x64xf32, #tpu.memory_space<vmem>>, vector<1x24x64xf32>
    tpu.vector_store %arg9[%c0, %c0_0, %c0_1], %0 {strides = array<i32>} : memref<18x24x64xf32, #tpu.memory_space<vmem>>, vector<1x24x64xf32>,
    %cst_2 = arith.constant 0.000000e+00 : f32
    %2 = vector.broadcast %cst_2 : f32 to vector<1x24x64xf32>
    %c17 = arith.constant 17 : index
    %c0_3 = arith.constant 0 : index
    %c0_4 = arith.constant 0 : index
    %3 = vector.load %arg9[%c17, %c0_3, %c0_4] : memref<18x24x64xf32, #tpu.memory_space<vmem>>, vector<1x24x64xf32>
    tpu.vector_store %arg9[%c17, %c0_3, %c0_4], %2 {strides = array<i32>} : memref<18x24x64xf32, #tpu.memory_space<vmem>>, vector<1x24x64xf32>,
    %cst_5 = arith.constant 0.000000e+00 : f32
    %4 = vector.broadcast %cst_5 : f32 to vector<18x1x64xf32>
    %c0_6 = arith.constant 0 : index
    %c0_7 = arith.constant 0 : index
    %c0_8 = arith.constant 0 : index
    %5 = vector.load %arg9[%c0_6, %c0_7, %c0_8] : memref<18x24x64xf32, #tpu.memory_space<vmem>>, vector<18x1x64xf32>
    tpu.vector_store %arg9[%c0_6, %c0_7, %c0_8], %4 {strides = array<i32>} : memref<18x24x64xf32, #tpu.memory_space<vmem>>, vector<18x1x64xf32>,
    %cst_9 = arith.constant 0.000000e+00 : f32
    %6 = vector.broadcast %cst_9 : f32 to vector<18x1x64xf32>
    %c0_10 = arith.constant 0 : index
    %c17_11 = arith.constant 17 : index
    %c0_12 = arith.constant 0 : index
    %7 = vector.load %arg9[%c0_10, %c17_11, %c0_12] : memref<18x24x64xf32, #tpu.memory_space<vmem>>, vector<18x1x64xf32>
    tpu.vector_store %arg9[%c0_10, %c17_11, %c0_12], %6 {strides = array<i32>} : memref<18x24x64xf32, #tpu.memory_space<vmem>>, vector<18x1x64xf32>,
    %cst_13 = arith.constant 0.000000e+00 : f32
    %8 = vector.broadcast %cst_13 : f32 to vector<1x24x128xf32>
    %c0_14 = arith.constant 0 : index
    %c0_15 = arith.constant 0 : index
    %c0_16 = arith.constant 0 : index
    %9 = vector.load %arg10[%c0_14, %c0_15, %c0_16] : memref<18x24x128xf32, #tpu.memory_space<vmem>>, vector<1x24x128xf32>
    tpu.vector_store %arg10[%c0_14, %c0_15, %c0_16], %8 {strides = array<i32>} : memref<18x24x128xf32, #tpu.memory_space<vmem>>, vector<1x24x128xf32>,
    %cst_17 = arith.constant 0.000000e+00 : f32
    %10 = vector.broadcast %cst_17 : f32 to vector<1x24x128xf32>
    %c17_18 = arith.constant 17 : index
    %c0_19 = arith.constant 0 : index
    %c0_20 = arith.constant 0 : index
    %11 = vector.load %arg10[%c17_18, %c0_19, %c0_20] : memref<18x24x128xf32, #tpu.memory_space<vmem>>, vector<1x24x128xf32>
    tpu.vector_store %arg10[%c17_18, %c0_19, %c0_20], %10 {strides = array<i32>} : memref<18x24x128xf32, #tpu.memory_space<vmem>>, vector<1x24x128xf32>,
    %cst_21 = arith.constant 0.000000e+00 : f32
    %12 = vector.broadcast %cst_21 : f32 to vector<18x1x128xf32>
    %c0_22 = arith.constant 0 : index
    %c0_23 = arith.constant 0 : index
    %c0_24 = arith.constant 0 : index
    %13 = vector.load %arg10[%c0_22, %c0_23, %c0_24] : memref<18x24x128xf32, #tpu.memory_space<vmem>>, vector<18x1x128xf32>
    tpu.vector_store %arg10[%c0_22, %c0_23, %c0_24], %12 {strides = array<i32>} : memref<18x24x128xf32, #tpu.memory_space<vmem>>, vector<18x1x128xf32>,
    %cst_25 = arith.constant 0.000000e+00 : f32
    %14 = vector.broadcast %cst_25 : f32 to vector<18x1x128xf32>
    %c0_26 = arith.constant 0 : index
    %c17_27 = arith.constant 17 : index
    %c0_28 = arith.constant 0 : index
    %15 = vector.load %arg10[%c0_26, %c17_27, %c0_28] : memref<18x24x128xf32, #tpu.memory_space<vmem>>, vector<18x1x128xf32>
    tpu.vector_store %arg10[%c0_26, %c17_27, %c0_28], %14 {strides = array<i32>} : memref<18x24x128xf32, #tpu.memory_space<vmem>>, vector<18x1x128xf32>,
    %c0_29 = arith.constant 0 : index
    %c0_30 = arith.constant 0 : index
    %c0_31 = arith.constant 0 : index
    %16 = vector.load %arg1[%c0_29, %c0_30, %c0_31] : memref<1x256x128xbf16, #tpu.memory_space<vmem>>, vector<1x256x128xbf16>
    %17 = vector.shape_cast %16 : vector<1x256x128xbf16> to vector<256x128xbf16>
    %c0_32 = arith.constant 0 : index
    %c0_33 = arith.constant 0 : index
    %18 = vector.load %arg2[%c0_32, %c0_33] : memref<128x256xbf16, #tpu.memory_space<vmem>>, vector<128x256xbf16>
    %cst_34 = arith.constant dense<0.000000e+00> : vector<256x256xf32>
    %19 = tpu.matmul %17, %18, %cst_34 {dimension_numbers = #tpu.dot_dimension_numbers<[1], [0], [0], [1], [0, 0, 1, 1], [], []>} : vector<256x128xbf16>, vector<128x256xbf16>, vector<256x256xf32> -> vector<256x256xf32>
    %c0_35 = arith.constant 0 : index
    %c0_36 = arith.constant 0 : index
    %20 = vector.load %arg3[%c0_35, %c0_36] : memref<1x256xf32, #tpu.memory_space<vmem>>, vector<1x256xf32>
    %21 = vector.broadcast %20 : vector<1x256xf32> to vector<256x256xf32>
    %22 = arith.addf %19, %21 : vector<256x256xf32>
    %cst_37 = arith.constant 0.000000e+00 : f32
    %23 = vector.broadcast %cst_37 : f32 to vector<256x256xf32>
    %24 = arith.maximumf %22, %23 : vector<256x256xf32>
    %25 = vector.extract_strided_slice %24 {offsets = [0, 0], sizes = [256, 128], strides = [1, 1]} : vector<256x256xf32> to vector<256x128xf32>
    %26 = vector.extract_strided_slice %24 {offsets = [0, 128], sizes = [256, 64], strides = [1, 1]} : vector<256x256xf32> to vector<256x64xf32>
    %27 = vector.shape_cast %26 : vector<256x64xf32> to vector<16x16x64xf32>
    %c1 = arith.constant 1 : index
    %c1_38 = arith.constant 1 : index
    %c0_39 = arith.constant 0 : index
    %28 = vector.load %arg9[%c1, %c1_38, %c0_39] : memref<18x24x64xf32, #tpu.memory_space<vmem>>, vector<16x16x64xf32>
    tpu.vector_store %arg9[%c1, %c1_38, %c0_39], %27 {strides = array<i32>} : memref<18x24x64xf32, #tpu.memory_space<vmem>>, vector<16x16x64xf32>,
    %c0_40 = arith.constant 0 : index
    %c0_41 = arith.constant 0 : index
    %c0_42 = arith.constant 0 : index
    %29 = vector.load %arg9[%c0_40, %c0_41, %c0_42] : memref<18x24x64xf32, #tpu.memory_space<vmem>>, vector<16x16x64xf32>
    %30 = vector.shape_cast %29 : vector<16x16x64xf32> to vector<256x64xf32>
    %31 = arith.truncf %30 : vector<256x64xf32> to vector<256x64xbf16>
    %c0_43 = arith.constant 0 : index
    %c0_44 = arith.constant 0 : index
    %32 = vector.load %arg11[%c0_43, %c0_44] : memref<256x576xbf16, #tpu.memory_space<vmem>>, vector<256x64xbf16>
    tpu.vector_store %arg11[%c0_43, %c0_44], %31 {strides = array<i32>} : memref<256x576xbf16, #tpu.memory_space<vmem>>, vector<256x64xbf16>,
    %c0_45 = arith.constant 0 : index
    %c1_46 = arith.constant 1 : index
    %c0_47 = arith.constant 0 : index
    %33 = vector.load %arg9[%c0_45, %c1_46, %c0_47] : memref<18x24x64xf32, #tpu.memory_space<vmem>>, vector<16x16x64xf32>
    %34 = vector.shape_cast %33 : vector<16x16x64xf32> to vector<256x64xf32>
    %35 = arith.truncf %34 : vector<256x64xf32> to vector<256x64xbf16>
    %c0_48 = arith.constant 0 : index
    %c64 = arith.constant 64 : index
    %36 = vector.load %arg11[%c0_48, %c64] : memref<256x576xbf16, #tpu.memory_space<vmem>>, vector<256x64xbf16>
    tpu.vector_store %arg11[%c0_48, %c64], %35 {strides = array<i32>} : memref<256x576xbf16, #tpu.memory_space<vmem>>, vector<256x64xbf16>,
    %c0_49 = arith.constant 0 : index
    %c2 = arith.constant 2 : index
    %c0_50 = arith.constant 0 : index
    %37 = vector.load %arg9[%c0_49, %c2, %c0_50] : memref<18x24x64xf32, #tpu.memory_space<vmem>>, vector<16x16x64xf32>
    %38 = vector.shape_cast %37 : vector<16x16x64xf32> to vector<256x64xf32>
    %39 = arith.truncf %38 : vector<256x64xf32> to vector<256x64xbf16>
    %c0_51 = arith.constant 0 : index
    %c128 = arith.constant 128 : index
    %40 = vector.load %arg11[%c0_51, %c128] : memref<256x576xbf16, #tpu.memory_space<vmem>>, vector<256x64xbf16>
    tpu.vector_store %arg11[%c0_51, %c128], %39 {strides = array<i32>} : memref<256x576xbf16, #tpu.memory_space<vmem>>, vector<256x64xbf16>,
    %c1_52 = arith.constant 1 : index
    %c0_53 = arith.constant 0 : index
    %c0_54 = arith.constant 0 : index
    %41 = vector.load %arg9[%c1_52, %c0_53, %c0_54] : memref<18x24x64xf32, #tpu.memory_space<vmem>>, vector<16x16x64xf32>
    %42 = vector.shape_cast %41 : vector<16x16x64xf32> to vector<256x64xf32>
    %43 = arith.truncf %42 : vector<256x64xf32> to vector<256x64xbf16>
    %c0_55 = arith.constant 0 : index
    %c192 = arith.constant 192 : index
    %44 = vector.load %arg11[%c0_55, %c192] : memref<256x576xbf16, #tpu.memory_space<vmem>>, vector<256x64xbf16>
    tpu.vector_store %arg11[%c0_55, %c192], %43 {strides = array<i32>} : memref<256x576xbf16, #tpu.memory_space<vmem>>, vector<256x64xbf16>,
    %c1_56 = arith.constant 1 : index
    %c1_57 = arith.constant 1 : index
    %c0_58 = arith.constant 0 : index
    %45 = vector.load %arg9[%c1_56, %c1_57, %c0_58] : memref<18x24x64xf32, #tpu.memory_space<vmem>>, vector<16x16x64xf32>
    %46 = vector.shape_cast %45 : vector<16x16x64xf32> to vector<256x64xf32>
    %47 = arith.truncf %46 : vector<256x64xf32> to vector<256x64xbf16>
    %c0_59 = arith.constant 0 : index
    %c256 = arith.constant 256 : index
    %48 = vector.load %arg11[%c0_59, %c256] : memref<256x576xbf16, #tpu.memory_space<vmem>>, vector<256x64xbf16>
    tpu.vector_store %arg11[%c0_59, %c256], %47 {strides = array<i32>} : memref<256x576xbf16, #tpu.memory_space<vmem>>, vector<256x64xbf16>,
    %c1_60 = arith.constant 1 : index
    %c2_61 = arith.constant 2 : index
    %c0_62 = arith.constant 0 : index
    %49 = vector.load %arg9[%c1_60, %c2_61, %c0_62] : memref<18x24x64xf32, #tpu.memory_space<vmem>>, vector<16x16x64xf32>
    %50 = vector.shape_cast %49 : vector<16x16x64xf32> to vector<256x64xf32>
    %51 = arith.truncf %50 : vector<256x64xf32> to vector<256x64xbf16>
    %c0_63 = arith.constant 0 : index
    %c320 = arith.constant 320 : index
    %52 = vector.load %arg11[%c0_63, %c320] : memref<256x576xbf16, #tpu.memory_space<vmem>>, vector<256x64xbf16>
    tpu.vector_store %arg11[%c0_63, %c320], %51 {strides = array<i32>} : memref<256x576xbf16, #tpu.memory_space<vmem>>, vector<256x64xbf16>,
    %c2_64 = arith.constant 2 : index
    %c0_65 = arith.constant 0 : index
    %c0_66 = arith.constant 0 : index
    %53 = vector.load %arg9[%c2_64, %c0_65, %c0_66] : memref<18x24x64xf32, #tpu.memory_space<vmem>>, vector<16x16x64xf32>
    %54 = vector.shape_cast %53 : vector<16x16x64xf32> to vector<256x64xf32>
    %55 = arith.truncf %54 : vector<256x64xf32> to vector<256x64xbf16>
    %c0_67 = arith.constant 0 : index
    %c384 = arith.constant 384 : index
    %56 = vector.load %arg11[%c0_67, %c384] : memref<256x576xbf16, #tpu.memory_space<vmem>>, vector<256x64xbf16>
    tpu.vector_store %arg11[%c0_67, %c384], %55 {strides = array<i32>} : memref<256x576xbf16, #tpu.memory_space<vmem>>, vector<256x64xbf16>,
    %c2_68 = arith.constant 2 : index
    %c1_69 = arith.constant 1 : index
    %c0_70 = arith.constant 0 : index
    %57 = vector.load %arg9[%c2_68, %c1_69, %c0_70] : memref<18x24x64xf32, #tpu.memory_space<vmem>>, vector<16x16x64xf32>
    %58 = vector.shape_cast %57 : vector<16x16x64xf32> to vector<256x64xf32>
    %59 = arith.truncf %58 : vector<256x64xf32> to vector<256x64xbf16>
    %c0_71 = arith.constant 0 : index
    %c448 = arith.constant 448 : index
    %60 = vector.load %arg11[%c0_71, %c448] : memref<256x576xbf16, #tpu.memory_space<vmem>>, vector<256x64xbf16>
    tpu.vector_store %arg11[%c0_71, %c448], %59 {strides = array<i32>} : memref<256x576xbf16, #tpu.memory_space<vmem>>, vector<256x64xbf16>,
    %c2_72 = arith.constant 2 : index
    %c2_73 = arith.constant 2 : index
    %c0_74 = arith.constant 0 : index
    %61 = vector.load %arg9[%c2_72, %c2_73, %c0_74] : memref<18x24x64xf32, #tpu.memory_space<vmem>>, vector<16x16x64xf32>
    %62 = vector.shape_cast %61 : vector<16x16x64xf32> to vector<256x64xf32>
    %63 = arith.truncf %62 : vector<256x64xf32> to vector<256x64xbf16>
    %c0_75 = arith.constant 0 : index
    %c512 = arith.constant 512 : index
    %64 = vector.load %arg11[%c0_75, %c512] : memref<256x576xbf16, #tpu.memory_space<vmem>>, vector<256x64xbf16>
    tpu.vector_store %arg11[%c0_75, %c512], %63 {strides = array<i32>} : memref<256x576xbf16, #tpu.memory_space<vmem>>, vector<256x64xbf16>,
    %c0_76 = arith.constant 0 : index
    %c0_77 = arith.constant 0 : index
    %65 = vector.load %arg11[%c0_76, %c0_77] : memref<256x576xbf16, #tpu.memory_space<vmem>>, vector<256x576xbf16>
    %c0_78 = arith.constant 0 : index
    %c0_79 = arith.constant 0 : index
    %66 = vector.load %arg4[%c0_78, %c0_79] : memref<576x128xbf16, #tpu.memory_space<vmem>>, vector<576x128xbf16>
    %cst_80 = arith.constant dense<0.000000e+00> : vector<256x128xf32>
    %67 = tpu.matmul %65, %66, %cst_80 {dimension_numbers = #tpu.dot_dimension_numbers<[1], [0], [0], [1], [0, 0, 1, 1], [], []>} : vector<256x576xbf16>, vector<576x128xbf16>, vector<256x128xf32> -> vector<256x128xf32>
    %c0_81 = arith.constant 0 : index
    %c0_82 = arith.constant 0 : index
    %68 = vector.load %arg5[%c0_81, %c0_82] : memref<1x128xf32, #tpu.memory_space<vmem>>, vector<1x128xf32>
    %69 = vector.broadcast %68 : vector<1x128xf32> to vector<256x128xf32>
    %70 = arith.addf %67, %69 : vector<256x128xf32>
    %cst_83 = arith.constant 0.000000e+00 : f32
    %71 = vector.broadcast %cst_83 : f32 to vector<256x128xf32>
    %72 = arith.maximumf %70, %71 : vector<256x128xf32>
    %73 = arith.addf %25, %72 : vector<256x128xf32>
    %74 = vector.shape_cast %73 : vector<256x128xf32> to vector<16x16x128xf32>
    %c1_84 = arith.constant 1 : index
    %c1_85 = arith.constant 1 : index
    %c0_86 = arith.constant 0 : index
    %75 = vector.load %arg10[%c1_84, %c1_85, %c0_86] : memref<18x24x128xf32, #tpu.memory_space<vmem>>, vector<16x16x128xf32>
    tpu.vector_store %arg10[%c1_84, %c1_85, %c0_86], %74 {strides = array<i32>} : memref<18x24x128xf32, #tpu.memory_space<vmem>>, vector<16x16x128xf32>,
    %c0_87 = arith.constant 0 : index
    %c0_88 = arith.constant 0 : index
    %c0_89 = arith.constant 0 : index
    %76 = vector.load %arg10[%c0_87, %c0_88, %c0_89] : memref<18x24x128xf32, #tpu.memory_space<vmem>>, vector<16x16x128xf32>
    %77 = vector.shape_cast %76 : vector<16x16x128xf32> to vector<256x128xf32>
    %78 = arith.truncf %77 : vector<256x128xf32> to vector<256x128xbf16>
    %c0_90 = arith.constant 0 : index
    %c0_91 = arith.constant 0 : index
    %79 = vector.load %arg12[%c0_90, %c0_91] : memref<256x1152xbf16, #tpu.memory_space<vmem>>, vector<256x128xbf16>
    tpu.vector_store %arg12[%c0_90, %c0_91], %78 {strides = array<i32>} : memref<256x1152xbf16, #tpu.memory_space<vmem>>, vector<256x128xbf16>,
    %c0_92 = arith.constant 0 : index
    %c1_93 = arith.constant 1 : index
    %c0_94 = arith.constant 0 : index
    %80 = vector.load %arg10[%c0_92, %c1_93, %c0_94] : memref<18x24x128xf32, #tpu.memory_space<vmem>>, vector<16x16x128xf32>
    %81 = vector.shape_cast %80 : vector<16x16x128xf32> to vector<256x128xf32>
    %82 = arith.truncf %81 : vector<256x128xf32> to vector<256x128xbf16>
    %c0_95 = arith.constant 0 : index
    %c128_96 = arith.constant 128 : index
    %83 = vector.load %arg12[%c0_95, %c128_96] : memref<256x1152xbf16, #tpu.memory_space<vmem>>, vector<256x128xbf16>
    tpu.vector_store %arg12[%c0_95, %c128_96], %82 {strides = array<i32>} : memref<256x1152xbf16, #tpu.memory_space<vmem>>, vector<256x128xbf16>,
    %c0_97 = arith.constant 0 : index
    %c2_98 = arith.constant 2 : index
    %c0_99 = arith.constant 0 : index
    %84 = vector.load %arg10[%c0_97, %c2_98, %c0_99] : memref<18x24x128xf32, #tpu.memory_space<vmem>>, vector<16x16x128xf32>
    %85 = vector.shape_cast %84 : vector<16x16x128xf32> to vector<256x128xf32>
    %86 = arith.truncf %85 : vector<256x128xf32> to vector<256x128xbf16>
    %c0_100 = arith.constant 0 : index
    %c256_101 = arith.constant 256 : index
    %87 = vector.load %arg12[%c0_100, %c256_101] : memref<256x1152xbf16, #tpu.memory_space<vmem>>, vector<256x128xbf16>
    tpu.vector_store %arg12[%c0_100, %c256_101], %86 {strides = array<i32>} : memref<256x1152xbf16, #tpu.memory_space<vmem>>, vector<256x128xbf16>,
    %c1_102 = arith.constant 1 : index
    %c0_103 = arith.constant 0 : index
    %c0_104 = arith.constant 0 : index
    %88 = vector.load %arg10[%c1_102, %c0_103, %c0_104] : memref<18x24x128xf32, #tpu.memory_space<vmem>>, vector<16x16x128xf32>
    %89 = vector.shape_cast %88 : vector<16x16x128xf32> to vector<256x128xf32>
    %90 = arith.truncf %89 : vector<256x128xf32> to vector<256x128xbf16>
    %c0_105 = arith.constant 0 : index
    %c384_106 = arith.constant 384 : index
    %91 = vector.load %arg12[%c0_105, %c384_106] : memref<256x1152xbf16, #tpu.memory_space<vmem>>, vector<256x128xbf16>
    tpu.vector_store %arg12[%c0_105, %c384_106], %90 {strides = array<i32>} : memref<256x1152xbf16, #tpu.memory_space<vmem>>, vector<256x128xbf16>,
    %c1_107 = arith.constant 1 : index
    %c1_108 = arith.constant 1 : index
    %c0_109 = arith.constant 0 : index
    %92 = vector.load %arg10[%c1_107, %c1_108, %c0_109] : memref<18x24x128xf32, #tpu.memory_space<vmem>>, vector<16x16x128xf32>
    %93 = vector.shape_cast %92 : vector<16x16x128xf32> to vector<256x128xf32>
    %94 = arith.truncf %93 : vector<256x128xf32> to vector<256x128xbf16>
    %c0_110 = arith.constant 0 : index
    %c512_111 = arith.constant 512 : index
    %95 = vector.load %arg12[%c0_110, %c512_111] : memref<256x1152xbf16, #tpu.memory_space<vmem>>, vector<256x128xbf16>
    tpu.vector_store %arg12[%c0_110, %c512_111], %94 {strides = array<i32>} : memref<256x1152xbf16, #tpu.memory_space<vmem>>, vector<256x128xbf16>,
    %c1_112 = arith.constant 1 : index
    %c2_113 = arith.constant 2 : index
    %c0_114 = arith.constant 0 : index
    %96 = vector.load %arg10[%c1_112, %c2_113, %c0_114] : memref<18x24x128xf32, #tpu.memory_space<vmem>>, vector<16x16x128xf32>
    %97 = vector.shape_cast %96 : vector<16x16x128xf32> to vector<256x128xf32>
    %98 = arith.truncf %97 : vector<256x128xf32> to vector<256x128xbf16>
    %c0_115 = arith.constant 0 : index
    %c640 = arith.constant 640 : index
    %99 = vector.load %arg12[%c0_115, %c640] : memref<256x1152xbf16, #tpu.memory_space<vmem>>, vector<256x128xbf16>
    tpu.vector_store %arg12[%c0_115, %c640], %98 {strides = array<i32>} : memref<256x1152xbf16, #tpu.memory_space<vmem>>, vector<256x128xbf16>,
    %c2_116 = arith.constant 2 : index
    %c0_117 = arith.constant 0 : index
    %c0_118 = arith.constant 0 : index
    %100 = vector.load %arg10[%c2_116, %c0_117, %c0_118] : memref<18x24x128xf32, #tpu.memory_space<vmem>>, vector<16x16x128xf32>
    %101 = vector.shape_cast %100 : vector<16x16x128xf32> to vector<256x128xf32>
    %102 = arith.truncf %101 : vector<256x128xf32> to vector<256x128xbf16>
    %c0_119 = arith.constant 0 : index
    %c768 = arith.constant 768 : index
    %103 = vector.load %arg12[%c0_119, %c768] : memref<256x1152xbf16, #tpu.memory_space<vmem>>, vector<256x128xbf16>
    tpu.vector_store %arg12[%c0_119, %c768], %102 {strides = array<i32>} : memref<256x1152xbf16, #tpu.memory_space<vmem>>, vector<256x128xbf16>,
    %c2_120 = arith.constant 2 : index
    %c1_121 = arith.constant 1 : index
    %c0_122 = arith.constant 0 : index
    %104 = vector.load %arg10[%c2_120, %c1_121, %c0_122] : memref<18x24x128xf32, #tpu.memory_space<vmem>>, vector<16x16x128xf32>
    %105 = vector.shape_cast %104 : vector<16x16x128xf32> to vector<256x128xf32>
    %106 = arith.truncf %105 : vector<256x128xf32> to vector<256x128xbf16>
    %c0_123 = arith.constant 0 : index
    %c896 = arith.constant 896 : index
    %107 = vector.load %arg12[%c0_123, %c896] : memref<256x1152xbf16, #tpu.memory_space<vmem>>, vector<256x128xbf16>
    tpu.vector_store %arg12[%c0_123, %c896], %106 {strides = array<i32>} : memref<256x1152xbf16, #tpu.memory_space<vmem>>, vector<256x128xbf16>,
    %c2_124 = arith.constant 2 : index
    %c2_125 = arith.constant 2 : index
    %c0_126 = arith.constant 0 : index
    %108 = vector.load %arg10[%c2_124, %c2_125, %c0_126] : memref<18x24x128xf32, #tpu.memory_space<vmem>>, vector<16x16x128xf32>
    %109 = vector.shape_cast %108 : vector<16x16x128xf32> to vector<256x128xf32>
    %110 = arith.truncf %109 : vector<256x128xf32> to vector<256x128xbf16>
    %c0_127 = arith.constant 0 : index
    %c1024 = arith.constant 1024 : index
    %111 = vector.load %arg12[%c0_127, %c1024] : memref<256x1152xbf16, #tpu.memory_space<vmem>>, vector<256x128xbf16>
    tpu.vector_store %arg12[%c0_127, %c1024], %110 {strides = array<i32>} : memref<256x1152xbf16, #tpu.memory_space<vmem>>, vector<256x128xbf16>,
    %c0_128 = arith.constant 0 : index
    %c0_129 = arith.constant 0 : index
    %112 = vector.load %arg12[%c0_128, %c0_129] : memref<256x1152xbf16, #tpu.memory_space<vmem>>, vector<256x1152xbf16>
    %c0_130 = arith.constant 0 : index
    %c0_131 = arith.constant 0 : index
    %113 = vector.load %arg6[%c0_130, %c0_131] : memref<1152x128xbf16, #tpu.memory_space<vmem>>, vector<1152x128xbf16>
    %cst_132 = arith.constant dense<0.000000e+00> : vector<256x128xf32>
    %114 = tpu.matmul %112, %113, %cst_132 {dimension_numbers = #tpu.dot_dimension_numbers<[1], [0], [0], [1], [0, 0, 1, 1], [], []>} : vector<256x1152xbf16>, vector<1152x128xbf16>, vector<256x128xf32> -> vector<256x128xf32>
    %c0_133 = arith.constant 0 : index
    %c0_134 = arith.constant 0 : index
    %115 = vector.load %arg7[%c0_133, %c0_134] : memref<1x128xf32, #tpu.memory_space<vmem>>, vector<1x128xf32>
    %116 = vector.broadcast %115 : vector<1x128xf32> to vector<256x128xf32>
    %117 = arith.addf %114, %116 : vector<256x128xf32>
    %cst_135 = arith.constant 0.000000e+00 : f32
    %118 = vector.broadcast %cst_135 : f32 to vector<256x128xf32>
    %119 = arith.maximumf %117, %118 : vector<256x128xf32>
    %c0_136 = arith.constant 0 : index
    %c0_137 = arith.constant 0 : index
    %c0_138 = arith.constant 0 : index
    %120 = vector.load %arg8[%c0_136, %c0_137, %c0_138] : memref<1x256x128xf32, #tpu.memory_space<vmem>>, vector<1x256x128xf32>
    %121 = vector.shape_cast %120 : vector<1x256x128xf32> to vector<256x128xf32>
    %122 = vector.shape_cast %119 : vector<256x128xf32> to vector<1x256x128xf32>
    tpu.vector_store %arg8[%c0_136, %c0_137, %c0_138], %122 {strides = array<i32>} : memref<1x256x128xf32, #tpu.memory_space<vmem>>, vector<1x256x128xf32>,
    return
  }
  func.func @transform_0(%arg0: i32) -> (i32, i32, i32) {
    %c0_i32 = arith.constant 0 : i32
    %c0_i32_0 = arith.constant 0 : i32
    %c0_i32_1 = arith.constant 0 : i32
    return %arg0, %c0_i32, %c0_i32_0 : i32, i32, i32
  }
  func.func @transform_1(%arg0: i32) -> (i32, i32) {
    %c0_i32 = arith.constant 0 : i32
    %c0_i32_0 = arith.constant 0 : i32
    %c0_i32_1 = arith.constant 0 : i32
    return %c0_i32, %c0_i32_0 : i32, i32
  }
  func.func @transform_2(%arg0: i32) -> (i32, i32) {
    %c0_i32 = arith.constant 0 : i32
    %c0_i32_0 = arith.constant 0 : i32
    %c0_i32_1 = arith.constant 0 : i32
    return %c0_i32, %c0_i32_0 : i32, i32
  }
  func.func @transform_3(%arg0: i32) -> (i32, i32) {
    %c0_i32 = arith.constant 0 : i32
    %c0_i32_0 = arith.constant 0 : i32
    %c0_i32_1 = arith.constant 0 : i32
    return %c0_i32, %c0_i32_0 : i32, i32
  }
  func.func @transform_4(%arg0: i32) -> (i32, i32) {
    %c0_i32 = arith.constant 0 : i32
    %c0_i32_0 = arith.constant 0 : i32
    %c0_i32_1 = arith.constant 0 : i32
    return %c0_i32, %c0_i32_0 : i32, i32
  }
  func.func @transform_5(%arg0: i32) -> (i32, i32) {
    %c0_i32 = arith.constant 0 : i32
    %c0_i32_0 = arith.constant 0 : i32
    %c0_i32_1 = arith.constant 0 : i32
    return %c0_i32, %c0_i32_0 : i32, i32
  }
  func.func @transform_6(%arg0: i32) -> (i32, i32) {
    %c0_i32 = arith.constant 0 : i32
    %c0_i32_0 = arith.constant 0 : i32
    %c0_i32_1 = arith.constant 0 : i32
    return %c0_i32, %c0_i32_0 : i32, i32
  }
  func.func @transform_7(%arg0: i32) -> (i32, i32, i32) {
    %c0_i32 = arith.constant 0 : i32
    %c0_i32_0 = arith.constant 0 : i32
    %c0_i32_1 = arith.constant 0 : i32
    return %arg0, %c0_i32, %c0_i32_0 : i32, i32, i32
  }
}

</mosaic_0001>

<bundles_post_ra>
// kernel: small_motion_encoder_pallas.1
= control target key start
LH: loop header
LB: loop body
LE: loop exit
PB: predicated region body
PF: predicated region fallthrough
CT: control target
= control target key end

     0   :  { %s6150_s24 = smov 0   ;;  %s7894_s0 = inlined_call_operand.vmem [shape: bf16[2,256,128], index: 0, kind: input, shape index: {}]   ;;  %s7895_s1 = inlined_call_operand.vmem [shape: bf16[128,256], index: 1, kind: input, shape index: {}]   ;;  %s7896_s2 = inlined_call_operand.vmem [shape: f32[1,256], index: 2, kind: input, shape index: {}]   ;;  %s7897_s3 = inlined_call_operand.vmem [shape: bf16[576,128], index: 3, kind: input, shape index: {}]   ;;  %s7898_s4 = inlined_call_operand.vmem [shape: f32[1,128], index: 4, kind: input, shape index: {}]   ;;  %s7899_s5 = inlined_call_operand.vmem [shape: bf16[1152,128], index: 5, kind: input, shape index: {}]   ;;  %s7900_s6 = inlined_call_operand.vmem [shape: f32[1,128], index: 6, kind: input, shape index: {}]   ;;  %s7901_s7 = inlined_call_operand.vmem [shape: f32[2,256,128], index: 7, kind: output, shape index: {}]  }
   0x1 LB: > { %s4959_s25 = sadd.s32 4294967295, %s6105_s24   ;;  %p4963_p0 = scmp.ge.s32.totalorder %s6105_s24, 1  ;;  %s6105_s24 = sphi %s6150_s24, %s17_s24  }
   0x2   : > { %p237_p1 = scmp.lt.s32.totalorder %s6105_s24, 3 }
   0x4   : > { %p238_p2 = pnand %p4963_p0, %p237_p1 }
   0x6   : > { %241 = sbr.rel (%p238_p2) target bundleno = 1287 (0x507), region = 48 }
   0xd   : > { %v5945_v0 = vld [vmem:[%s7895_s1 + $0x4] ss:$8 sps:$4 sm:$0xff]   ;;  %p269_p3 = scmp.lt.s32.totalorder %s4959_s25, 1  ;;  %v5947_v1 = vld [vmem:[%s7895_s1] ss:$8 sps:$4 sm:$0xff]   ;;  %v6107_v2 = vmov 0   ;;  %v418_v36 = vlaneseq }
   0xe   : > { %636 = vmatprep.mubr.bf16.mxu0 %v6107_v2  ;;  %604 = vmatprep.subr.bf16.mxu0 %v5945_v0  ;;  %v5948_v3 = vld [vmem:[%s7895_s1 + $0x14] ss:$8 sps:$4 sm:$0xff]   ;;  %v5950_v4 = vld [vmem:[%s7895_s1 + $0x10] ss:$8 sps:$4 sm:$0xff]   ;;  %v5951_v5 = vld [vmem:[%s7895_s1 + $0x24] ss:$8 sps:$4 sm:$0xff]  }
   0xf   : > { %s7949_s25 = smov (!%p269_p3, %s4959_s25), 1  ;;  %605 = vmatpush1.bf16.msra.mxu0 %v5947_v1  ;;  %v5953_v6 = vld [vmem:[%s7895_s1 + $0x20] ss:$8 sps:$4 sm:$0xff]   ;;  %v5954_v7 = vld [vmem:[%s7895_s1 + $0x34] ss:$8 sps:$4 sm:$0xff]   ;;  %vm280_vm0 = vcmask 523264  }
  0x10   : > { %606 = vmatprep.subr.bf16.mxu0 %v5948_v3  ;;  %s5128_s13 = sshll.u32 %s7949_s25, 7  ;;  %v5956_v8 = vld [vmem:[%s7895_s1 + $0x30] ss:$8 sps:$4 sm:$0xff]   ;;  %v5957_v9 = vld [vmem:[%s7895_s1 + $0x44] ss:$8 sps:$4 sm:$0xff]   ;;  %vm288_vm1 = vcmask 516096  }
  0x11   : > { %s6186_s20 = scalar_lea.vmem %s7894_s0, %s5128_s13  ;;  %v5959_v10 = vld [vmem:[%s7895_s1 + $0x40] ss:$8 sps:$4 sm:$0xff]   ;;  %v5960_v11 = vld [vmem:[%s7895_s1 + $0x54] ss:$8 sps:$4 sm:$0xff]   ;;  %v5962_v12 = vld [vmem:[%s7895_s1 + $0x50] ss:$8 sps:$4 sm:$0xff]  }
  0x12   : > { %v5963_v13 = vld [vmem:[%s7895_s1 + $0x64] ss:$8 sps:$4 sm:$0xff]   ;;  %v5965_v14 = vld [vmem:[%s7895_s1 + $0x60] ss:$8 sps:$4 sm:$0xff]   ;;  %v5966_v15 = vld [vmem:[%s7895_s1 + $0x74] ss:$8 sps:$4 sm:$0xff]  }
  0x13   : > { %607 = vmatpush1.bf16.msra.mxu0 %v5950_v4  ;;  %v5968_v16 = vld [vmem:[%s7895_s1 + $0x70] ss:$8 sps:$4 sm:$0xff]   ;;  %v5969_v17 = vld [vmem:[%s6186_s20] sm:$0xff]   ;;  %v5970_v18 = vld [vmem:[%s6186_s20 + $0x8] sm:$0xff]   ;;  %v6108_v29 = vmov 0.0   ;;  %v6384_v39 = vshrl.u32 %v418_v36, 7 }
  0x14   : > { %608 = vmatprep.subr.bf16.mxu0 %v5951_v5  ;;  %v5971_v19 = vld [vmem:[%s6186_s20 + $0x10] sm:$0xff]   ;;  %v5972_v20 = vld [vmem:[%s6186_s20 + $0x18] sm:$0xff]   ;;  %v5973_v21 = vld [vmem:[%s6186_s20 + $0x20] sm:$0xff]   ;;  %309 = vst.msk [vmem:[#allocation2 + $0x41] sm:$0x1] %vm288_vm1, %v6108_v29  ;;  %s6109_s16 = smov 64  }
  0x15   : > { %v5974_v22 = vld [vmem:[%s6186_s20 + $0x28] sm:$0xff]   ;;  %v5975_v23 = vld [vmem:[%s6186_s20 + $0x30] sm:$0xff]   ;;  %v5976_v24 = vld [vmem:[%s6186_s20 + $0x38] sm:$0xff]   ;;  %281 = vst.msk [vmem:[#allocation2] sm:$0xff] %vm280_vm0, %v6108_v29  ;;  %v424_v42 = vsub.s32 1, %v6384_v39  ;;  %vm1070_vm2 = vcmask 1048064  }
  0x16   : > { %v5977_v25 = vld [vmem:[%s6186_s20 + $0x40] sm:$0xff]   ;;  %v5978_v26 = vld [vmem:[%s6186_s20 + $0x48] sm:$0xff]   ;;  %v5979_v27 = vld [vmem:[%s6186_s20 + $0x50] sm:$0xff]   ;;  %282 = vst.msk [vmem:[#allocation2 + $0x8] sm:$0xff] %vm280_vm0, %v6108_v29  ;;  %s5129_s19 = sshll.u32 %s7949_s25, 8 }
  0x17   : > { %609 = vmatpush1.bf16.msra.mxu0 %v5953_v6  ;;  %v5980_v28 = vld [vmem:[%s6186_s20 + $0x58] sm:$0xff]   ;;  %283 = vst.msk [vmem:[#allocation2 + $0x10] sm:$0xff] %vm280_vm0, %v6108_v29  ;;  %285 = vst.msk [vmem:[#allocation2 + $0x198] sm:$0xff] %vm280_vm0, %v6108_v29  ;;  %v5981_v30 = vld [vmem:[%s6186_s20 + $0x60] sm:$0xff]   ;;  %s7822_s23 = scalar_lea.vmem %s7901_s7, %s5129_s19 }
  0x18   : > { %610 = vmatprep.subr.bf16.mxu0 %v5954_v7  ;;  %286 = vst.msk [vmem:[#allocation2 + $0x1a0] sm:$0xff] %vm280_vm0, %v6108_v29  ;;  %287 = vst.msk [vmem:[#allocation2 + $0x1a8] sm:$0xff] %vm280_vm0, %v6108_v29  ;;  %v5982_v31 = vld [vmem:[%s6186_s20 + $0x68] sm:$0xff]   ;;  %v5983_v32 = vld [vmem:[%s6186_s20 + $0x70] sm:$0xff]  }
  0x19   : > { %290 = vst.msk [vmem:[#allocation2 + $0x18] sm:$0x1] %vm288_vm1, %v6108_v29  ;;  %291 = vst.msk [vmem:[#allocation2 + $0x30] sm:$0x1] %vm288_vm1, %v6108_v29  ;;  %v5984_v33 = vld [vmem:[%s6186_s20 + $0x78] sm:$0xff]   ;;  %v5985_v34 = vld [vmem:[%s7897_s3 + $0x40] sm:$0xff]  }
  0x1a   : > { %292 = vst.msk [vmem:[#allocation2 + $0x48] sm:$0x1] %vm288_vm1, %v6108_v29  ;;  %293 = vst.msk [vmem:[#allocation2 + $0x60] sm:$0x1] %vm288_vm1, %v6108_v29  ;;  %v5986_v35 = vld [vmem:[%s7897_s3] sm:$0xff]   ;;  %5130 = vmatprep.subr.bf16.mxu1 %v5985_v34  ;;  %v5987_v37 = vld [vmem:[%s7897_s3 + $0x48] sm:$0xff]  }
  0x1b   : > { %611 = vmatpush1.bf16.msra.mxu0 %v5956_v8  ;;  %294 = vst.msk [vmem:[#allocation2 + $0x78] sm:$0x1] %vm288_vm1, %v6108_v29  ;;  %295 = vst.msk [vmem:[#allocation2 + $0x90] sm:$0x1] %vm288_vm1, %v6108_v29  ;;  %5131 = vmatpush3.bf16.msra.mxu1 %v5986_v35  ;;  %v5988_v38 = vld [vmem:[%s7897_s3 + $0x8] sm:$0xff]   ;;  %v5989_v40 = vld [vmem:[%s7897_s3 + $0x50] sm:$0xff]  }
  0x1c   : > { %612 = vmatprep.subr.bf16.mxu0 %v5957_v9  ;;  %296 = vst.msk [vmem:[#allocation2 + $0xa8] sm:$0x1] %vm288_vm1, %v6108_v29  ;;  %297 = vst.msk [vmem:[#allocation2 + $0xc0] sm:$0x1] %vm288_vm1, %v6108_v29  ;;  %5132 = vmatprep.subr.bf16.mxu1 %v5987_v37  ;;  %v5990_v41 = vld [vmem:[%s7897_s3 + $0x10] sm:$0xff]   ;;  %v5991_v44 = vld [vmem:[%s7897_s3 + $0x58] sm:$0xff]  }
  0x1d   : > { %298 = vst.msk [vmem:[#allocation2 + $0xd8] sm:$0x1] %vm288_vm1, %v6108_v29  ;;  %299 = vst.msk [vmem:[#allocation2 + $0xf0] sm:$0x1] %vm288_vm1, %v6108_v29  ;;  %v416_v43 = vld [vmem:[%s7896_s2] sm:$0x3] }
  0x1e   : > { %300 = vst.msk [vmem:[#allocation2 + $0x108] sm:$0x1] %vm288_vm1, %v6108_v29  ;;  %301 = vst.msk [vmem:[#allocation2 + $0x120] sm:$0x1] %vm288_vm1, %v6108_v29  ;;  %v5992_v45 = vld [vmem:[%s7897_s3 + $0x18] sm:$0xff]   ;;  %v6402_v46 = vrot.slane %v416_v43, %v424_v42  ;;  %v5993_v48 = vld [vmem:[%s7897_s3 + $0x60] sm:$0xff]  }
  0x1f   : > { %613 = vmatpush1.bf16.msra.mxu0 %v5959_v10  ;;  %302 = vst.msk [vmem:[#allocation2 + $0x138] sm:$0x1] %vm288_vm1, %v6108_v29  ;;  %303 = vst.msk [vmem:[#allocation2 + $0x150] sm:$0x1] %vm288_vm1, %v6108_v29  ;;  %5133 = vmatpush3.bf16.msra.mxu1 %v5988_v38  ;;  %v5994_v50 = vld [vmem:[%s7897_s3 + $0x20] sm:$0xff]   ;;  %v5995_v59 = vld [vmem:[%s7897_s3 + $0x68] sm:$0xff]  }
  0x20   : > { %614 = vmatprep.subr.bf16.mxu0 %v5960_v11  ;;  %304 = vst.msk [vmem:[#allocation2 + $0x168] sm:$0x1] %vm288_vm1, %v6108_v29  ;;  %305 = vst.msk [vmem:[#allocation2 + $0x180] sm:$0x1] %vm288_vm1, %v6108_v29  ;;  %5134 = vmatprep.subr.bf16.mxu1 %v5989_v40  ;;  %v1087_v53 = vld [vmem:[#allocation2 + $0x2] sm:$0xff]  ;;  %v5998_v4 = vld [vmem:[%s7897_s3 + $0x30] sm:$0xff]  }
  0x21   : > { %308 = vst.msk [vmem:[#allocation2 + $0x29] sm:$0x1] %vm288_vm1, %v6108_v29  ;;  %310 = vst.msk [vmem:[#allocation2 + $0x59] sm:$0x1] %vm288_vm1, %v6108_v29  ;;  %v5996_v60 = vld [vmem:[%s7897_s3 + $0x28] sm:$0xff]   ;;  %v5999_v8 = vld [vmem:[%s7897_s3 + $0x78] sm:$0xff]  }
  0x22   : > { %311 = vst.msk [vmem:[#allocation2 + $0x71] sm:$0x1] %vm288_vm1, %v6108_v29  ;;  %312 = vst.msk [vmem:[#allocation2 + $0x89] sm:$0x1] %vm288_vm1, %v6108_v29  ;;  %v895_v63 = vld [vmem:[#allocation2 + $0x8] sm:$0xff]  ;;  %v6000_v9 = vld [vmem:[%s7897_s3 + $0xc0] sm:$0xff]  }
  0x23   : > { %615 = vmatpush1.bf16.msra.mxu0 %v5962_v12  ;;  %313 = vst.msk [vmem:[#allocation2 + $0xa1] sm:$0x1] %vm288_vm1, %v6108_v29  ;;  %314 = vst.msk [vmem:[#allocation2 + $0xb9] sm:$0x1] %vm288_vm1, %v6108_v29  ;;  %5135 = vmatpush3.bf16.msra.mxu1 %v5990_v41  ;;  %v958_v12 = vld [vmem:[#allocation2 + $0x1] sm:$0xff] }
  0x24   : > { %616 = vmatprep.subr.bf16.mxu0 %v5963_v13  ;;  %315 = vst.msk [vmem:[#allocation2 + $0xd1] sm:$0x1] %vm288_vm1, %v6108_v29  ;;  %316 = vst.msk [vmem:[#allocation2 + $0xe9] sm:$0x1] %vm288_vm1, %v6108_v29  ;;  %5136 = vmatprep.subr.bf16.mxu1 %v5991_v44  ;;  %v6001_v13 = vld [vmem:[%s7897_s3 + $0x38] sm:$0xff]  }
  0x25   : > { %317 = vst.msk [vmem:[#allocation2 + $0x101] sm:$0x1] %vm288_vm1, %v6108_v29  ;;  %318 = vst.msk [vmem:[#allocation2 + $0x119] sm:$0x1] %vm288_vm1, %v6108_v29 }
  0x26   : > { %319 = vst.msk [vmem:[#allocation2 + $0x131] sm:$0x1] %vm288_vm1, %v6108_v29  ;;  %320 = vst.msk [vmem:[#allocation2 + $0x149] sm:$0x1] %vm288_vm1, %v6108_v29 }
  0x27   : > { %617 = vmatpush1.bf16.msra.mxu0 %v5965_v14  ;;  %321 = vst.msk [vmem:[#allocation2 + $0x161] sm:$0x1] %vm288_vm1, %v6108_v29  ;;  %322 = vst.msk [vmem:[#allocation2 + $0x179] sm:$0x1] %vm288_vm1, %v6108_v29  ;;  %5137 = vmatpush3.bf16.msra.mxu1 %v5992_v45 }
  0x28   : > { %618 = vmatprep.subr.bf16.mxu0 %v5966_v15  ;;  %323 = vst.msk [vmem:[#allocation2 + $0x191] sm:$0x1] %vm288_vm1, %v6108_v29  ;;  %325 = vst [vmem:[#allocation3] sm:$0xff] %v6108_v29  ;;  %5138 = vmatprep.subr.bf16.mxu1 %v5993_v48 }
  0x29   : > { %326 = vst [vmem:[#allocation3 + $0x8] sm:$0xff] %v6108_v29  ;;  %327 = vst [vmem:[#allocation3 + $0x10] sm:$0xff] %v6108_v29 }
  0x2a   : > { %329 = vst [vmem:[#allocation3 + $0x198] sm:$0xff] %v6108_v29  ;;  %330 = vst [vmem:[#allocation3 + $0x1a0] sm:$0xff] %v6108_v29 }
  0x2b   : > { %619 = vmatpush1.bf16.msra.mxu0 %v5968_v16  ;;  %331 = vst [vmem:[#allocation3 + $0x1a8] sm:$0xff] %v6108_v29  ;;  %333 = vst [vmem:[#allocation3 + $0x18] sm:$0x1] %v6108_v29  ;;  %5139 = vmatpush3.bf16.msra.mxu1 %v5994_v50  ;;  %v959_v16 = vld [vmem:[#allocation2 + $0x9] sm:$0xff] }
  0x2c   : > { %334 = vst [vmem:[#allocation3 + $0x30] sm:$0x1] %v6108_v29  ;;  %335 = vst [vmem:[#allocation3 + $0x48] sm:$0x1] %v6108_v29  ;;  %5140 = vmatprep.subr.bf16.mxu1 %v5995_v59  ;;  %5242 = vmatprep.subr.bf16.mxu0 %v6000_v9 }
  0x2d   : > { %336 = vst [vmem:[#allocation3 + $0x60] sm:$0x1] %v6108_v29  ;;  %337 = vst [vmem:[#allocation3 + $0x78] sm:$0x1] %v6108_v29 }
  0x2e   : > { %637 = vmatmul.mubr.bf16.vlgmr.msra.gmra.mrb[0].mxu0 %v5969_v17  ;;  %338 = vst [vmem:[#allocation3 + $0x90] sm:$0x1] %v6108_v29  ;;  %339 = vst [vmem:[#allocation3 + $0xa8] sm:$0x1] %v6108_v29  ;;  %v6002_v17 = vld [vmem:[%s7897_s3 + $0x80] sm:$0xff]  }
  0x2f   : > { %646 = vmatprep.mubr.bf16.mxu0 %v6107_v2  ;;  %340 = vst [vmem:[#allocation3 + $0xc0] sm:$0x1] %v6108_v29  ;;  %341 = vst [vmem:[#allocation3 + $0xd8] sm:$0x1] %v6108_v29  ;;  %5141 = vmatpush3.bf16.msra.mxu1 %v5996_v60 }
  0x30   : > { %342 = vst [vmem:[#allocation3 + $0xf0] sm:$0x1] %v6108_v29  ;;  %343 = vst [vmem:[#allocation3 + $0x108] sm:$0x1] %v6108_v29  ;;  %5243 = vmatpush3.bf16.msra.mxu0 %v6002_v17 }
  0x31   : > { %344 = vst [vmem:[#allocation3 + $0x120] sm:$0x1] %v6108_v29  ;;  %345 = vst [vmem:[#allocation3 + $0x138] sm:$0x1] %v6108_v29 }
  0x32   : > { %346 = vst [vmem:[#allocation3 + $0x150] sm:$0x1] %v6108_v29  ;;  %347 = vst [vmem:[#allocation3 + $0x168] sm:$0x1] %v6108_v29 }
  0x33   : > { %348 = vst [vmem:[#allocation3 + $0x180] sm:$0x1] %v6108_v29  ;;  %351 = vst [vmem:[#allocation3 + $0x29] sm:$0x1] %v6108_v29 }
  0x34   : > { %352 = vst [vmem:[#allocation3 + $0x41] sm:$0x1] %v6108_v29  ;;  %353 = vst [vmem:[#allocation3 + $0x59] sm:$0x1] %v6108_v29 }
  0x35   : > { %354 = vst [vmem:[#allocation3 + $0x71] sm:$0x1] %v6108_v29  ;;  %355 = vst [vmem:[#allocation3 + $0x89] sm:$0x1] %v6108_v29 }
  0x36   : > { %647 = vmatmul.mubr.bf16.gmra.mrb[4].mxu0 %v5970_v18  ;;  %356 = vst [vmem:[#allocation3 + $0xa1] sm:$0x1] %v6108_v29  ;;  %357 = vst [vmem:[#allocation3 + $0xb9] sm:$0x1] %v6108_v29 }
  0x37   : > { %656 = vmatprep.mubr.bf16.mxu0 %v6107_v2  ;;  %358 = vst [vmem:[#allocation3 + $0xd1] sm:$0x1] %v6108_v29  ;;  %359 = vst [vmem:[#allocation3 + $0xe9] sm:$0x1] %v6108_v29 }
  0x38   : > { %360 = vst [vmem:[#allocation3 + $0x101] sm:$0x1] %v6108_v29  ;;  %361 = vst [vmem:[#allocation3 + $0x119] sm:$0x1] %v6108_v29 }
  0x39   : > { %362 = vst [vmem:[#allocation3 + $0x131] sm:$0x1] %v6108_v29  ;;  %363 = vst [vmem:[#allocation3 + $0x149] sm:$0x1] %v6108_v29 }
  0x3a   : > { %364 = vst [vmem:[#allocation3 + $0x161] sm:$0x1] %v6108_v29  ;;  %365 = vst [vmem:[#allocation3 + $0x179] sm:$0x1] %v6108_v29 }
  0x3b   : > { %366 = vst [vmem:[#allocation3 + $0x191] sm:$0x1] %v6108_v29  ;;  %289 = vst.msk [vmem:[#allocation2] sm:$0x1] %vm288_vm1, %v6108_v29 }
  0x3c   : > { %306 = vst.msk [vmem:[#allocation2 + $0x198] sm:$0x1] %vm288_vm1, %v6108_v29  ;;  %307 = vst.msk [vmem:[#allocation2 + $0x11] sm:$0x1] %vm288_vm1, %v6108_v29 }
  0x3d   : > { %324 = vst.msk [vmem:[#allocation2 + $0x1a9] sm:$0x1] %vm288_vm1, %v6108_v29  ;;  %332 = vst [vmem:[#allocation3] sm:$0x1] %v6108_v29 }
  0x3e   : > { %657 = vmatmul.mubr.bf16.gmra.mrb[8].mxu0 %v5971_v19  ;;  %349 = vst [vmem:[#allocation3 + $0x198] sm:$0x1] %v6108_v29  ;;  %350 = vst [vmem:[#allocation3 + $0x11] sm:$0x1] %v6108_v29 }
  0x3f   : > { %666 = vmatprep.mubr.bf16.mxu0 %v6107_v2  ;;  %367 = vst [vmem:[#allocation3 + $0x1a9] sm:$0x1] %v6108_v29 }
  0x42   : > { %v894_v62 = vld [vmem:[#allocation2] sm:$0xff] }
  0x43   : > { %v1088_v54 = vld [vmem:[#allocation2 + $0xa] sm:$0xff]  ;;  %v926_v0 = vpack.c.bf16 %v895_v63, %v894_v62 }
  0x44   : > { %v1119_v56 = vpack.c.bf16 %v1088_v54, %v1087_v53  ;;  %v6004_v62 = vld [vmem:[%s7897_s3 + $0xc8] sm:$0xff]  }
  0x45   : > { %942 = vst.msk [vmem:[#allocation4] sm:$0xff] %vm280_vm0, %v926_v0  ;;  %5244 = vmatprep.subr.bf16.mxu0 %v6004_v62 }
  0x46   : > { %667 = vmatmul.mubr.bf16.gmra.mrb[12].mxu0 %v5972_v20  ;;  %1135 = vst.msk [vmem:[#allocation4 + $0x8] sm:$0xff] %vm280_vm0, %v1119_v56 }
  0x47   : > { %676 = vmatprep.mubr.bf16.mxu0 %v6107_v2 }
  0x4e   : > { %677 = vmatmul.mubr.bf16.gmra.mrb[16].mxu0 %v5973_v21 }
  0x4f   : > { %686 = vmatprep.mubr.bf16.mxu0 %v6107_v2 }
  0x56   : > { %687 = vmatmul.mubr.bf16.gmra.mrb[20].mxu0 %v5974_v22 }
  0x57   : > { %696 = vmatprep.mubr.bf16.mxu0 %v6107_v2 }
  0x5e   : > { %697 = vmatmul.mubr.bf16.gmra.mrb[24].mxu0 %v5975_v23 }
  0x5f   : > { %706 = vmatprep.mubr.bf16.mxu0 %v6107_v2 }
  0x66   : > { %707 = vmatmul.mubr.bf16.gmra.mrb[28].mxu0 %v5976_v24  ;;  %v6003_v24 = vld [vmem:[%s7897_s3 + $0x100] sm:$0xff]  }
  0x67   : > { %716 = vmatprep.mubr.bf16.mxu0 %v6107_v2 }
  0x6e   : > { %717 = vmatmul.mubr.bf16.gmra.mrb[32].mxu0 %v5977_v25 }
  0x6f   : > { %726 = vmatprep.mubr.bf16.mxu0 %v6107_v2 }
  0x76   : > { %727 = vmatmul.mubr.bf16.gmra.mrb[36].mxu0 %v5978_v26 }
  0x77   : > { %736 = vmatprep.mubr.bf16.mxu0 %v6107_v2 }
  0x7e   : > { %737 = vmatmul.mubr.bf16.gmra.mrb[40].mxu0 %v5979_v27 }
  0x7f   : > { %746 = vmatprep.mubr.bf16.mxu0 %v6107_v2 }
  0x86   : > { %747 = vmatmul.mubr.bf16.gmra.mrb[44].mxu0 %v5980_v28 }
  0x87   : > { %756 = vmatprep.mubr.bf16.mxu0 %v6107_v2 }
  0x8e   : > { %757 = vmatmul.mubr.bf16.gmra.mrb[48].mxu0 %v5981_v30 }
  0x8f   : > { %766 = vmatprep.mubr.bf16.mxu0 %v6107_v2 }
  0x96   : > { %767 = vmatmul.mubr.bf16.gmra.mrb[52].mxu0 %v5982_v31  ;;  %v990_v31 = vpack.c.bf16 %v959_v16, %v958_v12 }
  0x97   : > { %776 = vmatprep.mubr.bf16.mxu0 %v6107_v2 }
  0x9e   : > { %777 = vmatmul.mubr.bf16.gmra.mrb[56].mxu0 %v5983_v32 }
  0x9f   : > { %786 = vmatprep.mubr.bf16.mxu0 %v6107_v2  ;;  %v5997_v2 = vld [vmem:[%s7897_s3 + $0x70] sm:$0xff]  }
  0xa0   : > { %5142 = vmatprep.subr.bf16.mxu1 %v5997_v2 }
  0xa1   : > { %5143 = vmatpush3.bf16.msra.mxu1 %v5998_v4 }
  0xa2   : > { %5144 = vmatprep.subr.bf16.mxu1 %v5999_v8  ;;  %v6005_v8 = vld [vmem:[%s7897_s3 + $0x88] sm:$0xff]  }
  0xa3   : > { %5245 = vmatpush3.bf16.msra.mxu0 %v6005_v8 }
  0xa5   : > { %5145 = vmatpush3.bf16.msra.mxu1 %v6001_v13 }
  0xa6   : > { %787 = vmatmul.mubr.bf16.gmra.mrb[60].mxu0 %v5984_v33  ;;  %5846 = vmatprep.subr.bf16.mxu1 %v6003_v24 }
 0x101   : > { %v6404_v47 = vpop.f32.mrb[0].mxu0 }
 0x102   : > { %v640_v49 = vpop.f32.mrb[1].mxu0 }
 0x103   : > { %v641_v51 = vadd.f32 %v640_v49, %v6402_v46  ;;  %v6413_v52 = vpop.f32.mrb[2].mxu0 }
 0x104   : > { %v644_v55 = vpop.f32.mrb[3].mxu0 }
 0x105   : > { %v798_v57 = vmax.f32 %v641_v51, 0.0  ;;  %v645_v58 = vadd.f32 %v644_v55, %v6402_v46 }
 0x107   : > { %862 = vst.msk [vmem:[#allocation2 + $0x19] sm:$0xff] %vm280_vm0, %v798_v57  ;;  %v800_v61 = vmax.f32 %v645_v58, 0.0 }
 0x109   : > { %863 = vst.msk [vmem:[#allocation2 + $0x21] sm:$0xff] %vm280_vm0, %v800_v61  ;;  %v6425_v1 = vpop.f32.mrb[4].mxu0 }
 0x10a   : > { %v650_v3 = vpop.f32.mrb[5].mxu0 }
 0x10b   : > { %v651_v5 = vadd.f32 %v650_v3, %v6402_v46  ;;  %v6435_v6 = vpop.f32.mrb[6].mxu0 }
 0x10c   : > { %v654_v7 = vpop.f32.mrb[7].mxu0 }
 0x10d   : > { %v802_v10 = vmax.f32 %v651_v5, 0.0  ;;  %v655_v11 = vadd.f32 %v654_v7, %v6402_v46 }
 0x10e   : > { %v1151_v15 = vld [vmem:[#allocation2 + $0x18] sm:$0xff] }
 0x10f   : > { %864 = vst.msk [vmem:[#allocation2 + $0x31] sm:$0xff] %vm280_vm0, %v802_v10  ;;  %v804_v14 = vmax.f32 %v655_v11, 0.0  ;;  %v1279_v20 = vld [vmem:[#allocation2 + $0x19] sm:$0xff] }
 0x110   : > { %v1152_v18 = vld [vmem:[#allocation2 + $0x20] sm:$0xff] }
 0x111   : > { %v1343_v19 = vld [vmem:[#allocation2 + $0x1a] sm:$0xff]  ;;  %865 = vst.msk [vmem:[#allocation2 + $0x39] sm:$0xff] %vm280_vm0, %v804_v14  ;;  %v6452_v21 = vpop.f32.mrb[8].mxu0  ;;  %v1183_v22 = vpack.c.bf16 %v1152_v18, %v1151_v15  ;;  %v1344_v23 = vld [vmem:[#allocation2 + $0x22] sm:$0xff] }
 0x112   : > { %v1280_v25 = vld [vmem:[#allocation2 + $0x21] sm:$0xff]  ;;  %v660_v26 = vpop.f32.mrb[9].mxu0  ;;  %v6457_v27 = vpack.c.bf16 %v1344_v23, %v1343_v19  ;;  %v960_v61 = vld [vmem:[#allocation2 + $0x19] sm:$0xff] }
 0x113   : > { %v1311_v28 = vpack.c.bf16 %v1280_v25, %v1279_v20  ;;  %v661_v29 = vadd.f32 %v660_v26, %v6402_v46  ;;  %v6460_v30 = vpop.f32.mrb[10].mxu0  ;;  %1215 = vrot.lane.b32.xlu0 %v1183_v22, %s6109_s16  ;;  %943 = vst.msk [vmem:[#allocation4 + $0x28] sm:$0xff] %vm280_vm0, %v1183_v22  ;;  %v961_v41 = vld [vmem:[#allocation2 + $0x21] sm:$0xff] }
 0x114   : > { %v664_v32 = vpop.f32.mrb[11].mxu0  ;;  %1136 = vst.msk [vmem:[#allocation4 + $0x30] sm:$0xff] %vm280_vm0, %v6457_v27  ;;  %v991_v2 = vpack.c.bf16 %v961_v41, %v960_v61 }
 0x115   : > { %1327 = vst.msk [vmem:[#allocation4 + $0x10] sm:$0xff] %vm280_vm0, %v1311_v28  ;;  %v806_v33 = vmax.f32 %v661_v29, 0.0  ;;  %v665_v34 = vadd.f32 %v664_v32, %v6402_v46 }
 0x116   : > { %v1153_v36 = vld [vmem:[#allocation2 + $0x30] sm:$0xff] }
 0x117   : > { %866 = vst.msk [vmem:[#allocation2 + $0x49] sm:$0xff] %vm280_vm0, %v806_v33  ;;  %v808_v35 = vmax.f32 %v665_v34, 0.0  ;;  %1022 = vrot.lane.b32.xlu0 %v990_v31, %s6109_s16  ;;  %v1281_v49 = vld [vmem:[#allocation2 + $0x31] sm:$0xff] }
 0x118   : > { %v1664_v37 = vld [vmem:[#allocation2 + $0x32] sm:$0xff]  ;;  %v1665_v38 = vld [vmem:[#allocation2 + $0x3a] sm:$0xff] }
 0x119   : > { %v1154_v40 = vld [vmem:[#allocation2 + $0x38] sm:$0xff]  ;;  %v1696_v42 = vpack.c.bf16 %v1665_v38, %v1664_v37  ;;  %867 = vst.msk [vmem:[#allocation2 + $0x51] sm:$0xff] %vm280_vm0, %v808_v35  ;;  %v6471_v43 = vpop.f32.mrb[12].mxu0  ;;  %v1472_v54 = vld [vmem:[#allocation2 + $0x30] sm:$0xff] }
 0x11a   : > { %v1184_v44 = vpack.c.bf16 %v1154_v40, %v1153_v36  ;;  %v1345_v45 = vld [vmem:[#allocation2 + $0x32] sm:$0xff]  ;;  %v1346_v48 = vld [vmem:[#allocation2 + $0x3a] sm:$0xff]  ;;  %v670_v50 = vpop.f32.mrb[13].mxu0 }
 0x11b   : > { %v6473_v51 = vpack.c.bf16 %v1346_v48, %v1345_v45  ;;  %v1282_v53 = vld [vmem:[#allocation2 + $0x39] sm:$0xff]  ;;  %1712 = vst.msk [vmem:[#allocation4 + $0x20] sm:$0xff] %vm280_vm0, %v1696_v42  ;;  %v671_v56 = vadd.f32 %v670_v50, %v6402_v46  ;;  %v6477_v57 = vpop.f32.mrb[14].mxu0  ;;  %v962_v4 = vld [vmem:[#allocation2 + $0x31] sm:$0xff] }
 0x11c   : > { %v1473_v55 = vld [vmem:[#allocation2 + $0x38] sm:$0xff]  ;;  %1217 = vrot.lane.b32.xlu1 %v1184_v44, %s6109_s16  ;;  %944 = vst.msk [vmem:[#allocation4 + $0x50] sm:$0xff] %vm280_vm0, %v1184_v44  ;;  %v1312_v58 = vpack.c.bf16 %v1282_v53, %v1281_v49  ;;  %v674_v60 = vpop.f32.mrb[15].mxu0 }
 0x11d   : > { %v1504_v59 = vpack.c.bf16 %v1473_v55, %v1472_v54  ;;  %1137 = vst.msk [vmem:[#allocation4 + $0x58] sm:$0xff] %vm280_vm0, %v6473_v51  ;;  %v810_v63 = vmax.f32 %v671_v56, 0.0  ;;  %v675_v0 = vadd.f32 %v674_v60, %v6402_v46  ;;  %v963_v5 = vld [vmem:[#allocation2 + $0x39] sm:$0xff] }
 0x11e   : > { %1328 = vst.msk [vmem:[#allocation4 + $0x38] sm:$0xff] %vm280_vm0, %v1312_v58  ;;  %v1155_v3 = vld [vmem:[#allocation2 + $0x48] sm:$0xff]  ;;  %v6499_v17 = vpack.c.bf16 %v963_v5, %v962_v4  ;;  %v6006_v5 = vld [vmem:[%s7897_s3 + $0xd0] sm:$0xff]  }
 0x11f   : > { %1520 = vst.msk [vmem:[#allocation4 + $0x18] sm:$0xff] %vm280_vm0, %v1504_v59  ;;  %868 = vst.msk [vmem:[#allocation2 + $0x61] sm:$0xff] %vm280_vm0, %v810_v63  ;;  %v812_v7 = vmax.f32 %v675_v0, 0.0  ;;  %v1283_v9 = vld [vmem:[#allocation2 + $0x49] sm:$0xff]  ;;  %5246 = vmatprep.subr.bf16.mxu0 %v6006_v5 }
 0x120   : > { %1024 = vrot.lane.b32.xlu1 %v991_v2, %s6109_s16  ;;  %v1474_v10 = vld [vmem:[#allocation2 + $0x48] sm:$0xff]  ;;  %v1667_v12 = vld [vmem:[#allocation2 + $0x52] sm:$0xff] }
 0x121   : > { %v1666_v11 = vld [vmem:[#allocation2 + $0x4a] sm:$0xff]  ;;  %869 = vst.msk [vmem:[#allocation2 + $0x69] sm:$0xff] %vm280_vm0, %v812_v7  ;;  %v6497_v15 = vpop.f32.mrb[16].mxu0  ;;  %v1094_v20 = vld [vmem:[#allocation2 + $0x52] sm:$0xff] }
 0x122   : > { %v1156_v13 = vld [vmem:[#allocation2 + $0x50] sm:$0xff]  ;;  %v6494_v14 = vpack.c.bf16 %v1667_v12, %v1666_v11  ;;  %v680_v22 = vpop.f32.mrb[17].mxu0 }
 0x123   : > { %v1185_v16 = vpack.c.bf16 %v1156_v13, %v1155_v3  ;;  %v964_v18 = vld [vmem:[#allocation2 + $0x49] sm:$0xff]  ;;  %v965_v23 = vld [vmem:[#allocation2 + $0x51] sm:$0xff]  ;;  %v681_v28 = vadd.f32 %v680_v22, %v6402_v46  ;;  %v6504_v29 = vpop.f32.mrb[18].mxu0 }
 0x124   : > { %v1093_v19 = vld [vmem:[#allocation2 + $0x4a] sm:$0xff]  ;;  %1713 = vst.msk [vmem:[#allocation4 + $0x48] sm:$0xff] %vm280_vm0, %v6494_v14  ;;  %1026 = vrot.lane.b32.xlu1 %v6499_v17, %s6109_s16  ;;  %v684_v33 = vpop.f32.mrb[19].mxu0  ;;  %v6512_v36 = vpack.c.bf16 %v965_v23, %v964_v18 }
 0x125   : > { %v1122_v24 = vpack.c.bf16 %v1094_v20, %v1093_v19  ;;  %v1284_v25 = vld [vmem:[#allocation2 + $0x51] sm:$0xff]  ;;  %1219 = vrot.lane.b32.xlu0 %v1185_v16, %s6109_s16  ;;  %945 = vst.msk [vmem:[#allocation4 + $0x78] sm:$0xff] %vm280_vm0, %v1185_v16  ;;  %v814_v34 = vmax.f32 %v681_v28, 0.0  ;;  %v685_v35 = vadd.f32 %v684_v33, %v6402_v46 }
 0x126   : > { %v1475_v26 = vld [vmem:[#allocation2 + $0x50] sm:$0xff]  ;;  %v1313_v31 = vpack.c.bf16 %v1284_v25, %v1283_v9  ;;  %v1157_v37 = vld [vmem:[#allocation2 + $0x60] sm:$0xff] }
 0x127   : > { %v1505_v32 = vpack.c.bf16 %v1475_v26, %v1474_v10  ;;  %1138 = vst.msk [vmem:[#allocation4 + $0x80] sm:$0xff] %vm280_vm0, %v1122_v24  ;;  %870 = vst.msk [vmem:[#allocation2 + $0x79] sm:$0xff] %vm280_vm0, %v814_v34  ;;  %v816_v38 = vmax.f32 %v685_v35, 0.0  ;;  %v966_v40 = vld [vmem:[#allocation2 + $0x61] sm:$0xff]  ;;  %v6007_v12 = vld [vmem:[%s7897_s3 + $0x90] sm:$0xff]  }
 0x128   : > { %1329 = vst.msk [vmem:[#allocation4 + $0x60] sm:$0xff] %vm280_vm0, %v1313_v31  ;;  %1028 = vrot.lane.b32.xlu1 %v6512_v36, %s6109_s16  ;;  %v1285_v41 = vld [vmem:[#allocation2 + $0x61] sm:$0xff]  ;;  %v1669_v45 = vld [vmem:[#allocation2 + $0x6a] sm:$0xff]  ;;  %5247 = vmatpush3.bf16.msra.mxu0 %v6007_v12 }
 0x129   : > { %1521 = vst.msk [vmem:[#allocation4 + $0x40] sm:$0xff] %vm280_vm0, %v1505_v32  ;;  %v1476_v42 = vld [vmem:[#allocation2 + $0x60] sm:$0xff]  ;;  %v1158_v48 = vld [vmem:[#allocation2 + $0x68] sm:$0xff]  ;;  %871 = vst.msk [vmem:[#allocation2 + $0x81] sm:$0xff] %vm280_vm0, %v816_v38  ;;  %v6522_v50 = vpop.f32.mrb[20].mxu0 }
 0x12a   : > { %v1668_v44 = vld [vmem:[#allocation2 + $0x62] sm:$0xff]  ;;  %v1186_v53 = vpack.c.bf16 %v1158_v48, %v1157_v37  ;;  %v1096_v56 = vld [vmem:[#allocation2 + $0x6a] sm:$0xff]  ;;  %v690_v58 = vpop.f32.mrb[21].mxu0 }
 0x12b   : > { %v6519_v49 = vpack.c.bf16 %v1669_v45, %v1668_v44  ;;  %v967_v54 = vld [vmem:[#allocation2 + $0x69] sm:$0xff]  ;;  %v691_v63 = vadd.f32 %v690_v58, %v6402_v46  ;;  %v6529_v0 = vpop.f32.mrb[22].mxu0 }
 0x12c   : > { %v1095_v55 = vld [vmem:[#allocation2 + $0x62] sm:$0xff]  ;;  %v6524_v59 = vpack.c.bf16 %v967_v54, %v966_v40  ;;  %1221 = vrot.lane.b32.xlu0 %v1186_v53, %s6109_s16  ;;  %946 = vst.msk [vmem:[#allocation4 + $0xa0] sm:$0xff] %vm280_vm0, %v1186_v53  ;;  %v694_v4 = vpop.f32.mrb[23].mxu0 }
 0x12d   : > { %v1123_v60 = vpack.c.bf16 %v1096_v56, %v1095_v55  ;;  %v1286_v61 = vld [vmem:[#allocation2 + $0x69] sm:$0xff]  ;;  %1714 = vst.msk [vmem:[#allocation4 + $0x70] sm:$0xff] %vm280_vm0, %v6519_v49  ;;  %v818_v7 = vmax.f32 %v691_v63, 0.0  ;;  %v695_v8 = vadd.f32 %v694_v4, %v6402_v46 }
 0x12e   : > { %v1477_v62 = vld [vmem:[#allocation2 + $0x68] sm:$0xff]  ;;  %v1314_v2 = vpack.c.bf16 %v1286_v61, %v1285_v41  ;;  %1030 = vrot.lane.b32.xlu1 %v6524_v59, %s6109_s16  ;;  %v1159_v9 = vld [vmem:[#allocation2 + $0x78] sm:$0xff] }
 0x12f   : > { %v1506_v3 = vpack.c.bf16 %v1477_v62, %v1476_v42  ;;  %1139 = vst.msk [vmem:[#allocation4 + $0xa8] sm:$0xff] %vm280_vm0, %v1123_v60  ;;  %v968_v10 = vld [vmem:[#allocation2 + $0x79] sm:$0xff]  ;;  %872 = vst.msk [vmem:[#allocation2 + $0x91] sm:$0xff] %vm280_vm0, %v818_v7  ;;  %v820_v11 = vmax.f32 %v695_v8, 0.0 }
 0x130   : > { %1330 = vst.msk [vmem:[#allocation4 + $0x88] sm:$0xff] %vm280_vm0, %v1314_v2  ;;  %v1287_v13 = vld [vmem:[#allocation2 + $0x79] sm:$0xff]  ;;  %v1671_v19 = vld [vmem:[#allocation2 + $0x82] sm:$0xff] }
 0x131   : > { %1522 = vst.msk [vmem:[#allocation4 + $0x68] sm:$0xff] %vm280_vm0, %v1506_v3  ;;  %v1478_v16 = vld [vmem:[#allocation2 + $0x78] sm:$0xff]  ;;  %v1160_v20 = vld [vmem:[#allocation2 + $0x80] sm:$0xff]  ;;  %873 = vst.msk [vmem:[#allocation2 + $0x99] sm:$0xff] %vm280_vm0, %v820_v11  ;;  %v6549_v23 = vpop.f32.mrb[24].mxu0 }
 0x132   : > { %v1670_v18 = vld [vmem:[#allocation2 + $0x7a] sm:$0xff]  ;;  %v1187_v24 = vpack.c.bf16 %v1160_v20, %v1159_v9  ;;  %v1098_v28 = vld [vmem:[#allocation2 + $0x82] sm:$0xff]  ;;  %v700_v31 = vpop.f32.mrb[25].mxu0 }
 0x133   : > { %v6546_v22 = vpack.c.bf16 %v1671_v19, %v1670_v18  ;;  %v969_v25 = vld [vmem:[#allocation2 + $0x81] sm:$0xff]  ;;  %v701_v37 = vadd.f32 %v700_v31, %v6402_v46  ;;  %v6556_v38 = vpop.f32.mrb[26].mxu0  ;;  %v6009_v20 = vld [vmem:[%s7897_s3 + $0xd8] sm:$0xff]  }
 0x134   : > { %v1097_v26 = vld [vmem:[#allocation2 + $0x7a] sm:$0xff]  ;;  %v6551_v32 = vpack.c.bf16 %v969_v25, %v968_v10  ;;  %1223 = vrot.lane.b32.xlu0 %v1187_v24, %s6109_s16  ;;  %947 = vst.msk [vmem:[#allocation4 + $0xc8] sm:$0xff] %vm280_vm0, %v1187_v24  ;;  %v704_v42 = vpop.f32.mrb[27].mxu0  ;;  %5248 = vmatprep.subr.bf16.mxu0 %v6009_v20 }
 0x135   : > { %v1124_v33 = vpack.c.bf16 %v1098_v28, %v1097_v26  ;;  %v1288_v34 = vld [vmem:[#allocation2 + $0x81] sm:$0xff]  ;;  %1715 = vst.msk [vmem:[#allocation4 + $0x98] sm:$0xff] %vm280_vm0, %v6546_v22  ;;  %v822_v44 = vmax.f32 %v701_v37, 0.0  ;;  %v705_v45 = vadd.f32 %v704_v42, %v6402_v46 }
 0x136   : > { %v1479_v35 = vld [vmem:[#allocation2 + $0x80] sm:$0xff]  ;;  %v1315_v40 = vpack.c.bf16 %v1288_v34, %v1287_v13  ;;  %1032 = vrot.lane.b32.xlu1 %v6551_v32, %s6109_s16  ;;  %v1161_v48 = vld [vmem:[#allocation2 + $0x90] sm:$0xff] }
 0x137   : > { %v1507_v41 = vpack.c.bf16 %v1479_v35, %v1478_v16  ;;  %1140 = vst.msk [vmem:[#allocation4 + $0xd0] sm:$0xff] %vm280_vm0, %v1124_v33  ;;  %874 = vst.msk [vmem:[#allocation2 + $0xa9] sm:$0xff] %vm280_vm0, %v822_v44  ;;  %v824_v53 = vmax.f32 %v705_v45, 0.0  ;;  %v970_v54 = vld [vmem:[#allocation2 + $0x91] sm:$0xff] }
 0x138   : > { %1331 = vst.msk [vmem:[#allocation4 + $0xb0] sm:$0xff] %vm280_vm0, %v1315_v40  ;;  %v1289_v55 = vld [vmem:[#allocation2 + $0x91] sm:$0xff]  ;;  %v1673_v60 = vld [vmem:[#allocation2 + $0x9a] sm:$0xff] }
 0x139   : > { %1523 = vst.msk [vmem:[#allocation4 + $0x90] sm:$0xff] %vm280_vm0, %v1507_v41  ;;  %v1480_v56 = vld [vmem:[#allocation2 + $0x90] sm:$0xff]  ;;  %v1162_v61 = vld [vmem:[#allocation2 + $0x98] sm:$0xff]  ;;  %875 = vst.msk [vmem:[#allocation2 + $0xb1] sm:$0xff] %vm280_vm0, %v824_v53  ;;  %v6570_v63 = vpop.f32.mrb[28].mxu0 }
 0x13a   : > { %v1672_v58 = vld [vmem:[#allocation2 + $0x92] sm:$0xff]  ;;  %v1188_v2 = vpack.c.bf16 %v1162_v61, %v1161_v48  ;;  %v1100_v5 = vld [vmem:[#allocation2 + $0x9a] sm:$0xff]  ;;  %v710_v7 = vpop.f32.mrb[29].mxu0 }
 0x13b   : > { %v6567_v62 = vpack.c.bf16 %v1673_v60, %v1672_v58  ;;  %v971_v3 = vld [vmem:[#allocation2 + $0x99] sm:$0xff]  ;;  %v711_v12 = vadd.f32 %v710_v7, %v6402_v46  ;;  %v6577_v13 = vpop.f32.mrb[30].mxu0 }
 0x13c   : > { %v1099_v4 = vld [vmem:[#allocation2 + $0x92] sm:$0xff]  ;;  %v6572_v8 = vpack.c.bf16 %v971_v3, %v970_v54  ;;  %1225 = vrot.lane.b32.xlu0 %v1188_v2, %s6109_s16  ;;  %948 = vst.msk [vmem:[#allocation4 + $0xf0] sm:$0xff] %vm280_vm0, %v1188_v2  ;;  %v714_v19 = vpop.f32.mrb[31].mxu0 }
 0x13d   : > { %v1125_v9 = vpack.c.bf16 %v1100_v5, %v1099_v4  ;;  %v1290_v10 = vld [vmem:[#allocation2 + $0x99] sm:$0xff]  ;;  %1716 = vst.msk [vmem:[#allocation4 + $0xc0] sm:$0xff] %vm280_vm0, %v6567_v62  ;;  %v826_v24 = vmax.f32 %v711_v12, 0.0  ;;  %v715_v25 = vadd.f32 %v714_v19, %v6402_v46 }
 0x13e   : > { %v1481_v11 = vld [vmem:[#allocation2 + $0x98] sm:$0xff]  ;;  %v1316_v16 = vpack.c.bf16 %v1290_v10, %v1289_v55  ;;  %1034 = vrot.lane.b32.xlu1 %v6572_v8, %s6109_s16  ;;  %v1163_v26 = vld [vmem:[#allocation2 + $0xa8] sm:$0xff] }
 0x13f   : > { %v1508_v18 = vpack.c.bf16 %v1481_v11, %v1480_v56  ;;  %1141 = vst.msk [vmem:[#allocation4 + $0xf8] sm:$0xff] %vm280_vm0, %v1125_v9  ;;  %v972_v28 = vld [vmem:[#allocation2 + $0xa9] sm:$0xff]  ;;  %876 = vst.msk [vmem:[#allocation2 + $0xc1] sm:$0xff] %vm280_vm0, %v826_v24  ;;  %v828_v31 = vmax.f32 %v715_v25, 0.0  ;;  %v6010_v33 = vld [vmem:[%s7897_s3 + $0x98] sm:$0xff]  }
 0x140   : > { %1332 = vst.msk [vmem:[#allocation4 + $0xd8] sm:$0xff] %vm280_vm0, %v1316_v16  ;;  %v1291_v34 = vld [vmem:[#allocation2 + $0xa9] sm:$0xff]  ;;  %v1675_v40 = vld [vmem:[#allocation2 + $0xb2] sm:$0xff]  ;;  %5249 = vmatpush3.bf16.msra.mxu0 %v6010_v33 }
 0x141   : > { %1524 = vst.msk [vmem:[#allocation4 + $0xb8] sm:$0xff] %vm280_vm0, %v1508_v18  ;;  %v1482_v35 = vld [vmem:[#allocation2 + $0xa8] sm:$0xff]  ;;  %v1164_v41 = vld [vmem:[#allocation2 + $0xb0] sm:$0xff]  ;;  %877 = vst.msk [vmem:[#allocation2 + $0xc9] sm:$0xff] %vm280_vm0, %v828_v31  ;;  %v6597_v44 = vpop.f32.mrb[32].mxu0 }
 0x142   : > { %v1674_v37 = vld [vmem:[#allocation2 + $0xaa] sm:$0xff]  ;;  %v1189_v45 = vpack.c.bf16 %v1164_v41, %v1163_v26  ;;  %v1102_v54 = vld [vmem:[#allocation2 + $0xb2] sm:$0xff]  ;;  %v720_v55 = vpop.f32.mrb[33].mxu0 }
 0x143   : > { %v6594_v42 = vpack.c.bf16 %v1675_v40, %v1674_v37  ;;  %v973_v48 = vld [vmem:[#allocation2 + $0xb1] sm:$0xff]  ;;  %v721_v2 = vadd.f32 %v720_v55, %v6402_v46  ;;  %v6604_v3 = vpop.f32.mrb[34].mxu0 }
 0x144   : > { %v1101_v53 = vld [vmem:[#allocation2 + $0xaa] sm:$0xff]  ;;  %v6599_v56 = vpack.c.bf16 %v973_v48, %v972_v28  ;;  %1227 = vrot.lane.b32.xlu0 %v1189_v45, %s6109_s16  ;;  %949 = vst.msk [vmem:[#allocation4 + $0x118] sm:$0xff] %vm280_vm0, %v1189_v45  ;;  %v724_v7 = vpop.f32.mrb[35].mxu0  ;;  %v6011_v45 = vld [vmem:[%s7897_s3 + $0xe0] sm:$0xff]  }
 0x145   : > { %v1126_v58 = vpack.c.bf16 %v1102_v54, %v1101_v53  ;;  %v1292_v60 = vld [vmem:[#allocation2 + $0xb1] sm:$0xff]  ;;  %1717 = vst.msk [vmem:[#allocation4 + $0xe8] sm:$0xff] %vm280_vm0, %v6594_v42  ;;  %v830_v9 = vmax.f32 %v721_v2, 0.0  ;;  %v725_v10 = vadd.f32 %v724_v7, %v6402_v46  ;;  %5250 = vmatprep.subr.bf16.mxu0 %v6011_v45 }
 0x146   : > { %v1483_v61 = vld [vmem:[#allocation2 + $0xb0] sm:$0xff]  ;;  %v1317_v4 = vpack.c.bf16 %v1292_v60, %v1291_v34  ;;  %1036 = vrot.lane.b32.xlu1 %v6599_v56, %s6109_s16  ;;  %v1165_v11 = vld [vmem:[#allocation2 + $0xc0] sm:$0xff] }
 0x147   : > { %v1509_v5 = vpack.c.bf16 %v1483_v61, %v1482_v35  ;;  %1142 = vst.msk [vmem:[#allocation4 + $0x120] sm:$0xff] %vm280_vm0, %v1126_v58  ;;  %878 = vst.msk [vmem:[#allocation2 + $0xd9] sm:$0xff] %vm280_vm0, %v830_v9  ;;  %v832_v12 = vmax.f32 %v725_v10, 0.0  ;;  %v974_v16 = vld [vmem:[#allocation2 + $0xc1] sm:$0xff] }
 0x148   : > { %1333 = vst.msk [vmem:[#allocation4 + $0x100] sm:$0xff] %vm280_vm0, %v1317_v4  ;;  %v1293_v18 = vld [vmem:[#allocation2 + $0xc1] sm:$0xff]  ;;  %v1677_v24 = vld [vmem:[#allocation2 + $0xca] sm:$0xff] }
 0x149   : > { %1525 = vst.msk [vmem:[#allocation4 + $0xe0] sm:$0xff] %vm280_vm0, %v1509_v5  ;;  %v1484_v19 = vld [vmem:[#allocation2 + $0xc0] sm:$0xff]  ;;  %v1166_v25 = vld [vmem:[#allocation2 + $0xc8] sm:$0xff]  ;;  %879 = vst.msk [vmem:[#allocation2 + $0xe1] sm:$0xff] %vm280_vm0, %v832_v12  ;;  %v6618_v28 = vpop.f32.mrb[36].mxu0 }
 0x14a   : > { %v1676_v20 = vld [vmem:[#allocation2 + $0xc2] sm:$0xff]  ;;  %7902 = vst [vmem:[#allocation6_spill] sm:$0xff] %v6618_v28  ;;  %v1190_v31 = vpack.c.bf16 %v1166_v25, %v1165_v11  ;;  %v1104_v35 = vld [vmem:[#allocation2 + $0xca] sm:$0xff]  ;;  %v730_v37 = vpop.f32.mrb[37].mxu0 }
 0x14b   : > { %v6615_v26 = vpack.c.bf16 %v1677_v24, %v1676_v20  ;;  %v975_v33 = vld [vmem:[#allocation2 + $0xc9] sm:$0xff]  ;;  %v731_v54 = vadd.f32 %v730_v37, %v6402_v46  ;;  %v6628_v55 = vpop.f32.mrb[38].mxu0  ;;  %v6012_v11 = vld [vmem:[%s7897_s3 + $0xa0] sm:$0xff]  }
 0x14c   : > { %v1103_v34 = vld [vmem:[#allocation2 + $0xc2] sm:$0xff]  ;;  %v6620_v40 = vpack.c.bf16 %v975_v33, %v974_v16  ;;  %7903 = vst [vmem:[#allocation7_spill] sm:$0xff] %v6628_v55  ;;  %1229 = vrot.lane.b32.xlu0 %v1190_v31, %s6109_s16  ;;  %950 = vst.msk [vmem:[#allocation4 + $0x140] sm:$0xff] %vm280_vm0, %v1190_v31  ;;  %v734_v61 = vpop.f32.mrb[39].mxu0  ;;  %5251 = vmatpush3.bf16.msra.mxu0 %v6012_v11 }
 0x14d   : > { %v1127_v41 = vpack.c.bf16 %v1104_v35, %v1103_v34  ;;  %v1294_v48 = vld [vmem:[#allocation2 + $0xc9] sm:$0xff]  ;;  %1718 = vst.msk [vmem:[#allocation4 + $0x110] sm:$0xff] %vm280_vm0, %v6615_v26  ;;  %v834_v2 = vmax.f32 %v731_v54, 0.0  ;;  %v735_v4 = vadd.f32 %v734_v61, %v6402_v46 }
 0x14e   : > { %v1485_v53 = vld [vmem:[#allocation2 + $0xc8] sm:$0xff]  ;;  %v1318_v58 = vpack.c.bf16 %v1294_v48, %v1293_v18  ;;  %1038 = vrot.lane.b32.xlu1 %v6620_v40, %s6109_s16  ;;  %v1167_v5 = vld [vmem:[#allocation2 + $0xd8] sm:$0xff] }
 0x14f   : > { %v1510_v60 = vpack.c.bf16 %v1485_v53, %v1484_v19  ;;  %1143 = vst.msk [vmem:[#allocation4 + $0x148] sm:$0xff] %vm280_vm0, %v1127_v41  ;;  %v976_v7 = vld [vmem:[#allocation2 + $0xd9] sm:$0xff]  ;;  %880 = vst.msk [vmem:[#allocation2 + $0xf1] sm:$0xff] %vm280_vm0, %v834_v2  ;;  %v836_v9 = vmax.f32 %v735_v4, 0.0 }
 0x150   : > { %1334 = vst.msk [vmem:[#allocation4 + $0x128] sm:$0xff] %vm280_vm0, %v1318_v58  ;;  %v912_v10 = vld [vmem:[#allocation2 + $0xd8] sm:$0xff]  ;;  %v1679_v18 = vld [vmem:[#allocation2 + $0xe2] sm:$0xff] }
 0x151   : > { %1526 = vst.msk [vmem:[#allocation4 + $0x108] sm:$0xff] %vm280_vm0, %v1510_v60  ;;  %v1295_v12 = vld [vmem:[#allocation2 + $0xd9] sm:$0xff]  ;;  %881 = vst.msk [vmem:[#allocation2 + $0xf9] sm:$0xff] %vm280_vm0, %v836_v9  ;;  %v6645_v24 = vpop.f32.mrb[40].mxu0  ;;  %v977_v31 = vld [vmem:[#allocation2 + $0xe1] sm:$0xff] }
 0x152   : > { %v1678_v16 = vld [vmem:[#allocation2 + $0xda] sm:$0xff]  ;;  %7904 = vst [vmem:[#allocation8_spill] sm:$0xff] %v6645_v24  ;;  %v740_v35 = vpop.f32.mrb[41].mxu0  ;;  %v6647_v37 = vpack.c.bf16 %v977_v31, %v976_v7  ;;  %v1106_v45 = vld [vmem:[#allocation2 + $0xe2] sm:$0xff] }
 0x153   : > { %v1168_v19 = vld [vmem:[#allocation2 + $0xe0] sm:$0xff]  ;;  %v6642_v20 = vpack.c.bf16 %v1679_v18, %v1678_v16  ;;  %v741_v53 = vadd.f32 %v740_v35, %v6402_v46  ;;  %v6652_v54 = vpop.f32.mrb[42].mxu0 }
 0x154   : > { %v1191_v25 = vpack.c.bf16 %v1168_v19, %v1167_v5  ;;  %v913_v33 = vld [vmem:[#allocation2 + $0xe0] sm:$0xff]  ;;  %7905 = vst [vmem:[#allocation9_spill] sm:$0xff] %v6652_v54  ;;  %1040 = vrot.lane.b32.xlu1 %v6647_v37, %s6109_s16  ;;  %v744_v61 = vpop.f32.mrb[43].mxu0 }
 0x155   : > { %v1105_v34 = vld [vmem:[#allocation2 + $0xda] sm:$0xff]  ;;  %v935_v41 = vpack.c.bf16 %v913_v33, %v912_v10  ;;  %1719 = vst.msk [vmem:[#allocation4 + $0x138] sm:$0xff] %vm280_vm0, %v6642_v20  ;;  %v838_v2 = vmax.f32 %v741_v53, 0.0  ;;  %v745_v4 = vadd.f32 %v744_v61, %v6402_v46 }
 0x156   : > { %v1296_v48 = vld [vmem:[#allocation2 + $0xe1] sm:$0xff]  ;;  %1231 = vrot.lane.b32.xlu0 %v1191_v25, %s6109_s16  ;;  %v1128_v58 = vpack.c.bf16 %v1106_v45, %v1105_v34  ;;  %v1169_v5 = vld [vmem:[#allocation2 + $0xf0] sm:$0xff] }
 0x157   : > { %v1319_v60 = vpack.c.bf16 %v1296_v48, %v1295_v12  ;;  %951 = vst.msk [vmem:[#allocation4 + $0x168] sm:$0xff] %vm280_vm0, %v935_v41  ;;  %1527 = vst.msk [vmem:[#allocation4 + $0x130] sm:$0xff] %vm280_vm0, %v935_v41  ;;  %v840_v7 = vmax.f32 %v745_v4, 0.0  ;;  %v978_v9 = vld [vmem:[#allocation2 + $0xf1] sm:$0xff] }
 0x158   : > { %1144 = vst.msk [vmem:[#allocation4 + $0x170] sm:$0xff] %vm280_vm0, %v1128_v58  ;;  %882 = vst.msk [vmem:[#allocation2 + $0x109] sm:$0xff] %vm280_vm0, %v838_v2  ;;  %v914_v10 = vld [vmem:[#allocation2 + $0xf0] sm:$0xff]  ;;  %v1681_v16 = vld [vmem:[#allocation2 + $0xfa] sm:$0xff] }
 0x159   : > { %1335 = vst.msk [vmem:[#allocation4 + $0x150] sm:$0xff] %vm280_vm0, %v1319_v60  ;;  %v1297_v11 = vld [vmem:[#allocation2 + $0xf1] sm:$0xff]  ;;  %883 = vst.msk [vmem:[#allocation2 + $0x111] sm:$0xff] %vm280_vm0, %v840_v7  ;;  %v6666_v25 = vpop.f32.mrb[44].mxu0  ;;  %v979_v33 = vld [vmem:[#allocation2 + $0xf9] sm:$0xff] }
 0x15a   : > { %v1680_v12 = vld [vmem:[#allocation2 + $0xf2] sm:$0xff]  ;;  %7906 = vst [vmem:[#allocation10_spill] sm:$0xff] %v6666_v25  ;;  %v750_v41 = vpop.f32.mrb[45].mxu0  ;;  %v6668_v45 = vpack.c.bf16 %v979_v33, %v978_v9  ;;  %v1108_v53 = vld [vmem:[#allocation2 + $0xfa] sm:$0xff]  ;;  %v6014_v58 = vld [vmem:[%s7897_s3 + $0xe8] sm:$0xff]  }
 0x15b   : > { %v1170_v18 = vld [vmem:[#allocation2 + $0xf8] sm:$0xff]  ;;  %v6663_v19 = vpack.c.bf16 %v1681_v16, %v1680_v12  ;;  %v751_v61 = vadd.f32 %v750_v41, %v6402_v46  ;;  %v6676_v2 = vpop.f32.mrb[46].mxu0  ;;  %5252 = vmatprep.subr.bf16.mxu0 %v6014_v58 }
 0x15c   : > { %v1192_v31 = vpack.c.bf16 %v1170_v18, %v1169_v5  ;;  %v915_v34 = vld [vmem:[#allocation2 + $0xf8] sm:$0xff]  ;;  %7907 = vst [vmem:[#allocation11_spill] sm:$0xff] %v6676_v2  ;;  %1042 = vrot.lane.b32.xlu1 %v6668_v45, %s6109_s16  ;;  %v754_v7 = vpop.f32.mrb[47].mxu0 }
 0x15d   : > { %v1107_v35 = vld [vmem:[#allocation2 + $0xf2] sm:$0xff]  ;;  %v936_v48 = vpack.c.bf16 %v915_v34, %v914_v10  ;;  %1720 = vst.msk [vmem:[#allocation4 + $0x160] sm:$0xff] %vm280_vm0, %v6663_v19  ;;  %v842_v9 = vmax.f32 %v751_v61, 0.0  ;;  %v755_v10 = vadd.f32 %v754_v7, %v6402_v46 }
 0x15e   : > { %v1298_v60 = vld [vmem:[#allocation2 + $0xf9] sm:$0xff]  ;;  %1233 = vrot.lane.b32.xlu0 %v1192_v31, %s6109_s16  ;;  %v1129_v4 = vpack.c.bf16 %v1108_v53, %v1107_v35  ;;  %v6015_v31 = vld [vmem:[%s7897_s3 + $0xa8] sm:$0xff]  }
 0x15f   : > { %v1320_v5 = vpack.c.bf16 %v1298_v60, %v1297_v11  ;;  %952 = vst.msk [vmem:[#allocation4 + $0x190] sm:$0xff] %vm280_vm0, %v936_v48  ;;  %1528 = vst.msk [vmem:[#allocation4 + $0x158] sm:$0xff] %vm280_vm0, %v936_v48  ;;  %v1171_v12 = vld [vmem:[#allocation2 + $0x108] sm:$0xff]  ;;  %v844_v11 = vmax.f32 %v755_v10, 0.0  ;;  %5253 = vmatpush3.bf16.msra.mxu0 %v6015_v31 }
 0x160   : > { %1145 = vst.msk [vmem:[#allocation4 + $0x198] sm:$0xff] %vm280_vm0, %v1129_v4  ;;  %v980_v16 = vld [vmem:[#allocation2 + $0x109] sm:$0xff]  ;;  %884 = vst.msk [vmem:[#allocation2 + $0x121] sm:$0xff] %vm280_vm0, %v842_v9  ;;  %v1683_v35 = vld [vmem:[#allocation2 + $0x112] sm:$0xff] }
 0x161   : > { %1336 = vst.msk [vmem:[#allocation4 + $0x178] sm:$0xff] %vm280_vm0, %v1320_v5  ;;  %v916_v18 = vld [vmem:[#allocation2 + $0x108] sm:$0xff]  ;;  %v1172_v41 = vld [vmem:[#allocation2 + $0x110] sm:$0xff]  ;;  %885 = vst.msk [vmem:[#allocation2 + $0x129] sm:$0xff] %vm280_vm0, %v844_v11  ;;  %v6693_v53 = vpop.f32.mrb[48].mxu0 }
 0x162   : > { %v1299_v33 = vld [vmem:[#allocation2 + $0x109] sm:$0xff]  ;;  %7908 = vst [vmem:[#allocation12_spill] sm:$0xff] %v6693_v53  ;;  %v1193_v58 = vpack.c.bf16 %v1172_v41, %v1171_v12  ;;  %v981_v60 = vld [vmem:[#allocation2 + $0x111] sm:$0xff]  ;;  %v760_v5 = vpop.f32.mrb[49].mxu0 }
 0x163   : > { %v1682_v34 = vld [vmem:[#allocation2 + $0x10a] sm:$0xff]  ;;  %v6695_v7 = vpack.c.bf16 %v981_v60, %v980_v16  ;;  %v1110_v10 = vld [vmem:[#allocation2 + $0x112] sm:$0xff] }
 0x164   : > { %v6690_v48 = vpack.c.bf16 %v1683_v35, %v1682_v34  ;;  %v917_v61 = vld [vmem:[#allocation2 + $0x110] sm:$0xff]  ;;  %v761_v34 = vadd.f32 %v760_v5, %v6402_v46  ;;  %v6700_v35 = vpop.f32.mrb[50].mxu0  ;;  %1235 = vrot.lane.b32.xlu0 %v1193_v58, %s6109_s16 }
 0x165   : > { %v1109_v4 = vld [vmem:[#allocation2 + $0x10a] sm:$0xff]  ;;  %v937_v9 = vpack.c.bf16 %v917_v61, %v916_v18  ;;  %7909 = vst [vmem:[#allocation13_spill] sm:$0xff] %v6700_v35  ;;  %1044 = vrot.lane.b32.xlu1 %v6695_v7, %s6109_s16  ;;  %v764_v31 = vpop.f32.mrb[51].mxu0 }
 0x166   : > { %v1300_v2 = vld [vmem:[#allocation2 + $0x111] sm:$0xff]  ;;  %1721 = vst.msk [vmem:[#allocation4 + $0x188] sm:$0xff] %vm280_vm0, %v6690_v48  ;;  %v1130_v12 = vpack.c.bf16 %v1110_v10, %v1109_v4  ;;  %v846_v16 = vmax.f32 %v761_v34, 0.0  ;;  %v765_v18 = vadd.f32 %v764_v31, %v6402_v46 }
 0x167   : > { %v1321_v11 = vpack.c.bf16 %v1300_v2, %v1299_v33  ;;  %953 = vst.msk [vmem:[#allocation4 + $0x1b8] sm:$0xff] %vm280_vm0, %v937_v9  ;;  %1529 = vst.msk [vmem:[#allocation4 + $0x180] sm:$0xff] %vm280_vm0, %v937_v9  ;;  %v1173_v41 = vld [vmem:[#allocation2 + $0x120] sm:$0xff] }
 0x168   : > { %1146 = vst.msk [vmem:[#allocation4 + $0x1c0] sm:$0xff] %vm280_vm0, %v1130_v12  ;;  %886 = vst.msk [vmem:[#allocation2 + $0x139] sm:$0xff] %vm280_vm0, %v846_v16  ;;  %v848_v58 = vmax.f32 %v765_v18, 0.0  ;;  %v982_v2 = vld [vmem:[#allocation2 + $0x121] sm:$0xff]  ;;  %v1685_v4 = vld [vmem:[#allocation2 + $0x12a] sm:$0xff] }
 0x169   : > { %1337 = vst.msk [vmem:[#allocation4 + $0x1a0] sm:$0xff] %vm280_vm0, %v1321_v11  ;;  %v1301_v33 = vld [vmem:[#allocation2 + $0x121] sm:$0xff]  ;;  %v6714_v9 = vpop.f32.mrb[52].mxu0  ;;  %v983_v12 = vld [vmem:[#allocation2 + $0x129] sm:$0xff] }
 0x16a   : > { %v1492_v60 = vld [vmem:[#allocation2 + $0x120] sm:$0xff]  ;;  %v1174_v5 = vld [vmem:[#allocation2 + $0x128] sm:$0xff]  ;;  %887 = vst.msk [vmem:[#allocation2 + $0x141] sm:$0xff] %vm280_vm0, %v848_v58  ;;  %7910 = vst [vmem:[#allocation14_spill] sm:$0xff] %v6714_v9  ;;  %v770_v35 = vpop.f32.mrb[53].mxu0  ;;  %v6716_v53 = vpack.c.bf16 %v983_v12, %v982_v2 }
 0x16b   : > { %v1684_v61 = vld [vmem:[#allocation2 + $0x122] sm:$0xff]  ;;  %v1194_v34 = vpack.c.bf16 %v1174_v5, %v1173_v41  ;;  %v1112_v11 = vld [vmem:[#allocation2 + $0x12a] sm:$0xff]  ;;  %v771_v58 = vadd.f32 %v770_v35, %v6402_v46 }
 0x16c   : > { %v6711_v10 = vpack.c.bf16 %v1685_v4, %v1684_v61  ;;  %v1111_v31 = vld [vmem:[#allocation2 + $0x122] sm:$0xff]  ;;  %v6016_v18 = vld [vmem:[%s7897_s3 + $0xf0] sm:$0xff]   ;;  %v6724_v61 = vpop.f32.mrb[54].mxu0  ;;  %1046 = vrot.lane.b32.xlu1 %v6716_v53, %s6109_s16 }
 0x16d   : > { %v1131_v16 = vpack.c.bf16 %v1112_v11, %v1111_v31  ;;  %v1302_v25 = vld [vmem:[#allocation2 + $0x129] sm:$0xff]  ;;  %7911 = vst [vmem:[#allocation15_spill] sm:$0xff] %v6724_v61  ;;  %1237 = vrot.lane.b32.xlu0 %v1194_v34, %s6109_s16  ;;  %954 = vst.msk [vmem:[#allocation4 + $0x1e0] sm:$0xff] %vm280_vm0, %v1194_v34  ;;  %v774_v4 = vpop.f32.mrb[55].mxu0  ;;  %5254 = vmatprep.subr.bf16.mxu0 %v6016_v18  ;;  %v850_v5 = vmax.f32 %v771_v58, 0.0 }
 0x16e   : > { %v1493_v54 = vld [vmem:[#allocation2 + $0x128] sm:$0xff]  ;;  %1722 = vst.msk [vmem:[#allocation4 + $0x1b0] sm:$0xff] %vm280_vm0, %v6711_v10  ;;  %v1322_v41 = vpack.c.bf16 %v1302_v25, %v1301_v33  ;;  %v775_v12 = vadd.f32 %v774_v4, %v6402_v46 }
 0x16f   : > { %v1514_v2 = vpack.c.bf16 %v1493_v54, %v1492_v60  ;;  %1147 = vst.msk [vmem:[#allocation4 + $0x1e8] sm:$0xff] %vm280_vm0, %v1131_v16  ;;  %v1175_v35 = vld [vmem:[#allocation2 + $0x138] sm:$0xff]  ;;  %888 = vst.msk [vmem:[#allocation2 + $0x151] sm:$0xff] %vm280_vm0, %v850_v5  ;;  %v6017_v54 = vld [vmem:[%s7897_s3 + $0xb0] sm:$0xff]  }
 0x170   : > { %1338 = vst.msk [vmem:[#allocation4 + $0x1c8] sm:$0xff] %vm280_vm0, %v1322_v41  ;;  %v984_v31 = vld [vmem:[#allocation2 + $0x139] sm:$0xff]  ;;  %v852_v25 = vmax.f32 %v775_v12, 0.0  ;;  %5255 = vmatpush3.bf16.msra.mxu0 %v6017_v54 }
 0x171   : > { %1530 = vst.msk [vmem:[#allocation4 + $0x1a8] sm:$0xff] %vm280_vm0, %v1514_v2  ;;  %v1303_v33 = vld [vmem:[#allocation2 + $0x139] sm:$0xff]  ;;  %v1687_v11 = vld [vmem:[#allocation2 + $0x142] sm:$0xff]  ;;  %v6741_v58 = vpop.f32.mrb[56].mxu0 }
 0x172   : > { %v1494_v60 = vld [vmem:[#allocation2 + $0x138] sm:$0xff]  ;;  %v1176_v16 = vld [vmem:[#allocation2 + $0x140] sm:$0xff]  ;;  %889 = vst.msk [vmem:[#allocation2 + $0x159] sm:$0xff] %vm280_vm0, %v852_v25  ;;  %7912 = vst [vmem:[#allocation16_spill] sm:$0xff] %v6741_v58  ;;  %v780_v12 = vpop.f32.mrb[57].mxu0 }
 0x173   : > { %v1686_v34 = vld [vmem:[#allocation2 + $0x13a] sm:$0xff]  ;;  %v1195_v41 = vpack.c.bf16 %v1176_v16, %v1175_v35  ;;  %v1114_v5 = vld [vmem:[#allocation2 + $0x142] sm:$0xff] }
 0x174   : > { %v6738_v18 = vpack.c.bf16 %v1687_v11, %v1686_v34  ;;  %v985_v2 = vld [vmem:[#allocation2 + $0x141] sm:$0xff]  ;;  %v781_v34 = vadd.f32 %v780_v12, %v6402_v46  ;;  %v6748_v11 = vpop.f32.mrb[58].mxu0 }
 0x175   : > { %v1113_v4 = vld [vmem:[#allocation2 + $0x13a] sm:$0xff]  ;;  %v6743_v61 = vpack.c.bf16 %v985_v2, %v984_v31  ;;  %7913 = vst [vmem:[#allocation17_spill] sm:$0xff] %v6748_v11  ;;  %1239 = vrot.lane.b32.xlu0 %v1195_v41, %s6109_s16  ;;  %955 = vst.msk [vmem:[#allocation4 + $0x208] sm:$0xff] %vm280_vm0, %v1195_v41  ;;  %v784_v31 = vpop.f32.mrb[59].mxu0 }
 0x176   : > { %v1132_v9 = vpack.c.bf16 %v1114_v5, %v1113_v4  ;;  %v1304_v24 = vld [vmem:[#allocation2 + $0x141] sm:$0xff]  ;;  %1723 = vst.msk [vmem:[#allocation4 + $0x1d8] sm:$0xff] %vm280_vm0, %v6738_v18  ;;  %v854_v54 = vmax.f32 %v781_v34, 0.0  ;;  %v785_v16 = vadd.f32 %v784_v31, %v6402_v46  ;;  %v1177_v2 = vld [vmem:[#allocation2 + $0x150] sm:$0xff] }
 0x177   : > { %v1495_v55 = vld [vmem:[#allocation2 + $0x140] sm:$0xff]  ;;  %v1323_v35 = vpack.c.bf16 %v1304_v24, %v1303_v33  ;;  %1048 = vrot.lane.b32.xlu1 %v6743_v61, %s6109_s16  ;;  %v986_v41 = vld [vmem:[#allocation2 + $0x151] sm:$0xff] }
 0x178   : > { %v1515_v25 = vpack.c.bf16 %v1495_v55, %v1494_v60  ;;  %1148 = vst.msk [vmem:[#allocation4 + $0x210] sm:$0xff] %vm280_vm0, %v1132_v9  ;;  %890 = vst.msk [vmem:[#allocation2 + $0x169] sm:$0xff] %vm280_vm0, %v854_v54  ;;  %v856_v4 = vmax.f32 %v785_v16, 0.0  ;;  %v1305_v24 = vld [vmem:[#allocation2 + $0x151] sm:$0xff] }
 0x179   : > { %1339 = vst.msk [vmem:[#allocation4 + $0x1f0] sm:$0xff] %vm280_vm0, %v1323_v35  ;;  %v1496_v55 = vld [vmem:[#allocation2 + $0x150] sm:$0xff]  ;;  %v1689_v60 = vld [vmem:[#allocation2 + $0x15a] sm:$0xff]  ;;  %v6762_v9 = vpop.f32.mrb[60].mxu0 }
 0x17a   : > { %1531 = vst.msk [vmem:[#allocation4 + $0x1d0] sm:$0xff] %vm280_vm0, %v1515_v25  ;;  %v1688_v33 = vld [vmem:[#allocation2 + $0x152] sm:$0xff]  ;;  %891 = vst.msk [vmem:[#allocation2 + $0x171] sm:$0xff] %vm280_vm0, %v856_v4  ;;  %v1116_v25 = vld [vmem:[#allocation2 + $0x15a] sm:$0xff]  ;;  %v790_v11 = vpop.f32.mrb[61].mxu0 }
 0x17b   : > { %v1178_v5 = vld [vmem:[#allocation2 + $0x158] sm:$0xff]  ;;  %v6759_v12 = vpack.c.bf16 %v1689_v60, %v1688_v33  ;;  %7914 = vst [vmem:[#allocation18_spill] sm:$0xff] %v6762_v9  ;;  %v791_v33 = vadd.f32 %v790_v11, %v6402_v46  ;;  %v6769_v60 = vpop.f32.mrb[62].mxu0 }
 0x17c   : > { %v1196_v34 = vpack.c.bf16 %v1178_v5, %v1177_v2  ;;  %v987_v35 = vld [vmem:[#allocation2 + $0x159] sm:$0xff]  ;;  %7915 = vst [vmem:[#allocation19_spill] sm:$0xff] %v6769_v60  ;;  %v794_v5 = vpop.f32.mrb[63].mxu0 }
 0x17d   : > { %v1115_v31 = vld [vmem:[#allocation2 + $0x152] sm:$0xff]  ;;  %v6764_v58 = vpack.c.bf16 %v987_v35, %v986_v41  ;;  %1724 = vst.msk [vmem:[#allocation4 + $0x200] sm:$0xff] %vm280_vm0, %v6759_v12  ;;  %v858_v35 = vmax.f32 %v791_v33, 0.0  ;;  %v795_v11 = vadd.f32 %v794_v5, %v6402_v46 }
 0x17e   : > { %v1133_v54 = vpack.c.bf16 %v1116_v25, %v1115_v31  ;;  %v1306_v16 = vld [vmem:[#allocation2 + $0x159] sm:$0xff]  ;;  %1241 = vrot.lane.b32.xlu0 %v1196_v34, %s6109_s16  ;;  %956 = vst.msk [vmem:[#allocation4 + $0x230] sm:$0xff] %vm280_vm0, %v1196_v34 }
 0x17f   : > { %v1497_v28 = vld [vmem:[#allocation2 + $0x158] sm:$0xff]  ;;  %v1324_v4 = vpack.c.bf16 %v1306_v16, %v1305_v24  ;;  %1050 = vrot.lane.b32.xlu1 %v6764_v58, %s6109_s16  ;;  %v1179_v34 = vld [vmem:[#allocation2 + $0x168] sm:$0xff]  ;;  %892 = vst.msk [vmem:[#allocation2 + $0x181] sm:$0xff] %vm280_vm0, %v858_v35  ;;  %v860_v24 = vmax.f32 %v795_v11, 0.0 }
 0x180   : > { %v6019_v2 = vld [vmem:[%s7897_s3 + $0xf8] sm:$0xff]   ;;  %v1516_v41 = vpack.c.bf16 %v1497_v28, %v1496_v55  ;;  %1149 = vst.msk [vmem:[#allocation4 + $0x238] sm:$0xff] %vm280_vm0, %v1133_v54  ;;  %v988_v31 = vld [vmem:[#allocation2 + $0x169] sm:$0xff] }
 0x181   : > { %5256 = vmatprep.subr.bf16.mxu0 %v6019_v2  ;;  %1340 = vst.msk [vmem:[#allocation4 + $0x218] sm:$0xff] %vm280_vm0, %v1324_v4  ;;  %v6020_v28 = vld [vmem:[%s7897_s3 + $0xb8] sm:$0xff]   ;;  %v1307_v55 = vld [vmem:[#allocation2 + $0x169] sm:$0xff]  ;;  %893 = vst.msk [vmem:[#allocation2 + $0x189] sm:$0xff] %vm280_vm0, %v860_v24 }
 0x182   : > { %1532 = vst.msk [vmem:[#allocation4 + $0x1f8] sm:$0xff] %vm280_vm0, %v1516_v41  ;;  %v1498_v25 = vld [vmem:[#allocation2 + $0x168] sm:$0xff]  ;;  %v1691_v16 = vld [vmem:[#allocation2 + $0x172] sm:$0xff]  ;;  %5257 = vmatpush3.bf16.msra.mxu0 %v6020_v28 }
 0x183   : > { %v1690_v54 = vld [vmem:[#allocation2 + $0x16a] sm:$0xff]  ;;  %v1118_v5 = vld [vmem:[#allocation2 + $0x172] sm:$0xff] }
 0x184   : > { %v1180_v33 = vld [vmem:[#allocation2 + $0x170] sm:$0xff]  ;;  %v6786_v46 = vpack.c.bf16 %v1691_v16, %v1690_v54 }
 0x185   : > { %v1197_v2 = vpack.c.bf16 %v1180_v33, %v1179_v34  ;;  %v989_v4 = vld [vmem:[#allocation2 + $0x171] sm:$0xff]  ;;  %v1216_v34 = vpop.permute.xlu0 %1215 }
 0x186   : > { %v1117_v41 = vld [vmem:[#allocation2 + $0x16a] sm:$0xff]  ;;  %v6789_v35 = vpack.c.bf16 %v989_v4, %v988_v31  ;;  %1725 = vst.msk [vmem:[#allocation4 + $0x228] sm:$0xff] %vm280_vm0, %v6786_v46  ;;  %v1181_v31 = vld [vmem:[#allocation2 + $0x180] sm:$0xff] }
 0x187   : > { %v1134_v11 = vpack.c.bf16 %v1118_v5, %v1117_v41  ;;  %v1308_v60 = vld [vmem:[#allocation2 + $0x171] sm:$0xff]  ;;  %1243 = vrot.lane.b32.xlu0 %v1197_v2, %s6109_s16  ;;  %957 = vst.msk [vmem:[#allocation4 + $0x258] sm:$0xff] %vm280_vm0, %v1197_v2  ;;  %v1564_v28 = vld [vmem:[#allocation2 + $0x181] sm:$0xff] }
 0x188   : > { %v1499_v9 = vld [vmem:[#allocation2 + $0x170] sm:$0xff]  ;;  %v1325_v54 = vpack.c.bf16 %v1308_v60, %v1307_v55  ;;  %1052 = vrot.lane.b32.xlu1 %v6789_v35, %s6109_s16  ;;  %1263 = vst.msk [vmem:[#allocation4 + $0x8] sm:$0xff] %vm1070_vm2, %v1216_v34  ;;  %v1500_v16 = vld [vmem:[#allocation2 + $0x180] sm:$0xff]  ;;  %v1501_v41 = vld [vmem:[#allocation2 + $0x188] sm:$0xff] }
 0x189   : > { %v1517_v24 = vpack.c.bf16 %v1499_v9, %v1498_v25  ;;  %1150 = vst.msk [vmem:[#allocation4 + $0x260] sm:$0xff] %vm280_vm0, %v1134_v11  ;;  %v1692_v33 = vld [vmem:[#allocation2 + $0x182] sm:$0xff]  ;;  %v1693_v4 = vld [vmem:[#allocation2 + $0x18a] sm:$0xff]  ;;  %v1023_v55 = vpop.permute.xlu0 %1022  ;;  %v1518_v11 = vpack.c.bf16 %v1501_v41, %v1500_v16 }
 0x18a   : > { %1341 = vst.msk [vmem:[#allocation4 + $0x240] sm:$0xff] %vm280_vm0, %v1325_v54  ;;  %v1182_v9 = vld [vmem:[#allocation2 + $0x188] sm:$0xff]  ;;  %v6803_v60 = vpack.c.bf16 %v1693_v4, %v1692_v33 }
 0x18b   : > { %1533 = vst.msk [vmem:[#allocation4 + $0x220] sm:$0xff] %vm280_vm0, %v1517_v24  ;;  %v1198_v25 = vpack.c.bf16 %v1182_v9, %v1181_v31  ;;  %v1565_v2 = vld [vmem:[#allocation2 + $0x189] sm:$0xff]  ;;  %1534 = vst.msk [vmem:[#allocation4 + $0x248] sm:$0xff] %vm280_vm0, %v1518_v11  ;;  %v6093_v31 = vld [vmem:[%s7897_s3 + $0x100] sm:$0xff]  }
 0x18c   : > { %1407 = vrot.lane.b32.xlu1 %v6457_v27, %s6109_s16  ;;  %1071 = vst.msk [vmem:[#allocation4] sm:$0xff] %vm1070_vm2, %v1023_v55  ;;  %v6806_v5 = vpack.c.bf16 %v1565_v2, %v1564_v28 }
 0x18d   : > { %1726 = vst.msk [vmem:[#allocation4 + $0x250] sm:$0xff] %vm280_vm0, %v6803_v60  ;;  %1245 = vrot.lane.b32.xlu0 %v1198_v25, %s6109_s16 }
 0x18e   : > { %1342 = vst.msk [vmem:[#allocation4 + $0x268] sm:$0xff] %vm280_vm0, %v6806_v5  ;;  %v1218_v27 = vpop.permute.xlu1 %1217 }
 0x18f   : > { %v1729_v54 = vld [vmem:[#allocation4 + $0x8] sm:$0xff]  ;;  %1264 = vst.msk [vmem:[#allocation4 + $0x30] sm:$0xff] %vm1070_vm2, %v1218_v27 }
 0x190   : > { %1409 = vrot.lane.b32.xlu1 %v6473_v51, %s6109_s16  ;;  %2183 = vmatprep.mubr.bf16.mxu1 %v1729_v54  ;;  %v6008_v51 = vld [vmem:[%s7897_s3 + $0x108] sm:$0xff]  }
 0x191   : > { %1600 = vrot.lane.b32.xlu0 %v6499_v17, %s6109_s16 }
 0x192   : > { %v1025_v24 = vpop.permute.xlu1 %1024 }
 0x193   : > { %v1728_v34 = vld [vmem:[#allocation4] sm:$0xff]  ;;  %1072 = vst.msk [vmem:[#allocation4 + $0x28] sm:$0xff] %vm1070_vm2, %v1025_v24 }
 0x194   : > { %1411 = vrot.lane.b32.xlu1 %v6494_v14, %s6109_s16  ;;  %2184 = vmatmul.mubr.bf16.vlgmr.msra.gmra.mrb[0].mxu1 %v1728_v34  ;;  %v6013_v14 = vld [vmem:[%s7897_s3 + $0x110] sm:$0xff]  }
 0x195   : > { %5847 = vmatpush3.bf16.msra.mxu1 %v6093_v31  ;;  %1602 = vrot.lane.b32.xlu0 %v6512_v36, %s6109_s16  ;;  %v6018_v36 = vld [vmem:[%s7897_s3 + $0x118] sm:$0xff]  }
 0x196   : > { %5848 = vmatprep.subr.bf16.mxu1 %v6008_v51  ;;  %v1027_v28 = vpop.permute.xlu1 %1026  ;;  %v1734_v16 = vld [vmem:[#allocation4 + $0x30] sm:$0xff] }
 0x197   : > { %v1220_v17 = vpop.permute.xlu0 %1219  ;;  %1073 = vst.msk [vmem:[#allocation4 + $0x50] sm:$0xff] %vm1070_vm2, %v1027_v28  ;;  %2191 = vmatprep.mubr.bf16.mxu1 %v1734_v16 }
 0x198   : > { %1413 = vrot.lane.b32.xlu1 %v6519_v49, %s6109_s16  ;;  %1265 = vst.msk [vmem:[#allocation4 + $0x58] sm:$0xff] %vm1070_vm2, %v1220_v17 }
 0x199   : > { %1604 = vrot.lane.b32.xlu0 %v6524_v59, %s6109_s16  ;;  %5849 = vmatpush3.bf16.msra.mxu1 %v6008_v51 }
 0x19a   : > { %5850 = vmatprep.subr.bf16.mxu1 %v6013_v14  ;;  %v1029_v49 = vpop.permute.xlu1 %1028  ;;  %v1733_v33 = vld [vmem:[#allocation4 + $0x28] sm:$0xff] }
 0x19b   : > { %1074 = vst.msk [vmem:[#allocation4 + $0x78] sm:$0xff] %vm1070_vm2, %v1029_v49 }
 0x19c   : > { %1415 = vrot.lane.b32.xlu1 %v6546_v22, %s6109_s16  ;;  %2192 = vmatmul.mubr.bf16.gmra.mrb[4].mxu1 %v1733_v33 }
 0x19d   : > { %1606 = vrot.lane.b32.xlu0 %v6551_v32, %s6109_s16  ;;  %5851 = vmatpush3.bf16.msra.mxu1 %v6013_v14 }
 0x19e   : > { %5852 = vmatprep.subr.bf16.mxu1 %v6018_v36  ;;  %v1222_v59 = vpop.permute.xlu0 %1221  ;;  %v1738_v32 = vld [vmem:[#allocation4 + $0x50] sm:$0xff] }
 0x19f   : > { %v1739_v22 = vld [vmem:[#allocation4 + $0x58] sm:$0xff]  ;;  %1266 = vst.msk [vmem:[#allocation4 + $0x80] sm:$0xff] %vm1070_vm2, %v1222_v59 }
 0x1a0   : > { %1417 = vrot.lane.b32.xlu1 %v6567_v62, %s6109_s16  ;;  %v1031_v4 = vpop.permute.xlu1 %1030  ;;  %2199 = vmatprep.mubr.bf16.mxu1 %v1739_v22 }
 0x1a1   : > { %1075 = vst.msk [vmem:[#allocation4 + $0xa0] sm:$0xff] %vm1070_vm2, %v1031_v4  ;;  %1608 = vrot.lane.b32.xlu0 %v6572_v8, %s6109_s16  ;;  %5853 = vmatpush3.bf16.msra.mxu1 %v6018_v36 }
 0x1a2   : > { %v1743_v8 = vld [vmem:[#allocation4 + $0x78] sm:$0xff] }
 0x1a4   : > { %1419 = vrot.lane.b32.xlu1 %v6594_v42, %s6109_s16  ;;  %2200 = vmatmul.mubr.bf16.gmra.mrb[8].mxu1 %v1738_v32 }
 0x1a5   : > { %1610 = vrot.lane.b32.xlu0 %v6599_v56, %s6109_s16 }
 0x1a6   : > { %v1224_v62 = vpop.permute.xlu0 %1223  ;;  %v1744_v9 = vld [vmem:[#allocation4 + $0x80] sm:$0xff] }
 0x1a7   : > { %1267 = vst.msk [vmem:[#allocation4 + $0xa8] sm:$0xff] %vm1070_vm2, %v1224_v62  ;;  %2207 = vmatprep.mubr.bf16.mxu1 %v1744_v9  ;;  %v1694_v9 = vld [vmem:[#allocation2 + $0x19a] sm:$0xff] }
 0x1a8   : > { %1421 = vrot.lane.b32.xlu1 %v6615_v26, %s6109_s16  ;;  %v1033_v55 = vpop.permute.xlu1 %1032 }
 0x1a9   : > { %1076 = vst.msk [vmem:[#allocation4 + $0xc8] sm:$0xff] %vm1070_vm2, %v1033_v55  ;;  %1612 = vrot.lane.b32.xlu0 %v6620_v40, %s6109_s16  ;;  %v1748_v40 = vld [vmem:[#allocation4 + $0xa0] sm:$0xff] }
 0x1aa   : > { %v1695_v55 = vld [vmem:[#allocation2 + $0x1a2] sm:$0xff] }
 0x1ac   : > { %1423 = vrot.lane.b32.xlu1 %v6642_v20, %s6109_s16  ;;  %2208 = vmatmul.mubr.bf16.gmra.mrb[12].mxu1 %v1743_v8  ;;  %v1711_v8 = vpack.c.bf16 %v1695_v55, %v1694_v9  ;;  %v1762_v55 = vld [vmem:[#allocation4 + $0x110] sm:$0xff] }
 0x1ad   : > { %1614 = vrot.lane.b32.xlu0 %v6647_v37, %s6109_s16 }
 0x1ae   : > { %v1226_v42 = vpop.permute.xlu0 %1225  ;;  %v1749_v56 = vld [vmem:[#allocation4 + $0xa8] sm:$0xff]  ;;  %1727 = vst.msk [vmem:[#allocation4 + $0x278] sm:$0xff] %vm280_vm0, %v1711_v8 }
 0x1af   : > { %1268 = vst.msk [vmem:[#allocation4 + $0xd0] sm:$0xff] %vm1070_vm2, %v1226_v42  ;;  %2215 = vmatprep.mubr.bf16.mxu1 %v1749_v56  ;;  %v1502_v42 = vld [vmem:[#allocation2 + $0x198] sm:$0xff]  ;;  %v1503_v56 = vld [vmem:[#allocation2 + $0x1a0] sm:$0xff] }
 0x1b0   : > { %1425 = vrot.lane.b32.xlu1 %v6663_v19, %s6109_s16  ;;  %v1035_v26 = vpop.permute.xlu1 %1034 }
 0x1b1   : > { %1077 = vst.msk [vmem:[#allocation4 + $0xf0] sm:$0xff] %vm1070_vm2, %v1035_v26  ;;  %1616 = vrot.lane.b32.xlu0 %v6668_v45, %s6109_s16  ;;  %v1753_v45 = vld [vmem:[#allocation4 + $0xc8] sm:$0xff] }
 0x1b4   : > { %1427 = vrot.lane.b32.xlu1 %v6690_v48, %s6109_s16  ;;  %2216 = vmatmul.mubr.bf16.gmra.mrb[16].mxu1 %v1748_v40  ;;  %v1519_v40 = vpack.c.bf16 %v1503_v56, %v1502_v42 }
 0x1b5   : > { %1618 = vrot.lane.b32.xlu0 %v6695_v7, %s6109_s16 }
 0x1b6   : > { %v1228_v20 = vpop.permute.xlu0 %1227  ;;  %v1754_v37 = vld [vmem:[#allocation4 + $0xd0] sm:$0xff]  ;;  %1535 = vst.msk [vmem:[#allocation4 + $0x270] sm:$0xff] %vm280_vm0, %v1519_v40  ;;  %v1767_v40 = vld [vmem:[#allocation4 + $0x138] sm:$0xff] }
 0x1b7   : > { %1269 = vst.msk [vmem:[#allocation4 + $0xf8] sm:$0xff] %vm1070_vm2, %v1228_v20  ;;  %2223 = vmatprep.mubr.bf16.mxu1 %v1754_v37 }
 0x1b8   : > { %1429 = vrot.lane.b32.xlu1 %v6711_v10, %s6109_s16  ;;  %v1037_v19 = vpop.permute.xlu1 %1036 }
 0x1b9   : > { %1078 = vst.msk [vmem:[#allocation4 + $0x118] sm:$0xff] %vm1070_vm2, %v1037_v19  ;;  %1620 = vrot.lane.b32.xlu0 %v6716_v53, %s6109_s16  ;;  %v1758_v53 = vld [vmem:[#allocation4 + $0xf0] sm:$0xff] }
 0x1bc   : > { %1431 = vrot.lane.b32.xlu1 %v6738_v18, %s6109_s16  ;;  %2224 = vmatmul.mubr.bf16.gmra.mrb[20].mxu1 %v1753_v45  ;;  %v1567_v18 = vld [vmem:[#allocation2 + $0x1a1] sm:$0xff] }
 0x1bd   : > { %1622 = vrot.lane.b32.xlu0 %v6743_v61, %s6109_s16  ;;  %v1566_v61 = vld [vmem:[#allocation2 + $0x199] sm:$0xff] }
 0x1be   : > { %v1230_v48 = vpop.permute.xlu0 %1229  ;;  %v1759_v7 = vld [vmem:[#allocation4 + $0xf8] sm:$0xff] }
 0x1bf   : > { %1270 = vst.msk [vmem:[#allocation4 + $0x120] sm:$0xff] %vm1070_vm2, %v1230_v48  ;;  %2231 = vmatprep.mubr.bf16.mxu1 %v1759_v7 }
 0x1c0   : > { %1433 = vrot.lane.b32.xlu1 %v6759_v12, %s6109_s16  ;;  %v1039_v10 = vpop.permute.xlu1 %1038 }
 0x1c1   : > { %1079 = vst.msk [vmem:[#allocation4 + $0x140] sm:$0xff] %vm1070_vm2, %v1039_v10  ;;  %1624 = vrot.lane.b32.xlu0 %v6764_v58, %s6109_s16  ;;  %v1583_v58 = vpack.c.bf16 %v1567_v18, %v1566_v61 }
 0x1c4   : > { %1435 = vrot.lane.b32.xlu1 %v6786_v46, %s6109_s16  ;;  %2232 = vmatmul.mubr.bf16.gmra.mrb[24].mxu1 %v1758_v53  ;;  %v1763_v46 = vld [vmem:[#allocation4 + $0x118] sm:$0xff] }
 0x1c5   : > { %1626 = vrot.lane.b32.xlu0 %v6789_v35, %s6109_s16 }
 0x1c6   : > { %v1764_v25 = vld [vmem:[#allocation4 + $0x120] sm:$0xff]  ;;  %v1041_v2 = vpop.permute.xlu1 %1040 }
 0x1c7   : > { %2239 = vmatprep.mubr.bf16.mxu1 %v1764_v25  ;;  %1080 = vst.msk [vmem:[#allocation4 + $0x168] sm:$0xff] %vm1070_vm2, %v1041_v2 }
 0x1c8   : > { %1437 = vrot.lane.b32.xlu1 %v6803_v60, %s6109_s16  ;;  %v1232_v12 = vpop.permute.xlu0 %1231  ;;  %v1768_v11 = vld [vmem:[#allocation4 + $0x140] sm:$0xff] }
 0x1c9   : > { %1271 = vst.msk [vmem:[#allocation4 + $0x148] sm:$0xff] %vm1070_vm2, %v1232_v12  ;;  %1628 = vrot.lane.b32.xlu0 %v6806_v5, %s6109_s16 }
 0x1cc   : > { %2240 = vmatmul.mubr.bf16.gmra.mrb[28].mxu1 %v1763_v46 }
 0x1cd   : > { %1630 = vrot.lane.b32.xlu0 %v1583_v58, %s6109_s16 }
 0x1ce   : > { %v1043_v41 = vpop.permute.xlu1 %1042  ;;  %v1773_v51 = vld [vmem:[#allocation4 + $0x168] sm:$0xff] }
 0x1cf   : > { %1081 = vst.msk [vmem:[#allocation4 + $0x190] sm:$0xff] %vm1070_vm2, %v1043_v41 }
 0x1d0   : > { %v1234_v35 = vpop.permute.xlu0 %1233  ;;  %v1769_v60 = vld [vmem:[#allocation4 + $0x148] sm:$0xff] }
 0x1d1   : > { %1272 = vst.msk [vmem:[#allocation4 + $0x170] sm:$0xff] %vm1070_vm2, %v1234_v35  ;;  %2247 = vmatprep.mubr.bf16.mxu1 %v1769_v60  ;;  %v1732_v35 = vld [vmem:[#allocation4 + $0x20] sm:$0xff] }
 0x1d4   : > { %2248 = vmatmul.mubr.bf16.gmra.mrb[32].mxu1 %v1768_v11 }
 0x1d6   : > { %v1236_v27 = vpop.permute.xlu0 %1235  ;;  %v1778_v14 = vld [vmem:[#allocation4 + $0x190] sm:$0xff] }
 0x1d7   : > { %1273 = vst.msk [vmem:[#allocation4 + $0x198] sm:$0xff] %vm1070_vm2, %v1236_v27  ;;  %v1045_v5 = vpop.permute.xlu1 %1044 }
 0x1d8   : > { %v1774_v54 = vld [vmem:[#allocation4 + $0x170] sm:$0xff]  ;;  %1082 = vst.msk [vmem:[#allocation4 + $0x1b8] sm:$0xff] %vm1070_vm2, %v1045_v5 }
 0x1d9   : > { %2255 = vmatprep.mubr.bf16.mxu1 %v1774_v54  ;;  %v1737_v54 = vld [vmem:[#allocation4 + $0x48] sm:$0xff] }
 0x1dc   : > { %2256 = vmatmul.mubr.bf16.gmra.mrb[36].mxu1 %v1773_v51 }
 0x1de   : > { %v1779_v34 = vld [vmem:[#allocation4 + $0x198] sm:$0xff]  ;;  %v1047_v31 = vpop.permute.xlu1 %1046 }
 0x1df   : > { %v1238_v24 = vpop.permute.xlu0 %1237  ;;  %2263 = vmatprep.mubr.bf16.mxu1 %v1779_v34  ;;  %1083 = vst.msk [vmem:[#allocation4 + $0x1e0] sm:$0xff] %vm1070_vm2, %v1047_v31  ;;  %v1783_v36 = vld [vmem:[#allocation4 + $0x1b8] sm:$0xff] }
 0x1e0   : > { %1274 = vst.msk [vmem:[#allocation4 + $0x1c0] sm:$0xff] %vm1070_vm2, %v1238_v24  ;;  %v1742_v24 = vld [vmem:[#allocation4 + $0x70] sm:$0xff] }
 0x1e4   : > { %2264 = vmatmul.mubr.bf16.gmra.mrb[40].mxu1 %v1778_v14 }
 0x1e6   : > { %v1788_v22 = vld [vmem:[#allocation4 + $0x1e0] sm:$0xff] }
 0x1e7   : > { %v1240_v17 = vpop.permute.xlu0 %1239  ;;  %v1784_v28 = vld [vmem:[#allocation4 + $0x1c0] sm:$0xff] }
 0x1e8   : > { %1275 = vst.msk [vmem:[#allocation4 + $0x1e8] sm:$0xff] %vm1070_vm2, %v1240_v17  ;;  %2271 = vmatprep.mubr.bf16.mxu1 %v1784_v28  ;;  %v1747_v28 = vld [vmem:[#allocation4 + $0x98] sm:$0xff] }
 0x1e9   : > { %v1049_v16 = vpop.permute.xlu1 %1048 }
 0x1ea   : > { %1084 = vst.msk [vmem:[#allocation4 + $0x208] sm:$0xff] %vm1070_vm2, %v1049_v16 }
 0x1ec   : > { %2272 = vmatmul.mubr.bf16.gmra.mrb[44].mxu1 %v1783_v36 }
 0x1ef   : > { %v1789_v33 = vld [vmem:[#allocation4 + $0x1e8] sm:$0xff] }
 0x1f0   : > { %v1242_v49 = vpop.permute.xlu0 %1241  ;;  %2279 = vmatprep.mubr.bf16.mxu1 %v1789_v33 }
 0x1f1   : > { %1276 = vst.msk [vmem:[#allocation4 + $0x210] sm:$0xff] %vm1070_vm2, %v1242_v49  ;;  %v1051_v59 = vpop.permute.xlu1 %1050  ;;  %v1793_v26 = vld [vmem:[#allocation4 + $0x208] sm:$0xff]  ;;  %v1752_v49 = vld [vmem:[#allocation4 + $0xc0] sm:$0xff] }
 0x1f2   : > { %1085 = vst.msk [vmem:[#allocation4 + $0x230] sm:$0xff] %vm1070_vm2, %v1051_v59 }
 0x1f4   : > { %2280 = vmatmul.mubr.bf16.gmra.mrb[48].mxu1 %v1788_v22 }
 0x1f8   : > { %v1794_v32 = vld [vmem:[#allocation4 + $0x210] sm:$0xff] }
 0x1f9   : > { %v1244_v4 = vpop.permute.xlu0 %1243  ;;  %2287 = vmatprep.mubr.bf16.mxu1 %v1794_v32  ;;  %v1798_v7 = vld [vmem:[#allocation4 + $0x230] sm:$0xff]  ;;  %v1757_v32 = vld [vmem:[#allocation4 + $0xe8] sm:$0xff] }
 0x1fa   : > { %1277 = vst.msk [vmem:[#allocation4 + $0x238] sm:$0xff] %vm1070_vm2, %v1244_v4  ;;  %v1053_v62 = vpop.permute.xlu1 %1052 }
 0x1fb   : > { %1086 = vst.msk [vmem:[#allocation4 + $0x258] sm:$0xff] %vm1070_vm2, %v1053_v62 }
 0x1fc   : > { %2288 = vmatmul.mubr.bf16.gmra.mrb[52].mxu1 %v1793_v26 }
 0x1fe   : > { %v1408_v20 = vpop.permute.xlu1 %1407 }
 0x1ff   : > { %1455 = vst.msk [vmem:[#allocation4 + $0x10] sm:$0xff] %vm1070_vm2, %v1408_v20  ;;  %v1246_v37 = vpop.permute.xlu0 %1245 }
 0x200   : > { %1278 = vst.msk [vmem:[#allocation4 + $0x260] sm:$0xff] %vm1070_vm2, %v1246_v37 }
 0x201   : > { %v1799_v19 = vld [vmem:[#allocation4 + $0x238] sm:$0xff] }
 0x202   : > { %v1410_v45 = vpop.permute.xlu1 %1409  ;;  %2295 = vmatprep.mubr.bf16.mxu1 %v1799_v19  ;;  %v1803_v25 = vld [vmem:[#allocation4 + $0x258] sm:$0xff]  ;;  %v1772_v19 = vld [vmem:[#allocation4 + $0x160] sm:$0xff] }
 0x203   : > { %1456 = vst.msk [vmem:[#allocation4 + $0x38] sm:$0xff] %vm1070_vm2, %v1410_v45  ;;  %v1601_v48 = vpop.permute.xlu0 %1600 }
 0x204   : > { %1648 = vst.msk [vmem:[#allocation4 + $0x18] sm:$0xff] %vm1070_vm2, %v1601_v48  ;;  %2296 = vmatmul.mubr.bf16.gmra.mrb[56].mxu1 %v1798_v7  ;;  %v6021_v7 = vld [vmem:[%s7899_s5 + $0xc0] sm:$0xff]  }
 0x205   : > { %5486 = vmatprep.subr.bf16.mxu0 %v6021_v7  ;;  %v6040_v7 = vld [vmem:[%s7899_s5 + $0x98] sm:$0xff]  }
 0x206   : > { %v1412_v10 = vpop.permute.xlu1 %1411  ;;  %v1730_v46 = vld [vmem:[#allocation4 + $0x10] sm:$0xff] }
 0x207   : > { %1457 = vst.msk [vmem:[#allocation4 + $0x60] sm:$0xff] %vm1070_vm2, %v1412_v10  ;;  %v1603_v53 = vpop.permute.xlu0 %1602  ;;  %v1804_v61 = vld [vmem:[#allocation4 + $0x260] sm:$0xff] }
 0x208   : > { %1649 = vst.msk [vmem:[#allocation4 + $0x40] sm:$0xff] %vm1070_vm2, %v1603_v53  ;;  %2303 = vmatprep.mubr.bf16.mxu1 %v1804_v61  ;;  %v1777_v61 = vld [vmem:[#allocation4 + $0x188] sm:$0xff] }
 0x20a   : > { %v1414_v18 = vpop.permute.xlu1 %1413  ;;  %v1735_v51 = vld [vmem:[#allocation4 + $0x38] sm:$0xff] }
 0x20b   : > { %1458 = vst.msk [vmem:[#allocation4 + $0x88] sm:$0xff] %vm1070_vm2, %v1414_v18  ;;  %v1605_v12 = vpop.permute.xlu0 %1604  ;;  %v1731_v2 = vld [vmem:[#allocation4 + $0x18] sm:$0xff]  ;;  %v6022_v18 = vld [vmem:[%s7899_s5 + $0x80] sm:$0xff]  }
 0x20c   : > { %1650 = vst.msk [vmem:[#allocation4 + $0x68] sm:$0xff] %vm1070_vm2, %v1605_v12  ;;  %2304 = vmatmul.mubr.bf16.gmra.mrb[60].mxu1 %v1803_v25  ;;  %2344 = vmatprep.mubr.bf16.mxu0 %v1731_v2  ;;  %v1782_v2 = vld [vmem:[#allocation4 + $0x1b0] sm:$0xff] }
 0x20d   : > { %2345 = vmatmul.mubr.bf16.vlgmr.msra.gmra.mrb[64].mxu0 %v1730_v46  ;;  %5854 = vmatprep.mubr.msk.bf16.mxu1 %vm280_vm0, %v1732_v35  ;;  %v6023_v46 = vld [vmem:[%s7899_s5 + $0x40] sm:$0xff]  }
 0x20e   : > { %v1416_v58 = vpop.permute.xlu1 %1415  ;;  %v1740_v36 = vld [vmem:[#allocation4 + $0x60] sm:$0xff]  ;;  %5487 = vmatpush3.bf16.msra.mxu0 %v6022_v18  ;;  %5374 = vmatprep.subr.bf16.mxu1 %v6023_v46  ;;  %v6042_v18 = vld [vmem:[%s7899_s5 + $0x30] sm:$0xff]  }
 0x20f   : > { %1459 = vst.msk [vmem:[#allocation4 + $0xb0] sm:$0xff] %vm1070_vm2, %v1416_v58  ;;  %v1607_v60 = vpop.permute.xlu0 %1606  ;;  %v1736_v41 = vld [vmem:[#allocation4 + $0x40] sm:$0xff] }
 0x210   : > { %1651 = vst.msk [vmem:[#allocation4 + $0x90] sm:$0xff] %vm1070_vm2, %v1607_v60  ;;  %2352 = vmatprep.mubr.bf16.mxu0 %v1736_v41  ;;  %v6024_v35 = vld [vmem:[%s7899_s5] sm:$0xff]  }
 0x212   : > { %v1418_v11 = vpop.permute.xlu1 %1417  ;;  %v1745_v9 = vld [vmem:[#allocation4 + $0x88] sm:$0xff] }
 0x213   : > { %1460 = vst.msk [vmem:[#allocation4 + $0xd8] sm:$0xff] %vm1070_vm2, %v1418_v11  ;;  %v1609_v27 = vpop.permute.xlu0 %1608  ;;  %v1741_v34 = vld [vmem:[#allocation4 + $0x68] sm:$0xff] }
 0x214   : > { %1652 = vst.msk [vmem:[#allocation4 + $0xb8] sm:$0xff] %vm1070_vm2, %v1609_v27  ;;  %5855 = vmatmul.mubr.msk.bf16.vlgmr.msra.gmra.mrb[64].mxu1 %vm280_vm0, %v1737_v54  ;;  %v1787_v27 = vld [vmem:[#allocation4 + $0x1d8] sm:$0xff] }
 0x215   : > { %2353 = vmatmul.mubr.bf16.gmra.mrb[68].mxu0 %v1735_v51  ;;  %5858 = vmatprep.mubr.msk.bf16.mxu1 %vm280_vm0, %v1742_v24  ;;  %v6025_v24 = vld [vmem:[%s7899_s5 + $0x48] sm:$0xff]  }
 0x216   : > { %v1420_v5 = vpop.permute.xlu1 %1419  ;;  %2360 = vmatprep.mubr.bf16.mxu0 %v1741_v34  ;;  %v1750_v37 = vld [vmem:[#allocation4 + $0xb0] sm:$0xff]  ;;  %5375 = vmatpush3.bf16.msra.mxu1 %v6024_v35  ;;  %v6026_v34 = vld [vmem:[%s7899_s5 + $0x8] sm:$0xff]  }
 0x217   : > { %1461 = vst.msk [vmem:[#allocation4 + $0x100] sm:$0xff] %vm1070_vm2, %v1420_v5  ;;  %v1611_v31 = vpop.permute.xlu0 %1610  ;;  %v1746_v33 = vld [vmem:[#allocation4 + $0x90] sm:$0xff]  ;;  %v1792_v5 = vld [vmem:[#allocation4 + $0x200] sm:$0xff]  ;;  %5376 = vmatprep.subr.bf16.mxu1 %v6025_v24 }
 0x218   : > { %1653 = vst.msk [vmem:[#allocation4 + $0xe0] sm:$0xff] %vm1070_vm2, %v1611_v31  ;;  %v2796_v24 = vld [vmem:[#allocation3 + $0x9] sm:$0xff] }
 0x21a   : > { %v1422_v14 = vpop.permute.xlu1 %1421  ;;  %v1755_v25 = vld [vmem:[#allocation4 + $0xd8] sm:$0xff]  ;;  %5377 = vmatpush3.bf16.msra.mxu1 %v6026_v34 }
 0x21b   : > { %1462 = vst.msk [vmem:[#allocation4 + $0x128] sm:$0xff] %vm1070_vm2, %v1422_v14  ;;  %v1613_v17 = vpop.permute.xlu0 %1612  ;;  %v1751_v8 = vld [vmem:[#allocation4 + $0xb8] sm:$0xff]  ;;  %v6027_v14 = vld [vmem:[%s7899_s5 + $0xc8] sm:$0xff]  }
 0x21c   : > { %1654 = vst.msk [vmem:[#allocation4 + $0x108] sm:$0xff] %vm1070_vm2, %v1613_v17  ;;  %5859 = vmatmul.mubr.msk.bf16.gmra.mrb[68].mxu1 %vm280_vm0, %v1747_v28  ;;  %5488 = vmatprep.subr.bf16.mxu0 %v6027_v14  ;;  %v1797_v17 = vld [vmem:[#allocation4 + $0x228] sm:$0xff]  ;;  %v2731_v14 = vld [vmem:[#allocation3] sm:$0xff] }
 0x21d   : > { %2361 = vmatmul.mubr.bf16.gmra.mrb[72].mxu0 %v1740_v36  ;;  %5862 = vmatprep.mubr.msk.bf16.mxu1 %vm280_vm0, %v1752_v49  ;;  %v6028_v28 = vld [vmem:[%s7899_s5 + $0x88] sm:$0xff]   ;;  %v1802_v36 = vld [vmem:[#allocation4 + $0x250] sm:$0xff] }
 0x21e   : > { %v1424_v16 = vpop.permute.xlu1 %1423  ;;  %2368 = vmatprep.mubr.bf16.mxu0 %v1746_v33  ;;  %v1760_v54 = vld [vmem:[#allocation4 + $0x100] sm:$0xff]  ;;  %v6029_v33 = vld [vmem:[%s7899_s5 + $0x50] sm:$0xff]   ;;  %5489 = vmatpush3.bf16.msra.mxu0 %v6028_v28  ;;  %v6047_v28 = vld [vmem:[%s7899_s5 + $0xe8] sm:$0xff]  }
 0x21f   : > { %1463 = vst.msk [vmem:[#allocation4 + $0x150] sm:$0xff] %vm1070_vm2, %v1424_v16  ;;  %v1615_v59 = vpop.permute.xlu0 %1614  ;;  %v1756_v45 = vld [vmem:[#allocation4 + $0xe0] sm:$0xff]  ;;  %5378 = vmatprep.subr.bf16.mxu1 %v6029_v33 }
 0x220   : > { %1655 = vst.msk [vmem:[#allocation4 + $0x130] sm:$0xff] %vm1070_vm2, %v1615_v59  ;;  %v6030_v59 = vld [vmem:[%s7899_s5 + $0x10] sm:$0xff]  }
 0x221   : > { %5379 = vmatpush3.bf16.msra.mxu1 %v6030_v59  ;;  %v6048_v59 = vld [vmem:[%s7899_s5 + $0xa8] sm:$0xff]  }
 0x222   : > { %v1426_v22 = vpop.permute.xlu1 %1425  ;;  %v1765_v16 = vld [vmem:[#allocation4 + $0x128] sm:$0xff] }
 0x223   : > { %1464 = vst.msk [vmem:[#allocation4 + $0x178] sm:$0xff] %vm1070_vm2, %v1426_v22  ;;  %v1617_v4 = vpop.permute.xlu0 %1616  ;;  %v1761_v58 = vld [vmem:[#allocation4 + $0x108] sm:$0xff]  ;;  %v1807_v22 = vld [vmem:[#allocation4 + $0x278] sm:$0xff] }
 0x224   : > { %1656 = vst.msk [vmem:[#allocation4 + $0x158] sm:$0xff] %vm1070_vm2, %v1617_v4  ;;  %5863 = vmatmul.mubr.msk.bf16.gmra.mrb[72].mxu1 %vm280_vm0, %v1757_v32 }
 0x225   : > { %2369 = vmatmul.mubr.bf16.gmra.mrb[76].mxu0 %v1745_v9  ;;  %5866 = vmatprep.mubr.msk.bf16.mxu1 %vm280_vm0, %v1762_v55  ;;  %v6032_v9 = vld [vmem:[%s7899_s5 + $0x18] sm:$0xff]   ;;  %v6033_v55 = vld [vmem:[%s7899_s5 + $0xd0] sm:$0xff]  }
 0x226   : > { %v1428_v62 = vpop.permute.xlu1 %1427  ;;  %2376 = vmatprep.mubr.bf16.mxu0 %v1751_v8  ;;  %v1770_v4 = vld [vmem:[#allocation4 + $0x150] sm:$0xff]  ;;  %5490 = vmatprep.subr.bf16.mxu0 %v6033_v55 }
 0x227   : > { %1465 = vst.msk [vmem:[#allocation4 + $0x1a0] sm:$0xff] %vm1070_vm2, %v1428_v62  ;;  %v1619_v42 = vpop.permute.xlu0 %1618  ;;  %v1766_v51 = vld [vmem:[#allocation4 + $0x130] sm:$0xff]  ;;  %v6031_v62 = vld [vmem:[%s7899_s5 + $0x58] sm:$0xff]  }
 0x228   : > { %1657 = vst.msk [vmem:[#allocation4 + $0x180] sm:$0xff] %vm1070_vm2, %v1619_v42  ;;  %5380 = vmatprep.subr.bf16.mxu1 %v6031_v62  ;;  %v6034_v8 = vld [vmem:[%s7899_s5 + $0x90] sm:$0xff]  }
 0x229   : > { %5381 = vmatpush3.bf16.msra.mxu1 %v6032_v9  ;;  %5491 = vmatpush3.bf16.msra.mxu0 %v6034_v8  ;;  %v6050_v62 = vld [vmem:[%s7899_s5 + $0xf0] sm:$0xff]  }
 0x22a   : > { %v1430_v56 = vpop.permute.xlu1 %1429  ;;  %v1775_v42 = vld [vmem:[#allocation4 + $0x178] sm:$0xff]  ;;  %v6052_v55 = vld [vmem:[%s7899_s5 + $0xb0] sm:$0xff]  }
 0x22b   : > { %1466 = vst.msk [vmem:[#allocation4 + $0x1c8] sm:$0xff] %vm1070_vm2, %v1430_v56  ;;  %v1621_v26 = vpop.permute.xlu0 %1620  ;;  %v1771_v49 = vld [vmem:[#allocation4 + $0x158] sm:$0xff] }
 0x22c   : > { %1658 = vst.msk [vmem:[#allocation4 + $0x1a8] sm:$0xff] %vm1070_vm2, %v1621_v26  ;;  %5867 = vmatmul.mubr.msk.bf16.gmra.mrb[76].mxu1 %vm280_vm0, %v1767_v40  ;;  %v6035_v26 = vld [vmem:[%s7899_s5 + $0x60] sm:$0xff]  }
 0x22d   : > { %2377 = vmatmul.mubr.bf16.gmra.mrb[80].mxu0 %v1750_v37  ;;  %5870 = vmatprep.mubr.msk.bf16.mxu1 %vm280_vm0, %v1772_v19  ;;  %v6036_v40 = vld [vmem:[%s7899_s5 + $0x20] sm:$0xff]   ;;  %v6037_v19 = vld [vmem:[%s7899_s5 + $0x68] sm:$0xff]  }
 0x22e   : > { %v1432_v20 = vpop.permute.xlu1 %1431  ;;  %2384 = vmatprep.mubr.bf16.mxu0 %v1756_v45  ;;  %5382 = vmatprep.subr.bf16.mxu1 %v6035_v26  ;;  %v6038_v45 = vld [vmem:[%s7899_s5 + $0x28] sm:$0xff]  }
 0x22f   : > { %1467 = vst.msk [vmem:[#allocation4 + $0x1f0] sm:$0xff] %vm1070_vm2, %v1432_v20  ;;  %v1623_v48 = vpop.permute.xlu0 %1622  ;;  %v1776_v32 = vld [vmem:[#allocation4 + $0x180] sm:$0xff]  ;;  %5383 = vmatpush3.bf16.msra.mxu1 %v6036_v40 }
 0x230   : > { %1659 = vst.msk [vmem:[#allocation4 + $0x1d0] sm:$0xff] %vm1070_vm2, %v1623_v48  ;;  %v1780_v20 = vld [vmem:[#allocation4 + $0x1a0] sm:$0xff]  ;;  %5384 = vmatprep.subr.bf16.mxu1 %v6037_v19  ;;  %v6039_v48 = vld [vmem:[%s7899_s5 + $0xd8] sm:$0xff]  }
 0x231   : > { %5492 = vmatprep.subr.bf16.mxu0 %v6039_v48 }
 0x232   : > { %v1434_v10 = vpop.permute.xlu1 %1433  ;;  %5493 = vmatpush3.bf16.msra.mxu0 %v6040_v7  ;;  %v6049_v7 = vld [vmem:[%s7899_s5 + $0x140] sm:$0xff]  }
 0x233   : > { %1468 = vst.msk [vmem:[#allocation4 + $0x218] sm:$0xff] %vm1070_vm2, %v1434_v10  ;;  %v1625_v53 = vpop.permute.xlu0 %1624  ;;  %v1781_v56 = vld [vmem:[#allocation4 + $0x1a8] sm:$0xff]  ;;  %5385 = vmatpush3.bf16.msra.mxu1 %v6038_v45 }
 0x234   : > { %1660 = vst.msk [vmem:[#allocation4 + $0x1f8] sm:$0xff] %vm1070_vm2, %v1625_v53  ;;  %5871 = vmatmul.mubr.msk.bf16.gmra.mrb[80].mxu1 %vm280_vm0, %v1777_v61  ;;  %v1785_v10 = vld [vmem:[#allocation4 + $0x1c8] sm:$0xff]  ;;  %v6041_v61 = vld [vmem:[%s7899_s5 + $0x70] sm:$0xff]  }
 0x235   : > { %2385 = vmatmul.mubr.bf16.gmra.mrb[84].mxu0 %v1755_v25  ;;  %5874 = vmatprep.mubr.msk.bf16.mxu1 %vm280_vm0, %v1782_v2 }
 0x236   : > { %v1436_v12 = vpop.permute.xlu1 %1435  ;;  %2392 = vmatprep.mubr.bf16.mxu0 %v1761_v58  ;;  %5386 = vmatprep.subr.bf16.mxu1 %v6041_v61 }
 0x237   : > { %1469 = vst.msk [vmem:[#allocation4 + $0x240] sm:$0xff] %vm1070_vm2, %v1436_v12  ;;  %v1627_v60 = vpop.permute.xlu0 %1626  ;;  %v1786_v37 = vld [vmem:[#allocation4 + $0x1d0] sm:$0xff]  ;;  %5387 = vmatpush3.bf16.msra.mxu1 %v6042_v18 }
 0x238   : > { %1661 = vst.msk [vmem:[#allocation4 + $0x220] sm:$0xff] %vm1070_vm2, %v1627_v60  ;;  %v1790_v60 = vld [vmem:[#allocation4 + $0x1f0] sm:$0xff] }
 0x23a   : > { %v1438_v41 = vpop.permute.xlu1 %1437 }
 0x23b   : > { %1470 = vst.msk [vmem:[#allocation4 + $0x268] sm:$0xff] %vm1070_vm2, %v1438_v41  ;;  %v1629_v11 = vpop.permute.xlu0 %1628  ;;  %v1791_v53 = vld [vmem:[#allocation4 + $0x1f8] sm:$0xff] }
 0x23c   : > { %1662 = vst.msk [vmem:[#allocation4 + $0x248] sm:$0xff] %vm1070_vm2, %v1629_v11  ;;  %5875 = vmatmul.mubr.msk.bf16.gmra.mrb[84].mxu1 %vm280_vm0, %v1787_v27  ;;  %v6043_v41 = vld [vmem:[%s7899_s5 + $0x78] sm:$0xff]   ;;  %v6045_v11 = vld [vmem:[%s7899_s5 + $0xe0] sm:$0xff]  }
 0x23d   : > { %2393 = vmatmul.mubr.bf16.gmra.mrb[88].mxu0 %v1760_v54  ;;  %5878 = vmatprep.mubr.msk.bf16.mxu1 %vm280_vm0, %v1792_v5  ;;  %v6044_v54 = vld [vmem:[%s7899_s5 + $0x38] sm:$0xff]   ;;  %v6046_v5 = vld [vmem:[%s7899_s5 + $0xa0] sm:$0xff]  }
 0x23e   : > { %2400 = vmatprep.mubr.bf16.mxu0 %v1766_v51  ;;  %5388 = vmatprep.subr.bf16.mxu1 %v6043_v41  ;;  %v2795_v51 = vld [vmem:[#allocation3 + $0x1] sm:$0xff]  ;;  %v1800_v48 = vld [vmem:[#allocation4 + $0x240] sm:$0xff] }
 0x23f   : > { %v1631_v31 = vpop.permute.xlu0 %1630  ;;  %v1796_v27 = vld [vmem:[#allocation4 + $0x220] sm:$0xff]  ;;  %5389 = vmatpush3.bf16.msra.mxu1 %v6044_v54  ;;  %5494 = vmatprep.subr.bf16.mxu0 %v6045_v11 }
 0x240   : > { %1663 = vst.msk [vmem:[#allocation4 + $0x270] sm:$0xff] %vm1070_vm2, %v1631_v31  ;;  %v2827_v31 = vpack.c.bf16 %v2796_v24, %v2795_v51  ;;  %5495 = vmatpush3.bf16.msra.mxu0 %v6046_v5  ;;  %5598 = vmatprep.subr.bf16.mxu1 %v6049_v7  ;;  %v6055_v51 = vld [vmem:[%s7899_s5 + $0x148] sm:$0xff]  }
 0x241   : > { %5496 = vmatprep.subr.bf16.mxu0 %v6047_v28  ;;  %v6056_v24 = vld [vmem:[%s7899_s5 + $0x108] sm:$0xff]  }
 0x243   : > { %v1801_v9 = vld [vmem:[#allocation4 + $0x248] sm:$0xff] }
 0x244   : > { %5879 = vmatmul.mubr.msk.bf16.gmra.mrb[88].mxu1 %vm280_vm0, %v1797_v17  ;;  %5497 = vmatpush3.bf16.msra.mxu0 %v6048_v59 }
 0x245   : > { %2401 = vmatmul.mubr.bf16.gmra.mrb[92].mxu0 %v1765_v16  ;;  %5882 = vmatprep.mubr.msk.bf16.mxu1 %vm280_vm0, %v1802_v36  ;;  %v6094_v16 = vld [vmem:[#allocation3 + $0x8] sm:$0xff] }
 0x246   : > { %2408 = vmatprep.mubr.bf16.mxu0 %v1771_v49  ;;  %v2763_v36 = vpack.c.bf16 %v6094_v16, %v2731_v14  ;;  %5498 = vmatprep.subr.bf16.mxu0 %v6050_v62 }
 0x247   : > { %v1806_v45 = vld [vmem:[#allocation4 + $0x270] sm:$0xff] }
 0x248   : > { %5499 = vmatpush3.bf16.msra.mxu0 %v6052_v55  ;;  %v6058_v55 = vld [vmem:[%s7899_s5 + $0x110] sm:$0xff]  }
 0x24c   : > { %5883 = vmatmul.mubr.msk.bf16.gmra.mrb[92].mxu1 %vm280_vm0, %v1807_v22 }
 0x24d   : > { %2409 = vmatmul.mubr.bf16.gmra.mrb[96].mxu0 %v1770_v4  ;;  %4067 = vmatprep.mubr.bf16.mxu1 %v2827_v31 }
 0x24e   : > { %2416 = vmatprep.mubr.bf16.mxu0 %v1776_v32  ;;  %v1795_v32 = vld [vmem:[#allocation4 + $0x218] sm:$0xff] }
 0x254   : > { %4068 = vmatmul.mubr.bf16.vlgmr.msra.gmra.mrb[96].mxu1 %v2763_v36 }
 0x255   : > { %2417 = vmatmul.mubr.bf16.gmra.mrb[100].mxu0 %v1775_v42 }
 0x256   : > { %2424 = vmatprep.mubr.bf16.mxu0 %v1781_v56  ;;  %v6053_v56 = vld [vmem:[%s7899_s5 + $0xf8] sm:$0xff]  }
 0x257   : > { %5500 = vmatprep.subr.bf16.mxu0 %v6053_v56 }
 0x25d   : > { %2425 = vmatmul.mubr.bf16.gmra.mrb[104].mxu0 %v1780_v20  ;;  %v6054_v20 = vld [vmem:[%s7899_s5 + $0xb8] sm:$0xff]  }
 0x25e   : > { %2432 = vmatprep.mubr.bf16.mxu0 %v1786_v37  ;;  %5501 = vmatpush3.bf16.msra.mxu0 %v6054_v20 }
 0x265   : > { %2433 = vmatmul.mubr.bf16.gmra.mrb[108].mxu0 %v1785_v10  ;;  %v6051_v10 = vld [vmem:[%s7899_s5 + $0x100] sm:$0xff]  }
 0x266   : > { %2440 = vmatprep.mubr.bf16.mxu0 %v1791_v53  ;;  %5599 = vmatpush3.bf16.msra.mxu1 %v6051_v10 }
 0x267   : > { %v5146_v12 = vpop.f32.mrb[0].mxu1  ;;  %5600 = vmatprep.subr.bf16.mxu1 %v6055_v51 }
 0x268   : > { %v5147_v25 = vpop.f32.mrb[1].mxu1 }
 0x269   : > { %v7033_v2 = vadd.f32 %v5147_v25, %v5146_v12  ;;  %v5149_v58 = vpop.f32.mrb[2].mxu1 }
 0x26a   : > { %v5150_v46 = vpop.f32.mrb[3].mxu1  ;;  %5601 = vmatpush3.bf16.msra.mxu1 %v6056_v24  ;;  %v6061_v24 = vld [vmem:[%s7899_s5 + $0x1c0] sm:$0xff]  }
 0x26b   : > { %v7035_v35 = vadd.f32 %v5150_v46, %v5149_v58  ;;  %v1805_v46 = vld [vmem:[#allocation4 + $0x268] sm:$0xff]  ;;  %5710 = vmatprep.subr.bf16.mxu0 %v6061_v24 }
 0x26d   : > { %2441 = vmatmul.mubr.bf16.gmra.mrb[112].mxu0 %v1790_v60 }
 0x26e   : > { %2448 = vmatprep.mubr.bf16.mxu0 %v1796_v27 }
 0x26f   : > { %v5152_v34 = vpop.f32.mrb[4].mxu1 }
 0x270   : > { %v5153_v17 = vpop.f32.mrb[5].mxu1 }
 0x271   : > { %v7052_v49 = vadd.f32 %v5153_v17, %v5152_v34  ;;  %v5155_v33 = vpop.f32.mrb[6].mxu1 }
 0x272   : > { %v5156_v22 = vpop.f32.mrb[7].mxu1 }
 0x273   : > { %v7057_v4 = vadd.f32 %v5156_v22, %v5155_v33 }
 0x275   : > { %2449 = vmatmul.mubr.bf16.gmra.mrb[116].mxu0 %v1795_v32 }
 0x276   : > { %2456 = vmatprep.mubr.bf16.mxu0 %v1801_v9  ;;  %v6057_v9 = vld [vmem:[%s7899_s5 + $0x150] sm:$0xff]  }
 0x277   : > { %v5158_v8 = vpop.f32.mrb[8].mxu1  ;;  %5602 = vmatprep.subr.bf16.mxu1 %v6057_v9 }
 0x278   : > { %v5159_v42 = vpop.f32.mrb[9].mxu1  ;;  %5603 = vmatpush3.bf16.msra.mxu1 %v6058_v55 }
 0x279   : > { %v7068_v26 = vadd.f32 %v5159_v42, %v5158_v8  ;;  %v5161_v40 = vpop.f32.mrb[10].mxu1 }
 0x27a   : > { %v5162_v37 = vpop.f32.mrb[11].mxu1 }
 0x27b   : > { %v7073_v19 = vadd.f32 %v5162_v37, %v5161_v40 }
 0x27d   : > { %2457 = vmatmul.mubr.bf16.gmra.mrb[120].mxu0 %v1800_v48 }
 0x27e   : > { %2464 = vmatprep.mubr.bf16.mxu0 %v1806_v45 }
 0x27f   : > { %v5164_v53 = vpop.f32.mrb[12].mxu1 }
 0x280   : > { %v5165_v61 = vpop.f32.mrb[13].mxu1 }
 0x281   : > { %v7081_v18 = vadd.f32 %v5165_v61, %v5164_v53  ;;  %v5167_v12 = vpop.f32.mrb[14].mxu1 }
 0x282   : > { %v5168_v25 = vpop.f32.mrb[15].mxu1 }
 0x283   : > { %v7083_v58 = vadd.f32 %v5168_v25, %v5167_v12  ;;  %v6059_v12 = vld [vmem:[%s7899_s5 + $0x158] sm:$0xff]  }
 0x284   : > { %v6060_v25 = vld [vmem:[%s7899_s5 + $0x118] sm:$0xff]   ;;  %5604 = vmatprep.subr.bf16.mxu1 %v6059_v12 }
 0x285   : > { %2465 = vmatmul.mubr.bf16.gmra.mrb[124].mxu0 %v1805_v46  ;;  %5605 = vmatpush3.bf16.msra.mxu1 %v6060_v25 }
 0x287   : > { %v5170_v60 = vpop.f32.mrb[16].mxu1 }
 0x288   : > { %v5171_v41 = vpop.f32.mrb[17].mxu1 }
 0x289   : > { %v7085_v11 = vadd.f32 %v5171_v41, %v5170_v60  ;;  %v5173_v27 = vpop.f32.mrb[18].mxu1 }
 0x28a   : > { %v5174_v54 = vpop.f32.mrb[19].mxu1 }
 0x28b   : > { %v7087_v5 = vadd.f32 %v5174_v54, %v5173_v27 }
 0x28f   : > { %v5176_v34 = vpop.f32.mrb[20].mxu1 }
 0x290   : > { %v5177_v31 = vpop.f32.mrb[21].mxu1 }
 0x291   : > { %v7095_v14 = vadd.f32 %v5177_v31, %v5176_v34  ;;  %v5179_v17 = vpop.f32.mrb[22].mxu1 }
 0x292   : > { %v5180_v28 = vpop.f32.mrb[23].mxu1 }
 0x293   : > { %v7097_v16 = vadd.f32 %v5180_v28, %v5179_v17 }
 0x297   : > { %v5182_v36 = vpop.f32.mrb[24].mxu1 }
 0x298   : > { %v5183_v33 = vpop.f32.mrb[25].mxu1 }
 0x299   : > { %v7099_v59 = vadd.f32 %v5183_v33, %v5182_v36  ;;  %v5185_v22 = vpop.f32.mrb[26].mxu1 }
 0x29a   : > { %v5186_v32 = vpop.f32.mrb[27].mxu1 }
 0x29b   : > { %v7101_v62 = vadd.f32 %v5186_v32, %v5185_v22  ;;  %v6063_v22 = vld [vmem:[%s7899_s5 + $0x160] sm:$0xff]  }
 0x29c   : > { %v6064_v32 = vld [vmem:[%s7899_s5 + $0x120] sm:$0xff]   ;;  %5606 = vmatprep.subr.bf16.mxu1 %v6063_v22 }
 0x29d   : > { %5607 = vmatpush3.bf16.msra.mxu1 %v6064_v32  ;;  %v6072_v32 = vld [vmem:[%s7899_s5 + $0x130] sm:$0xff]  }
 0x29f   : > { %v5188_v8 = vpop.f32.mrb[28].mxu1 }
 0x2a0   : > { %v5189_v42 = vpop.f32.mrb[29].mxu1 }
 0x2a1   : > { %v7109_v56 = vadd.f32 %v5189_v42, %v5188_v8  ;;  %v5191_v40 = vpop.f32.mrb[30].mxu1 }
 0x2a2   : > { %v5192_v20 = vpop.f32.mrb[31].mxu1 }
 0x2a3   : > { %v7111_v37 = vadd.f32 %v5192_v20, %v5191_v40 }
 0x2a7   : > { %v5194_v45 = vpop.f32.mrb[32].mxu1 }
 0x2a8   : > { %v5195_v48 = vpop.f32.mrb[33].mxu1 }
 0x2a9   : > { %v7113_v7 = vadd.f32 %v5195_v48, %v5194_v45  ;;  %v5197_v10 = vpop.f32.mrb[34].mxu1 }
 0x2aa   : > { %v5198_v53 = vpop.f32.mrb[35].mxu1 }
 0x2ab   : > { %v7115_v61 = vadd.f32 %v5198_v53, %v5197_v10 }
 0x2af   : > { %v5200_v46 = vpop.f32.mrb[36].mxu1 }
 0x2b0   : > { %v5201_v60 = vpop.f32.mrb[37].mxu1 }
 0x2b1   : > { %v7123_v41 = vadd.f32 %v5201_v60, %v5200_v46  ;;  %v5203_v27 = vpop.f32.mrb[38].mxu1  ;;  %v6067_v46 = vld [vmem:[%s7899_s5 + $0x168] sm:$0xff]  }
 0x2b2   : > { %v5204_v54 = vpop.f32.mrb[39].mxu1  ;;  %v6068_v60 = vld [vmem:[%s7899_s5 + $0x128] sm:$0xff]   ;;  %5608 = vmatprep.subr.bf16.mxu1 %v6067_v46 }
 0x2b3   : > { %v7125_v51 = vadd.f32 %v5204_v54, %v5203_v27  ;;  %5609 = vmatpush3.bf16.msra.mxu1 %v6068_v60 }
 0x2b7   : > { %v5206_v34 = vpop.f32.mrb[40].mxu1 }
 0x2b8   : > { %v5207_v31 = vpop.f32.mrb[41].mxu1 }
 0x2b9   : > { %v7130_v17 = vadd.f32 %v5207_v31, %v5206_v34  ;;  %v5209_v28 = vpop.f32.mrb[42].mxu1 }
 0x2ba   : > { %v5210_v36 = vpop.f32.mrb[43].mxu1 }
 0x2bb   : > { %v7132_v33 = vadd.f32 %v5210_v36, %v5209_v28  ;;  %v6071_v36 = vld [vmem:[%s7899_s5 + $0x170] sm:$0xff]  }
 0x2bc   : > { %5610 = vmatprep.subr.bf16.mxu1 %v6071_v36 }
 0x2bd   : > { %5611 = vmatpush3.bf16.msra.mxu1 %v6072_v32 }
 0x2bf   : > { %v5212_v9 = vpop.f32.mrb[44].mxu1 }
 0x2c0   : > { %v5213_v55 = vpop.f32.mrb[45].mxu1 }
 0x2c1   : > { %v7140_v8 = vadd.f32 %v5213_v55, %v5212_v9  ;;  %v5215_v42 = vpop.f32.mrb[46].mxu1 }
 0x2c2   : > { %v5216_v40 = vpop.f32.mrb[47].mxu1 }
 0x2c3   : > { %v7142_v20 = vadd.f32 %v5216_v40, %v5215_v42 }
 0x2c5   : > { %7916 = vst [vmem:[#allocation20_spill] sm:$0xff] %v7142_v20 }
 0x2c7   : > { %v5218_v45 = vpop.f32.mrb[48].mxu1 }
 0x2c8   : > { %v5219_v48 = vpop.f32.mrb[49].mxu1 }
 0x2c9   : > { %v7144_v10 = vadd.f32 %v5219_v48, %v5218_v45  ;;  %v5221_v53 = vpop.f32.mrb[50].mxu1  ;;  %v420_v48 = vsub.s32 0, %v6384_v39  ;;  %v6095_v39 = vld [vmem:[%s7896_s2] sm:$0x3] }
 0x2ca   : > { %v5222_v12 = vpop.f32.mrb[51].mxu1 }
 0x2cb   : > { %7917 = vst [vmem:[#allocation21_spill] sm:$0xff] %v7144_v10  ;;  %v7146_v25 = vadd.f32 %v5222_v12, %v5221_v53  ;;  %v7172_v53 = vld [vmem:[%s7898_s4] ss:$0 sm:$0xff] }
 0x2cd   : > { %7918 = vst [vmem:[#allocation22_spill] sm:$0xff] %v7146_v25 }
 0x2cf   : > { %v5224_v27 = vpop.f32.mrb[52].mxu1 }
 0x2d0   : > { %v5225_v54 = vpop.f32.mrb[53].mxu1 }
 0x2d1   : > { %v7154_v24 = vadd.f32 %v5225_v54, %v5224_v27  ;;  %v5227_v34 = vpop.f32.mrb[54].mxu1 }
 0x2d2   : > { %v5228_v31 = vpop.f32.mrb[55].mxu1 }
 0x2d3   : > { %7919 = vst [vmem:[#allocation23_spill] sm:$0xff] %v7154_v24  ;;  %v7156_v28 = vadd.f32 %v5228_v31, %v5227_v34  ;;  %v2186_v31 = vadd.f32 %v7033_v2, %v7172_v53  ;;  %v6075_v2 = vld [vmem:[%s7899_s5 + $0x178] sm:$0xff]  }
 0x2d4   : > { %5612 = vmatprep.subr.bf16.mxu1 %v6075_v2 }
 0x2d5   : > { %7920 = vst [vmem:[#allocation24_spill] sm:$0xff] %v7156_v28 }
 0x2d7   : > { %v5230_v22 = vpop.f32.mrb[56].mxu1 }
 0x2d8   : > { %v5231_v9 = vpop.f32.mrb[57].mxu1 }
 0x2d9   : > { %v7164_v55 = vadd.f32 %v5231_v9, %v5230_v22  ;;  %v5233_v42 = vpop.f32.mrb[58].mxu1  ;;  %v7181_v9 = vrot.slane %v6095_v39, %v420_v48  ;;  %v6076_v48 = vld [vmem:[%s7899_s5 + $0x138] sm:$0xff]   ;;  %v2194_v39 = vadd.f32 %v7052_v49, %v7172_v53 }
 0x2da   : > { %v5234_v40 = vpop.f32.mrb[59].mxu1  ;;  %5613 = vmatpush3.bf16.msra.mxu1 %v6076_v48 }
 0x2db   : > { %7921 = vst [vmem:[#allocation25_spill] sm:$0xff] %v7164_v55  ;;  %v7166_v45 = vadd.f32 %v5234_v40, %v5233_v42  ;;  %v649_v2 = vadd.f32 %v6425_v1, %v7181_v9  ;;  %v653_v48 = vadd.f32 %v6435_v6, %v7181_v9 }
 0x2dd   : > { %7922 = vst [vmem:[#allocation26_spill] sm:$0xff] %v7166_v45 }
 0x2df   : > { %v5236_v12 = vpop.f32.mrb[60].mxu1 }
 0x2e0   : > { %v5237_v46 = vpop.f32.mrb[61].mxu1  ;;  %v5258_v60 = vpop.f32.mrb[64].mxu0 }
 0x2e1   : > { %v7174_v27 = vadd.f32 %v5237_v46, %v5236_v12  ;;  %v5239_v54 = vpop.f32.mrb[62].mxu1  ;;  %v5259_v34 = vpop.f32.mrb[65].mxu0  ;;  %v2189_v12 = vadd.f32 %v7035_v35, %v7172_v53  ;;  %v643_v35 = vadd.f32 %v6413_v52, %v7181_v9  ;;  %v2197_v52 = vadd.f32 %v7057_v4, %v7172_v53  ;;  %v6081_v4 = vld [vmem:[%s7899_s5 + $0x200] sm:$0xff]  }
 0x2e2   : > { %v5260_v36 = vadd.f32 %v5259_v34, %v5258_v60  ;;  %v5240_v22 = vpop.f32.mrb[63].mxu1  ;;  %v5261_v32 = vpop.f32.mrb[66].mxu0  ;;  %v639_v60 = vadd.f32 %v6404_v47, %v7181_v9  ;;  %5886 = vmatprep.subr.bf16.mxu1 %v6081_v4 }
 0x2e3   : > { %7923 = vst [vmem:[#allocation27_spill] sm:$0xff] %v7174_v27  ;;  %v7183_v42 = vadd.f32 %v5240_v22, %v5239_v54  ;;  %v5262_v40 = vpop.f32.mrb[67].mxu0  ;;  %v799_v24 = vmax.f32 %v643_v35, 0.0 }
 0x2e4   : > { %v5263_v46 = vadd.f32 %v5262_v40, %v5261_v32  ;;  %v2347_v27 = vadd.f32 %v5260_v36, %v2186_v31 }
 0x2e5   : > { %7924 = vst [vmem:[#allocation28_spill] sm:$0xff] %v7183_v42 }
 0x2e6   : > { %v2350_v45 = vadd.f32 %v5263_v46, %v2189_v12  ;;  %v797_v46 = vmax.f32 %v639_v60, 0.0 }
 0x2e7   : > { %v5856_v34 = vpop.f32.mrb[64].mxu1 }
 0x2e8   : > { %v5264_v54 = vpop.f32.mrb[68].mxu0  ;;  %v2507_v22 = vpop.f32.mrb[65].mxu1 }
 0x2e9   : > { %v2508_v31 = vadd.f32 %v2507_v22, %v2347_v27  ;;  %v5265_v36 = vpop.f32.mrb[69].mxu0  ;;  %v5857_v32 = vpop.f32.mrb[66].mxu1 }
 0x2ea   : > { %v5266_v40 = vadd.f32 %v5265_v36, %v5264_v54  ;;  %v5267_v47 = vpop.f32.mrb[70].mxu0  ;;  %v2510_v12 = vpop.f32.mrb[67].mxu1 }
 0x2eb   : > { %v2634_v42 = vmax.f32 %v2508_v31, 0.0  ;;  %v2511_v55 = vadd.f32 %v2510_v12, %v2350_v45  ;;  %v5268_v28 = vpop.f32.mrb[71].mxu0  ;;  %v801_v31 = vmax.f32 %v649_v2, 0.0 }
 0x2ec   : > { %v2355_v27 = vadd.f32 %v5266_v40, %v2194_v39  ;;  %v5269_v22 = vadd.f32 %v5268_v28, %v5267_v47  ;;  %v803_v28 = vmax.f32 %v653_v48, 0.0 }
 0x2ed   : > { %v2666_v49 = vadd.f32 %v2634_v42, %v797_v46  ;;  %v2635_v54 = vmax.f32 %v2511_v55, 0.0  ;;  %v2205_v46 = vadd.f32 %v7073_v19, %v7172_v53 }
 0x2ee   : > { %v2516_v36 = vadd.f32 %v5856_v34, %v2355_v27  ;;  %v2358_v25 = vadd.f32 %v5269_v22, %v2197_v52  ;;  %v2859_v22 = vld [vmem:[#allocation3 + $0x2] sm:$0xff] }
 0x2ef   : > { %2699 = vst [vmem:[#allocation3 + $0x19] sm:$0xff] %v2666_v49  ;;  %v2667_v60 = vadd.f32 %v2635_v54, %v799_v24  ;;  %v7205_v45 = vpop.f32.mrb[68].mxu1  ;;  %v2202_v24 = vadd.f32 %v7068_v26, %v7172_v53  ;;  %v663_v26 = vadd.f32 %v6460_v30, %v7181_v9 }
 0x2f0   : > { %v2636_v12 = vmax.f32 %v2516_v36, 0.0  ;;  %v2519_v1 = vadd.f32 %v5857_v32, %v2358_v25  ;;  %v5270_v10 = vpop.f32.mrb[72].mxu0  ;;  %v2523_v20 = vpop.f32.mrb[69].mxu1  ;;  %v659_v32 = vadd.f32 %v6452_v21, %v7181_v9 }
 0x2f1   : > { %2700 = vst [vmem:[#allocation3 + $0x21] sm:$0xff] %v2667_v60  ;;  %v5271_v6 = vpop.f32.mrb[73].mxu0  ;;  %v7210_v42 = vpop.f32.mrb[70].mxu1  ;;  %v2828_v55 = vpack.c.bf16 %v2667_v60, %v2666_v49 }
 0x2f2   : > { %v2668_v34 = vadd.f32 %v2636_v12, %v801_v31  ;;  %v2637_v35 = vmax.f32 %v2519_v1, 0.0  ;;  %v5272_v39 = vadd.f32 %v5271_v6, %v5270_v10  ;;  %v5273_v40 = vpop.f32.mrb[74].mxu0  ;;  %v2526_v25 = vpop.f32.mrb[71].mxu1  ;;  %v2860_v10 = vld [vmem:[#allocation3 + $0xa] sm:$0xff]  ;;  %v805_v21 = vmax.f32 %v659_v32, 0.0 }
 0x2f3   : > { %v5274_v47 = vpop.f32.mrb[75].mxu0  ;;  %4075 = vmatprep.mubr.bf16.mxu1 %v2828_v55  ;;  %v807_v6 = vmax.f32 %v663_v26, 0.0 }
 0x2f4   : > { %2701 = vst [vmem:[#allocation3 + $0x31] sm:$0xff] %v2668_v34  ;;  %v2669_v2 = vadd.f32 %v2637_v35, %v803_v28  ;;  %v2363_v52 = vadd.f32 %v5272_v39, %v2202_v24  ;;  %v5275_v27 = vadd.f32 %v5274_v47, %v5273_v40  ;;  %v2891_v28 = vpack.c.bf16 %v2860_v10, %v2859_v22  ;;  %v6065_v47 = vld [vmem:[%s7899_s5 + $0x1c8] sm:$0xff]  }
 0x2f5   : > { %v673_v22 = vadd.f32 %v6477_v57, %v7181_v9 }
 0x2f6   : > { %2702 = vst [vmem:[#allocation3 + $0x39] sm:$0xff] %v2669_v2  ;;  %v2524_v48 = vadd.f32 %v2523_v20, %v2363_v52  ;;  %v2366_v49 = vadd.f32 %v5275_v27, %v2205_v46  ;;  %v2829_v54 = vpack.c.bf16 %v2669_v2, %v2668_v34  ;;  %v2923_v1 = vld [vmem:[#allocation3 + $0x18] sm:$0xff]  ;;  %v6062_v20 = vld [vmem:[%s7899_s5 + $0x180] sm:$0xff]   ;;  %v2210_v34 = vadd.f32 %v7081_v18, %v7172_v53 }
 0x2f7   : > { %v7220_v36 = vpop.f32.mrb[72].mxu1  ;;  %v669_v46 = vadd.f32 %v6471_v43, %v7181_v9  ;;  %v2213_v2 = vadd.f32 %v7083_v58, %v7172_v53  ;;  %v6066_v43 = vld [vmem:[%s7899_s5 + $0x188] sm:$0xff]  }
 0x2f8   : > { %v2638_v60 = vmax.f32 %v2524_v48, 0.0  ;;  %v2527_v31 = vadd.f32 %v2526_v25, %v2366_v49  ;;  %v5276_v12 = vpop.f32.mrb[76].mxu0  ;;  %v7222_v19 = vpop.f32.mrb[73].mxu1  ;;  %v2924_v4 = vld [vmem:[#allocation3 + $0x20] sm:$0xff] }
 0x2f9   : > { %v5277_v55 = vpop.f32.mrb[77].mxu0  ;;  %v7224_v30 = vpop.f32.mrb[74].mxu1  ;;  %v2955_v24 = vpack.c.bf16 %v2924_v4, %v2923_v1  ;;  %v2861_v57 = vld [vmem:[#allocation3 + $0x1a] sm:$0xff]  ;;  %v809_v1 = vmax.f32 %v669_v46, 0.0 }
 0x2fa   : > { %v2670_v35 = vadd.f32 %v2638_v60, %v805_v21  ;;  %v2639_v39 = vmax.f32 %v2527_v31, 0.0  ;;  %v5278_v40 = vadd.f32 %v5277_v55, %v5276_v12  ;;  %v5279_v25 = vpop.f32.mrb[78].mxu0  ;;  %v7231_v32 = vpop.f32.mrb[75].mxu1  ;;  %v2862_v12 = vld [vmem:[#allocation3 + $0x22] sm:$0xff] }
 0x2fb   : > { %v5280_v52 = vpop.f32.mrb[79].mxu0  ;;  %4228 = vmatprep.mubr.bf16.mxu0 %v2955_v24  ;;  %4076 = vmatmul.mubr.bf16.gmra.mrb[100].mxu1 %v2955_v24  ;;  %v2925_v10 = vld [vmem:[#allocation3 + $0x30] sm:$0xff]  ;;  %v2218_v24 = vadd.f32 %v7085_v11, %v7172_v53  ;;  %v7263_v46 = vpack.c.bf16 %v2862_v12, %v2861_v57  ;;  %v6073_v11 = vld [vmem:[%s7899_s5 + $0x1d8] sm:$0xff]  }
 0x2fc   : > { %2703 = vst [vmem:[#allocation3 + $0x49] sm:$0xff] %v2670_v35  ;;  %v2671_v18 = vadd.f32 %v2639_v39, %v807_v6  ;;  %v2371_v27 = vadd.f32 %v5278_v40, %v2210_v34  ;;  %v5281_v26 = vadd.f32 %v5280_v52, %v5279_v25  ;;  %4229 = vmatmul.mubr.bf16.vlgmr.msra.gmra.mrb[128].mxu0 %v2891_v28 }
 0x2fd   : > { %4083 = vmatprep.mubr.bf16.mxu1 %v2829_v54  ;;  %v2926_v48 = vld [vmem:[#allocation3 + $0x38] sm:$0xff]  ;;  %5711 = vmatpush3.bf16.msra.mxu0 %v6062_v20  ;;  %v6069_v54 = vld [vmem:[%s7899_s5 + $0x1d0] sm:$0xff]   ;;  %v2221_v52 = vadd.f32 %v7087_v5, %v7172_v53 }
 0x2fe   : > { %2704 = vst [vmem:[#allocation3 + $0x51] sm:$0xff] %v2671_v18  ;;  %v2532_v58 = vadd.f32 %v7205_v45, %v2371_v27  ;;  %v2374_v49 = vadd.f32 %v5281_v26, %v2213_v2  ;;  %v2956_v21 = vpack.c.bf16 %v2926_v48, %v2925_v10  ;;  %v2830_v60 = vpack.c.bf16 %v2671_v18, %v2670_v35  ;;  %v6070_v35 = vld [vmem:[%s7899_s5 + $0x190] sm:$0xff]  }
 0x2ff   : > { %5712 = vmatprep.subr.bf16.mxu0 %v6065_v47  ;;  %v7249_v31 = vpop.f32.mrb[76].mxu1  ;;  %v811_v45 = vmax.f32 %v673_v22, 0.0  ;;  %v679_v2 = vadd.f32 %v6497_v15, %v7181_v9  ;;  %v683_v10 = vadd.f32 %v6504_v29, %v7181_v9  ;;  %v6074_v15 = vld [vmem:[%s7899_s5 + $0x198] sm:$0xff]   ;;  %v2863_v29 = vld [vmem:[#allocation3 + $0x32] sm:$0xff]  ;;  %v2864_v57 = vld [vmem:[#allocation3 + $0x3a] sm:$0xff] }
 0x300   : > { %v2640_v4 = vmax.f32 %v2532_v58, 0.0  ;;  %v2535_v28 = vadd.f32 %v7210_v42, %v2374_v49  ;;  %v5282_v6 = vpop.f32.mrb[80].mxu0  ;;  %v7252_v55 = vpop.f32.mrb[77].mxu1  ;;  %4236 = vmatprep.mubr.bf16.mxu0 %v2956_v21 }
 0x301   : > { %v5283_v20 = vpop.f32.mrb[81].mxu0  ;;  %v7256_v34 = vpop.f32.mrb[78].mxu1  ;;  %5713 = vmatpush3.bf16.msra.mxu0 %v6066_v43  ;;  %v813_v12 = vmax.f32 %v679_v2, 0.0  ;;  %v689_v2 = vadd.f32 %v6522_v50, %v7181_v9  ;;  %v6080_v50 = vld [vmem:[%s7899_s5 + $0x1a8] sm:$0xff]  }
 0x302   : > { %v2672_v39 = vadd.f32 %v2640_v4, %v809_v1  ;;  %v2641_v40 = vmax.f32 %v2535_v28, 0.0  ;;  %v5284_v25 = vadd.f32 %v5283_v20, %v5282_v6  ;;  %v5285_v42 = vpop.f32.mrb[82].mxu0  ;;  %v7261_v47 = vpop.f32.mrb[79].mxu1  ;;  %5714 = vmatprep.subr.bf16.mxu0 %v6069_v54 }
 0x303   : > { %v5286_v18 = vpop.f32.mrb[83].mxu0  ;;  %4084 = vmatmul.mubr.bf16.gmra.mrb[104].mxu1 %v2956_v21  ;;  %v2927_v48 = vld [vmem:[#allocation3 + $0x48] sm:$0xff] }
 0x304   : > { %2705 = vst [vmem:[#allocation3 + $0x61] sm:$0xff] %v2672_v39  ;;  %v2673_v27 = vadd.f32 %v2641_v40, %v811_v45  ;;  %v2379_v26 = vadd.f32 %v5284_v25, %v2218_v24  ;;  %v5287_v22 = vadd.f32 %v5286_v18, %v5285_v42  ;;  %4237 = vmatmul.mubr.bf16.gmra.mrb[132].mxu0 %v7263_v46 }
 0x305   : > { %4091 = vmatprep.mubr.bf16.mxu1 %v2830_v60  ;;  %v2928_v43 = vld [vmem:[#allocation3 + $0x50] sm:$0xff]  ;;  %5715 = vmatpush3.bf16.msra.mxu0 %v6070_v35  ;;  %v2226_v45 = vadd.f32 %v7095_v14, %v7172_v53  ;;  %v6079_v14 = vld [vmem:[%s7899_s5 + $0x1e8] sm:$0xff]  }
 0x306   : > { %2706 = vst [vmem:[#allocation3 + $0x69] sm:$0xff] %v2673_v27  ;;  %v2540_v5 = vadd.f32 %v7222_v19, %v2379_v26  ;;  %v2382_v58 = vadd.f32 %v5287_v22, %v2221_v52  ;;  %v2957_v49 = vpack.c.bf16 %v2928_v43, %v2927_v48  ;;  %v2831_v21 = vpack.c.bf16 %v2673_v27, %v2672_v39  ;;  %v6077_v60 = vld [vmem:[%s7899_s5 + $0x1e0] sm:$0xff]  }
 0x307   : > { %5716 = vmatprep.subr.bf16.mxu0 %v6073_v11  ;;  %v7282_v54 = vpop.f32.mrb[80].mxu1  ;;  %v815_v19 = vmax.f32 %v683_v10, 0.0  ;;  %v6078_v35 = vld [vmem:[%s7899_s5 + $0x1a0] sm:$0xff]   ;;  %v7296_v11 = vpack.c.bf16 %v2864_v57, %v2863_v29  ;;  %v2229_v52 = vadd.f32 %v7097_v16, %v7172_v53  ;;  %v693_v10 = vadd.f32 %v6529_v0, %v7181_v9 }
 0x308   : > { %v2642_v1 = vmax.f32 %v2540_v5, 0.0  ;;  %v2543_v4 = vadd.f32 %v7231_v32, %v2382_v58  ;;  %v5288_v28 = vpop.f32.mrb[84].mxu0  ;;  %v7285_v6 = vpop.f32.mrb[81].mxu1  ;;  %4244 = vmatprep.mubr.bf16.mxu0 %v2957_v49  ;;  %v2865_v0 = vld [vmem:[#allocation3 + $0x4a] sm:$0xff]  ;;  %v817_v29 = vmax.f32 %v689_v2, 0.0  ;;  %v2237_v2 = vadd.f32 %v7101_v62, %v7172_v53 }
 0x309   : > { %v5289_v24 = vpop.f32.mrb[85].mxu0  ;;  %v7289_v20 = vpop.f32.mrb[82].mxu1  ;;  %5717 = vmatpush3.bf16.msra.mxu0 %v6074_v15 }
 0x30a   : > { %v2674_v39 = vadd.f32 %v2642_v1, %v813_v12  ;;  %v2643_v40 = vmax.f32 %v2543_v4, 0.0  ;;  %v5290_v25 = vadd.f32 %v5289_v24, %v5288_v28  ;;  %v5291_v32 = vpop.f32.mrb[86].mxu0  ;;  %v7294_v42 = vpop.f32.mrb[83].mxu1  ;;  %5718 = vmatprep.subr.bf16.mxu0 %v6077_v60  ;;  %v2866_v60 = vld [vmem:[#allocation3 + $0x52] sm:$0xff]  ;;  %v2234_v28 = vadd.f32 %v7099_v59, %v7172_v53  ;;  %v6083_v24 = vld [vmem:[%s7899_s5 + $0x1b0] sm:$0xff]   ;;  %v6084_v59 = vld [vmem:[%s7899_s5 + $0x1f8] sm:$0xff]  }
 0x30b   : > { %v5292_v18 = vpop.f32.mrb[87].mxu0  ;;  %4092 = vmatmul.mubr.bf16.gmra.mrb[108].mxu1 %v2957_v49  ;;  %v2929_v48 = vld [vmem:[#allocation3 + $0x60] sm:$0xff] }
 0x30c   : > { %2707 = vst [vmem:[#allocation3 + $0x79] sm:$0xff] %v2674_v39  ;;  %v2675_v27 = vadd.f32 %v2643_v40, %v815_v19  ;;  %v2387_v26 = vadd.f32 %v5290_v25, %v2226_v45  ;;  %v5293_v22 = vadd.f32 %v5292_v18, %v5291_v32  ;;  %4245 = vmatmul.mubr.bf16.gmra.mrb[136].mxu0 %v7296_v11  ;;  %v6082_v49 = vld [vmem:[%s7899_s5 + $0x1f0] sm:$0xff]  }
 0x30d   : > { %4099 = vmatprep.mubr.bf16.mxu1 %v2831_v21  ;;  %v2930_v43 = vld [vmem:[#allocation3 + $0x68] sm:$0xff]  ;;  %5719 = vmatpush3.bf16.msra.mxu0 %v6078_v35  ;;  %v7329_v32 = vpack.c.bf16 %v2866_v60, %v2865_v0 }
 0x30e   : > { %2708 = vst [vmem:[#allocation3 + $0x81] sm:$0xff] %v2675_v27  ;;  %v2548_v16 = vadd.f32 %v7220_v36, %v2387_v26  ;;  %v2390_v15 = vadd.f32 %v5293_v22, %v2229_v52  ;;  %v2958_v5 = vpack.c.bf16 %v2930_v43, %v2929_v48  ;;  %v2832_v58 = vpack.c.bf16 %v2675_v27, %v2674_v39 }
 0x30f   : > { %5720 = vmatprep.subr.bf16.mxu0 %v6079_v14  ;;  %v7315_v21 = vpop.f32.mrb[84].mxu1  ;;  %v819_v36 = vmax.f32 %v693_v10, 0.0  ;;  %v699_v14 = vadd.f32 %v6549_v23, %v7181_v9  ;;  %v703_v22 = vadd.f32 %v6556_v38, %v7181_v9  ;;  %v6085_v23 = vld [vmem:[%s7899_s5 + $0x1b8] sm:$0xff]  }
 0x310   : > { %v2644_v57 = vmax.f32 %v2548_v16, 0.0  ;;  %v2551_v12 = vadd.f32 %v7224_v30, %v2390_v15  ;;  %v5294_v1 = vpop.f32.mrb[88].mxu0  ;;  %v7318_v4 = vpop.f32.mrb[85].mxu1  ;;  %4252 = vmatprep.mubr.bf16.mxu0 %v2958_v5 }
 0x311   : > { %v5295_v19 = vpop.f32.mrb[89].mxu0  ;;  %v7322_v45 = vpop.f32.mrb[86].mxu1  ;;  %5721 = vmatpush3.bf16.msra.mxu0 %v6080_v50 }
 0x312   : > { %v2676_v35 = vadd.f32 %v2644_v57, %v817_v29  ;;  %v2645_v39 = vmax.f32 %v2551_v12, 0.0  ;;  %v5296_v40 = vadd.f32 %v5295_v19, %v5294_v1  ;;  %v5297_v30 = vpop.f32.mrb[90].mxu0  ;;  %v7327_v25 = vpop.f32.mrb[87].mxu1  ;;  %5722 = vmatprep.subr.bf16.mxu0 %v6082_v49  ;;  %v821_v49 = vmax.f32 %v699_v14, 0.0 }
 0x313   : > { %v5298_v52 = vpop.f32.mrb[91].mxu0  ;;  %4100 = vmatmul.mubr.bf16.gmra.mrb[112].mxu1 %v2958_v5  ;;  %v2931_v10 = vld [vmem:[#allocation3 + $0x78] sm:$0xff]  ;;  %v2867_v5 = vld [vmem:[#allocation3 + $0x62] sm:$0xff]  ;;  %v823_v57 = vmax.f32 %v703_v22, 0.0 }
 0x314   : > { %2709 = vst [vmem:[#allocation3 + $0x91] sm:$0xff] %v2676_v35  ;;  %v2677_v18 = vadd.f32 %v2645_v39, %v819_v36  ;;  %v2395_v27 = vadd.f32 %v5296_v40, %v2234_v28  ;;  %v5299_v26 = vadd.f32 %v5298_v52, %v5297_v30  ;;  %4253 = vmatmul.mubr.bf16.gmra.mrb[140].mxu0 %v7329_v32 }
 0x315   : > { %4107 = vmatprep.mubr.bf16.mxu1 %v2832_v58  ;;  %v2932_v48 = vld [vmem:[#allocation3 + $0x80] sm:$0xff]  ;;  %5723 = vmatpush3.bf16.msra.mxu0 %v6083_v24  ;;  %v2868_v58 = vld [vmem:[#allocation3 + $0x6a] sm:$0xff]  ;;  %v2245_v40 = vadd.f32 %v7111_v37, %v7172_v53 }
 0x316   : > { %2710 = vst [vmem:[#allocation3 + $0x99] sm:$0xff] %v2677_v18  ;;  %v2556_v62 = vadd.f32 %v7252_v55, %v2395_v27  ;;  %v2398_v43 = vadd.f32 %v5299_v26, %v2237_v2  ;;  %v2959_v50 = vpack.c.bf16 %v2932_v48, %v2931_v10  ;;  %v2833_v16 = vpack.c.bf16 %v2677_v18, %v2676_v35  ;;  %v2869_v22 = vld [vmem:[#allocation3 + $0x7a] sm:$0xff]  ;;  %v2870_v10 = vld [vmem:[#allocation3 + $0x82] sm:$0xff] }
 0x317   : > { %5724 = vmatprep.subr.bf16.mxu0 %v6084_v59  ;;  %v7345_v15 = vpop.f32.mrb[88].mxu1  ;;  %v2242_v55 = vadd.f32 %v7109_v56, %v7172_v53  ;;  %v7356_v39 = vpack.c.bf16 %v2868_v58, %v2867_v5  ;;  %v713_v2 = vadd.f32 %v6577_v13, %v7181_v9 }
 0x318   : > { %v2646_v38 = vmax.f32 %v2556_v62, 0.0  ;;  %v2559_v0 = vadd.f32 %v7261_v47, %v2398_v43  ;;  %v5300_v60 = vpop.f32.mrb[92].mxu0  ;;  %v7348_v29 = vpop.f32.mrb[89].mxu1  ;;  %4260 = vmatprep.mubr.bf16.mxu0 %v2959_v50  ;;  %v709_v47 = vadd.f32 %v6570_v63, %v7181_v9 }
 0x319   : > { %v5301_v12 = vpop.f32.mrb[93].mxu0  ;;  %v7352_v1 = vpop.f32.mrb[90].mxu1  ;;  %5725 = vmatpush3.bf16.msra.mxu0 %v6085_v23 }
 0x31a   : > { %v2678_v36 = vadd.f32 %v2646_v38, %v821_v49  ;;  %v2647_v28 = vmax.f32 %v2559_v0, 0.0  ;;  %v5302_v19 = vadd.f32 %v5301_v12, %v5300_v60  ;;  %v5303_v24 = vpop.f32.mrb[94].mxu0  ;;  %v7354_v35 = vpop.f32.mrb[91].mxu1  ;;  %v825_v23 = vmax.f32 %v709_v47, 0.0 }
 0x31b   : > { %v5304_v30 = vpop.f32.mrb[95].mxu0  ;;  %4108 = vmatmul.mubr.bf16.gmra.mrb[116].mxu1 %v2959_v50  ;;  %v2933_v52 = vld [vmem:[#allocation3 + $0x90] sm:$0xff]  ;;  %v2253_v12 = vadd.f32 %v7115_v61, %v7172_v53 }
 0x31c   : > { %2711 = vst [vmem:[#allocation3 + $0xa9] sm:$0xff] %v2678_v36  ;;  %v2679_v56 = vadd.f32 %v2647_v28, %v823_v57  ;;  %v2403_v59 = vadd.f32 %v5302_v19, %v2242_v55  ;;  %v5305_v14 = vadd.f32 %v5304_v30, %v5303_v24  ;;  %4261 = vmatmul.mubr.bf16.gmra.mrb[144].mxu0 %v7356_v39 }
 0x31d   : > { %4115 = vmatprep.mubr.bf16.mxu1 %v2833_v16  ;;  %v2934_v18 = vld [vmem:[#allocation3 + $0x98] sm:$0xff]  ;;  %v827_v16 = vmax.f32 %v713_v2, 0.0  ;;  %v7378_v57 = vpack.c.bf16 %v2870_v10, %v2869_v22  ;;  %v723_v24 = vadd.f32 %v6604_v3, %v7181_v9  ;;  %v2258_v3 = vadd.f32 %v7123_v41, %v7172_v53 }
 0x31e   : > { %2712 = vst [vmem:[#allocation3 + $0xb1] sm:$0xff] %v2679_v56  ;;  %v2564_v63 = vadd.f32 %v7249_v31, %v2403_v59  ;;  %v2406_v27 = vadd.f32 %v5305_v14, %v2245_v40  ;;  %v7366_v26 = vpack.c.bf16 %v2934_v18, %v2933_v52  ;;  %v2834_v37 = vpack.c.bf16 %v2679_v56, %v2678_v36  ;;  %v2871_v59 = vld [vmem:[#allocation3 + $0x92] sm:$0xff]  ;;  %v2872_v14 = vld [vmem:[#allocation3 + $0x9a] sm:$0xff] }
 0x31f   : > { %v7368_v48 = vpop.f32.mrb[92].mxu1  ;;  %v2250_v31 = vadd.f32 %v7113_v7, %v7172_v53 }
 0x320   : > { %v2648_v62 = vmax.f32 %v2564_v63, 0.0  ;;  %v2567_v43 = vadd.f32 %v7256_v34, %v2406_v27  ;;  %v5306_v50 = vpop.f32.mrb[96].mxu0  ;;  %4268 = vmatprep.mubr.bf16.mxu0 %v7366_v26  ;;  %v7372_v13 = vpop.f32.mrb[93].mxu1  ;;  %v719_v34 = vadd.f32 %v6597_v44, %v7181_v9  ;;  %v831_v27 = vmax.f32 %v723_v24, 0.0 }
 0x321   : > { %v5307_v5 = vpop.f32.mrb[97].mxu0  ;;  %v7376_v58 = vpop.f32.mrb[94].mxu1 }
 0x322   : > { %v2680_v49 = vadd.f32 %v2648_v62, %v825_v23  ;;  %v2649_v38 = vmax.f32 %v2567_v43, 0.0  ;;  %v5308_v0 = vadd.f32 %v5307_v5, %v5306_v50  ;;  %v5309_v60 = vpop.f32.mrb[98].mxu0  ;;  %v7380_v55 = vpop.f32.mrb[95].mxu1  ;;  %v829_v2 = vmax.f32 %v719_v34, 0.0  ;;  %v7925_v43 = vld [vmem:[#allocation6_spill] sm:$0xff] }
 0x323   : > { %v5310_v36 = vpop.f32.mrb[99].mxu0  ;;  %4116 = vmatmul.mubr.bf16.gmra.mrb[120].mxu1 %v7366_v26  ;;  %v2935_v47 = vld [vmem:[#allocation3 + $0xa8] sm:$0xff]  ;;  %v7397_v62 = vpack.c.bf16 %v2872_v14, %v2871_v59  ;;  %v729_v50 = vadd.f32 %v7925_v43, %v7181_v9 }
 0x324   : > { %2713 = vst [vmem:[#allocation3 + $0xc1] sm:$0xff] %v2680_v49  ;;  %v2681_v7 = vadd.f32 %v2649_v38, %v827_v16  ;;  %v2411_v28 = vadd.f32 %v5308_v0, %v2250_v31  ;;  %v5311_v19 = vadd.f32 %v5310_v36, %v5309_v60  ;;  %4269 = vmatmul.mubr.bf16.gmra.mrb[148].mxu0 %v7378_v57 }
 0x325   : > { %4123 = vmatprep.mubr.bf16.mxu1 %v2834_v37  ;;  %v2936_v40 = vld [vmem:[#allocation3 + $0xb0] sm:$0xff] }
 0x326   : > { %2714 = vst [vmem:[#allocation3 + $0xc9] sm:$0xff] %v2681_v7  ;;  %v2572_v44 = vadd.f32 %v7285_v6, %v2411_v28  ;;  %v2414_v30 = vadd.f32 %v5311_v19, %v2253_v12  ;;  %v7391_v61 = vpack.c.bf16 %v2936_v40, %v2935_v47  ;;  %v2835_v56 = vpack.c.bf16 %v2681_v7, %v2680_v49  ;;  %v7926_v49 = vld [vmem:[#allocation7_spill] sm:$0xff]  ;;  %v2873_v7 = vld [vmem:[#allocation3 + $0xaa] sm:$0xff] }
 0x327   : > { %v733_v38 = vadd.f32 %v7926_v49, %v7181_v9  ;;  %v2874_v28 = vld [vmem:[#allocation3 + $0xb2] sm:$0xff]  ;;  %v833_v19 = vmax.f32 %v729_v50, 0.0 }
 0x328   : > { %v2650_v52 = vmax.f32 %v2572_v44, 0.0  ;;  %v2575_v18 = vadd.f32 %v7294_v42, %v2414_v30  ;;  %v5312_v63 = vpop.f32.mrb[100].mxu0  ;;  %4276 = vmatprep.mubr.bf16.mxu0 %v7391_v61  ;;  %v2261_v42 = vadd.f32 %v7125_v51, %v7172_v53  ;;  %v2266_v30 = vadd.f32 %v7130_v17, %v7172_v53 }
 0x329   : > { %v5313_v37 = vpop.f32.mrb[101].mxu0  ;;  %v835_v44 = vmax.f32 %v733_v38, 0.0 }
 0x32a   : > { %v2682_v22 = vadd.f32 %v2650_v52, %v829_v2  ;;  %v2651_v6 = vmax.f32 %v2575_v18, 0.0  ;;  %v5314_v10 = vadd.f32 %v5313_v37, %v5312_v63  ;;  %v5315_v23 = vpop.f32.mrb[102].mxu0  ;;  %v7414_v52 = vpack.c.bf16 %v2874_v28, %v2873_v7  ;;  %v7927_v18 = vld [vmem:[#allocation8_spill] sm:$0xff] }
 0x32b   : > { %v5316_v16 = vpop.f32.mrb[103].mxu0  ;;  %4124 = vmatmul.mubr.bf16.gmra.mrb[124].mxu1 %v7391_v61  ;;  %v2937_v0 = vld [vmem:[#allocation3 + $0xc0] sm:$0xff]  ;;  %v739_v63 = vadd.f32 %v7927_v18, %v7181_v9 }
 0x32c   : > { %2715 = vst [vmem:[#allocation3 + $0xd9] sm:$0xff] %v2682_v22  ;;  %v2683_v31 = vadd.f32 %v2651_v6, %v831_v27  ;;  %v2419_v5 = vadd.f32 %v5314_v10, %v2258_v3  ;;  %v5317_v41 = vadd.f32 %v5316_v16, %v5315_v23  ;;  %4277 = vmatmul.mubr.bf16.gmra.mrb[152].mxu0 %v7397_v62 }
 0x32d   : > { %4131 = vmatprep.mubr.bf16.mxu1 %v2835_v56  ;;  %v2938_v60 = vld [vmem:[#allocation3 + $0xc8] sm:$0xff] }
 0x32e   : > { %2716 = vst [vmem:[#allocation3 + $0xe1] sm:$0xff] %v2683_v31  ;;  %v2580_v34 = vadd.f32 %v7282_v54, %v2419_v5  ;;  %v2422_v12 = vadd.f32 %v5317_v41, %v2261_v42  ;;  %v7408_v51 = vpack.c.bf16 %v2938_v60, %v2937_v0  ;;  %v2836_v36 = vpack.c.bf16 %v2683_v31, %v2682_v22  ;;  %v7928_v22 = vld [vmem:[#allocation9_spill] sm:$0xff] }
 0x32f   : > { %v743_v6 = vadd.f32 %v7928_v22, %v7181_v9  ;;  %v2875_v16 = vld [vmem:[#allocation3 + $0xc2] sm:$0xff]  ;;  %v2876_v31 = vld [vmem:[#allocation3 + $0xca] sm:$0xff]  ;;  %v837_v5 = vmax.f32 %v739_v63, 0.0  ;;  %v2274_v60 = vadd.f32 %v7140_v8, %v7172_v53 }
 0x330   : > { %v2652_v24 = vmax.f32 %v2580_v34, 0.0  ;;  %v2583_v47 = vadd.f32 %v7289_v20, %v2422_v12  ;;  %v5318_v40 = vpop.f32.mrb[104].mxu0  ;;  %4284 = vmatprep.mubr.bf16.mxu0 %v7408_v51  ;;  %v2269_v20 = vadd.f32 %v7132_v33, %v7172_v53  ;;  %v7435_v28 = vpack.c.bf16 %v2876_v31, %v2875_v16 }
 0x331   : > { %v5319_v56 = vpop.f32.mrb[105].mxu0  ;;  %v839_v0 = vmax.f32 %v743_v6, 0.0 }
 0x332   : > { %v2684_v59 = vadd.f32 %v2652_v24, %v833_v19  ;;  %v2653_v54 = vmax.f32 %v2583_v47, 0.0  ;;  %v5320_v14 = vadd.f32 %v5319_v56, %v5318_v40  ;;  %v5321_v2 = vpop.f32.mrb[106].mxu0  ;;  %v7929_v19 = vld [vmem:[#allocation10_spill] sm:$0xff]  ;;  %v7930_v47 = vld [vmem:[#allocation20_spill] sm:$0xff]  ;;  %v7931_v56 = vld [vmem:[#allocation11_spill] sm:$0xff] }
 0x333   : > { %v5322_v27 = vpop.f32.mrb[107].mxu0  ;;  %4132 = vmatmul.mubr.bf16.gmra.mrb[128].mxu1 %v7408_v51  ;;  %v2939_v10 = vld [vmem:[#allocation3 + $0xd8] sm:$0xff]  ;;  %v749_v24 = vadd.f32 %v7929_v19, %v7181_v9 }
 0x334   : > { %2717 = vst [vmem:[#allocation3 + $0xf1] sm:$0xff] %v2684_v59  ;;  %v7421_v3 = vadd.f32 %v2653_v54, %v835_v44  ;;  %v2427_v17 = vadd.f32 %v5320_v14, %v2266_v30  ;;  %v5323_v37 = vadd.f32 %v5322_v27, %v5321_v2  ;;  %4285 = vmatmul.mubr.bf16.gmra.mrb[156].mxu0 %v7414_v52 }
 0x335   : > { %4139 = vmatprep.mubr.bf16.mxu1 %v2836_v36  ;;  %v2940_v23 = vld [vmem:[#allocation3 + $0xe0] sm:$0xff] }
 0x336   : > { %2718 = vst [vmem:[#allocation3 + $0xf9] sm:$0xff] %v7421_v3  ;;  %v2588_v33 = vadd.f32 %v7318_v4, %v2427_v17  ;;  %v2430_v43 = vadd.f32 %v5323_v37, %v2269_v20  ;;  %v7428_v50 = vpack.c.bf16 %v2940_v23, %v2939_v10  ;;  %v2837_v42 = vpack.c.bf16 %v7421_v3, %v2684_v59  ;;  %v2877_v27 = vld [vmem:[#allocation3 + $0xda] sm:$0xff]  ;;  %v2878_v17 = vld [vmem:[#allocation3 + $0xe2] sm:$0xff] }
 0x337   : > { %v753_v59 = vadd.f32 %v7931_v56, %v7181_v9  ;;  %v841_v37 = vmax.f32 %v749_v24, 0.0 }
 0x338   : > { %v2654_v41 = vmax.f32 %v2588_v33, 0.0  ;;  %v2591_v49 = vadd.f32 %v7327_v25, %v2430_v43  ;;  %v5324_v38 = vpop.f32.mrb[108].mxu0  ;;  %4292 = vmatprep.mubr.bf16.mxu0 %v7428_v50  ;;  %v2277_v25 = vadd.f32 %v7930_v47, %v7172_v53  ;;  %v7932_v33 = vld [vmem:[#allocation21_spill] sm:$0xff]  ;;  %v5390_v47 = vpop.f32.mrb[96].mxu1 }
 0x339   : > { %v5325_v34 = vpop.f32.mrb[109].mxu0  ;;  %v843_v23 = vmax.f32 %v753_v59, 0.0  ;;  %v2282_v43 = vadd.f32 %v7932_v33, %v7172_v53 }
 0x33a   : > { %v2686_v4 = vadd.f32 %v2654_v41, %v837_v5  ;;  %v2655_v12 = vmax.f32 %v2591_v49, 0.0  ;;  %v5326_v36 = vadd.f32 %v5325_v34, %v5324_v38  ;;  %v5327_v7 = vpop.f32.mrb[110].mxu0  ;;  %v7454_v41 = vpack.c.bf16 %v2878_v17, %v2877_v27  ;;  %v7933_v49 = vld [vmem:[#allocation12_spill] sm:$0xff] }
 0x33b   : > { %v5328_v40 = vpop.f32.mrb[111].mxu0  ;;  %4140 = vmatmul.mubr.bf16.gmra.mrb[132].mxu1 %v7428_v50  ;;  %v2941_v54 = vld [vmem:[#allocation3 + $0xf0] sm:$0xff]  ;;  %v759_v38 = vadd.f32 %v7933_v49, %v7181_v9 }
 0x33c   : > { %2719 = vst [vmem:[#allocation3 + $0x109] sm:$0xff] %v2686_v4  ;;  %v2687_v44 = vadd.f32 %v2655_v12, %v839_v0  ;;  %v2435_v30 = vadd.f32 %v5326_v36, %v2274_v60  ;;  %v5329_v8 = vadd.f32 %v5328_v40, %v5327_v7  ;;  %4293 = vmatmul.mubr.bf16.gmra.mrb[160].mxu0 %v7435_v28  ;;  %v7934_v0 = vld [vmem:[#allocation22_spill] sm:$0xff]  ;;  %v7935_v36 = vld [vmem:[#allocation13_spill] sm:$0xff] }
 0x33d   : > { %4147 = vmatprep.mubr.bf16.mxu1 %v2837_v42  ;;  %v2942_v14 = vld [vmem:[#allocation3 + $0xf8] sm:$0xff]  ;;  %v763_v7 = vadd.f32 %v7935_v36, %v7181_v9 }
 0x33e   : > { %2720 = vst [vmem:[#allocation3 + $0x111] sm:$0xff] %v2687_v44  ;;  %v2596_v2 = vadd.f32 %v7315_v21, %v2435_v30  ;;  %v2438_v18 = vadd.f32 %v5329_v8, %v2277_v25  ;;  %v7446_v63 = vpack.c.bf16 %v2942_v14, %v2941_v54  ;;  %v7448_v20 = vpack.c.bf16 %v2687_v44, %v2686_v4  ;;  %v5391_v8 = vpop.f32.mrb[97].mxu1  ;;  %v2879_v56 = vld [vmem:[#allocation3 + $0xf2] sm:$0xff]  ;;  %v2880_v59 = vld [vmem:[#allocation3 + $0xfa] sm:$0xff] }
 0x33f   : > { %v7470_v54 = vadd.f32 %v5391_v8, %v5390_v47  ;;  %v5393_v14 = vpop.f32.mrb[98].mxu1 }
 0x340   : > { %v2656_v22 = vmax.f32 %v2596_v2, 0.0  ;;  %v2599_v6 = vadd.f32 %v7322_v45, %v2438_v18  ;;  %v5330_v10 = vpop.f32.mrb[112].mxu0  ;;  %4300 = vmatprep.mubr.bf16.mxu0 %v7446_v63  ;;  %v2285_v45 = vadd.f32 %v7934_v0, %v7172_v53  ;;  %v845_v2 = vmax.f32 %v759_v38, 0.0 }
 0x341   : > { %v5331_v42 = vpop.f32.mrb[113].mxu0 }
 0x342   : > { %v2688_v21 = vadd.f32 %v2656_v22, %v841_v37  ;;  %v2657_v16 = vmax.f32 %v2599_v6, 0.0  ;;  %v5332_v31 = vadd.f32 %v5331_v42, %v5330_v10  ;;  %v5333_v5 = vpop.f32.mrb[114].mxu0  ;;  %v5394_v37 = vpop.f32.mrb[99].mxu1  ;;  %v7936_v22 = vld [vmem:[#allocation23_spill] sm:$0xff] }
 0x343   : > { %v5334_v60 = vpop.f32.mrb[115].mxu0  ;;  %4148 = vmatmul.mubr.bf16.gmra.mrb[136].mxu1 %v7446_v63  ;;  %v2943_v19 = vld [vmem:[#allocation3 + $0x108] sm:$0xff]  ;;  %v2290_v6 = vadd.f32 %v7936_v22, %v7172_v53 }
 0x344   : > { %2721 = vst [vmem:[#allocation3 + $0x121] sm:$0xff] %v2688_v21  ;;  %v2689_v34 = vadd.f32 %v2657_v16, %v843_v23  ;;  %v2443_v4 = vadd.f32 %v5332_v31, %v2282_v43  ;;  %v5335_v12 = vadd.f32 %v5334_v60, %v5333_v5  ;;  %4301 = vmatmul.mubr.bf16.gmra.mrb[164].mxu0 %v7454_v41  ;;  %v7937_v31 = vld [vmem:[#allocation14_spill] sm:$0xff]  ;;  %v7938_v5 = vld [vmem:[#allocation24_spill] sm:$0xff] }
 0x345   : > { %4155 = vmatprep.mubr.bf16.mxu1 %v7448_v20  ;;  %v2944_v24 = vld [vmem:[#allocation3 + $0x110] sm:$0xff]  ;;  %v7476_v23 = vadd.f32 %v5394_v37, %v5393_v14  ;;  %v7478_v16 = vpack.c.bf16 %v2880_v59, %v2879_v56  ;;  %v2293_v49 = vadd.f32 %v7938_v5, %v7172_v53  ;;  %v7943_v5 = vld [vmem:[#allocation17_spill] sm:$0xff] }
 0x346   : > { %2722 = vst [vmem:[#allocation3 + $0x129] sm:$0xff] %v2689_v34  ;;  %v2604_v25 = vadd.f32 %v7348_v29, %v2443_v4  ;;  %v2446_v40 = vadd.f32 %v5335_v12, %v2285_v45  ;;  %v7466_v44 = vpack.c.bf16 %v2944_v24, %v2943_v19  ;;  %v7468_v30 = vpack.c.bf16 %v2689_v34, %v2688_v21  ;;  %v7939_v34 = vld [vmem:[#allocation15_spill] sm:$0xff]  ;;  %v2881_v47 = vld [vmem:[#allocation3 + $0x10a] sm:$0xff] }
 0x347   : > { %v847_v29 = vmax.f32 %v763_v7, 0.0  ;;  %v773_v4 = vadd.f32 %v7939_v34, %v7181_v9 }
 0x348   : > { %v2658_v18 = vmax.f32 %v2604_v25, 0.0  ;;  %v2607_v27 = vadd.f32 %v7354_v35, %v2446_v40  ;;  %v5336_v17 = vpop.f32.mrb[116].mxu0  ;;  %4308 = vmatprep.mubr.bf16.mxu0 %v7466_v44  ;;  %v769_v35 = vadd.f32 %v7937_v31, %v7181_v9  ;;  %v2882_v25 = vld [vmem:[#allocation3 + $0x112] sm:$0xff] }
 0x349   : > { %v5337_v10 = vpop.f32.mrb[117].mxu0  ;;  %v851_v14 = vmax.f32 %v773_v4, 0.0 }
 0x34a   : > { %v2690_v33 = vadd.f32 %v2658_v18, %v845_v2  ;;  %v2659_v43 = vmax.f32 %v2607_v27, 0.0  ;;  %v5338_v42 = vadd.f32 %v5337_v10, %v5336_v17  ;;  %v5339_v21 = vpop.f32.mrb[118].mxu0  ;;  %v849_v40 = vmax.f32 %v769_v35, 0.0  ;;  %v6096_v2 = vld [vmem:[%s7898_s4] ss:$0 sm:$0xff]  ;;  %v7941_v10 = vld [vmem:[#allocation16_spill] sm:$0xff] }
 0x34b   : > { %v5340_v38 = vpop.f32.mrb[119].mxu0  ;;  %4156 = vmatmul.mubr.bf16.gmra.mrb[140].mxu1 %v7466_v44  ;;  %v2945_v12 = vld [vmem:[#allocation3 + $0x120] sm:$0xff] }
 0x34c   : > { %2723 = vst [vmem:[#allocation3 + $0x139] sm:$0xff] %v2690_v33  ;;  %v2691_v0 = vadd.f32 %v2659_v43, %v847_v29  ;;  %v2451_v45 = vadd.f32 %v5338_v42, %v2290_v6  ;;  %v5341_v60 = vadd.f32 %v5340_v38, %v5339_v21  ;;  %4309 = vmatmul.mubr.bf16.gmra.mrb[168].mxu0 %v7478_v16 }
 0x34d   : > { %4163 = vmatprep.mubr.bf16.mxu1 %v7468_v30  ;;  %v2946_v36 = vld [vmem:[#allocation3 + $0x128] sm:$0xff]  ;;  %v7500_v6 = vpack.c.bf16 %v2882_v25, %v2881_v47 }
 0x34e   : > { %2724 = vst [vmem:[#allocation3 + $0x141] sm:$0xff] %v2691_v0  ;;  %v2612_v7 = vadd.f32 %v7345_v15, %v2451_v45  ;;  %v2454_v53 = vadd.f32 %v5341_v60, %v2293_v49  ;;  %v7490_v19 = vpack.c.bf16 %v2946_v36, %v2945_v12  ;;  %v7492_v24 = vpack.c.bf16 %v2691_v0, %v2690_v33  ;;  %v7940_v15 = vld [vmem:[#allocation25_spill] sm:$0xff]  ;;  %v7942_v33 = vld [vmem:[#allocation26_spill] sm:$0xff] }
 0x34f   : > { %v2298_v18 = vadd.f32 %v6096_v2, %v7940_v15  ;;  %v2301_v43 = vadd.f32 %v6096_v2, %v7942_v33  ;;  %v783_v49 = vadd.f32 %v7943_v5, %v7181_v9  ;;  %v2883_v12 = vld [vmem:[#allocation3 + $0x122] sm:$0xff]  ;;  %v2884_v36 = vld [vmem:[#allocation3 + $0x12a] sm:$0xff] }
 0x350   : > { %v2660_v8 = vmax.f32 %v2612_v7, 0.0  ;;  %v2615_v56 = vadd.f32 %v7352_v1, %v2454_v53  ;;  %v5342_v59 = vpop.f32.mrb[120].mxu0  ;;  %4316 = vmatprep.mubr.bf16.mxu0 %v7490_v19  ;;  %v779_v1 = vadd.f32 %v7941_v10, %v7181_v9 }
 0x351   : > { %v5343_v27 = vpop.f32.mrb[121].mxu0 }
 0x352   : > { %v2692_v17 = vadd.f32 %v2660_v8, %v849_v40  ;;  %v2661_v37 = vmax.f32 %v2615_v56, 0.0  ;;  %v5344_v29 = vadd.f32 %v5343_v27, %v5342_v59  ;;  %v5345_v22 = vpop.f32.mrb[122].mxu0  ;;  %v853_v7 = vmax.f32 %v779_v1, 0.0  ;;  %v7944_v8 = vld [vmem:[#allocation27_spill] sm:$0xff] }
 0x353   : > { %v5346_v42 = vpop.f32.mrb[123].mxu0  ;;  %4164 = vmatmul.mubr.bf16.gmra.mrb[144].mxu1 %v7490_v19  ;;  %v2947_v38 = vld [vmem:[#allocation3 + $0x138] sm:$0xff]  ;;  %v855_v40 = vmax.f32 %v783_v49, 0.0  ;;  %v2306_v56 = vadd.f32 %v6096_v2, %v7944_v8  ;;  %v7518_v27 = vpack.c.bf16 %v2884_v36, %v2883_v12 }
 0x354   : > { %2725 = vst [vmem:[#allocation3 + $0x151] sm:$0xff] %v2692_v17  ;;  %v2693_v21 = vadd.f32 %v2661_v37, %v851_v14  ;;  %v5347_v31 = vadd.f32 %v5346_v42, %v5345_v22  ;;  %4317 = vmatmul.mubr.bf16.gmra.mrb[172].mxu0 %v7500_v6  ;;  %v2459_v35 = vadd.f32 %v5344_v29, %v2298_v18  ;;  %v7946_v29 = vld [vmem:[#allocation28_spill] sm:$0xff] }
 0x355   : > { %4171 = vmatprep.mubr.bf16.mxu1 %v7492_v24  ;;  %v2948_v0 = vld [vmem:[#allocation3 + $0x140] sm:$0xff]  ;;  %v2309_v22 = vadd.f32 %v6096_v2, %v7946_v29 }
 0x356   : > { %2726 = vst [vmem:[#allocation3 + $0x159] sm:$0xff] %v2693_v21  ;;  %v2620_v45 = vadd.f32 %v7372_v13, %v2459_v35  ;;  %v2462_v60 = vadd.f32 %v5347_v31, %v2301_v43  ;;  %v7511_v34 = vpack.c.bf16 %v2948_v0, %v2947_v38  ;;  %v7513_v4 = vpack.c.bf16 %v2693_v21, %v2692_v17  ;;  %v7945_v17 = vld [vmem:[#allocation18_spill] sm:$0xff]  ;;  %v7947_v43 = vld [vmem:[#allocation19_spill] sm:$0xff]  ;;  %v2886_v0 = vld [vmem:[#allocation3 + $0x142] sm:$0xff] }
 0x357   : > { %v789_v37 = vadd.f32 %v7945_v17, %v7181_v9  ;;  %v793_v42 = vadd.f32 %v7947_v43, %v7181_v9  ;;  %v2885_v38 = vld [vmem:[#allocation3 + $0x13a] sm:$0xff]  ;;  %v6097_v43 = vld [vmem:[%s7899_s5 + $0x200] sm:$0xff]  }
 0x358   : > { %v2662_v53 = vmax.f32 %v2620_v45, 0.0  ;;  %v2623_v47 = vadd.f32 %v7380_v55, %v2462_v60  ;;  %v5348_v25 = vpop.f32.mrb[124].mxu0  ;;  %4324 = vmatprep.mubr.bf16.mxu0 %v7511_v34  ;;  %v2987_v29 = vld [vmem:[#allocation3 + $0x19] sm:$0xff] }
 0x359   : > { %v5349_v59 = vpop.f32.mrb[125].mxu0  ;;  %v857_v45 = vmax.f32 %v789_v37, 0.0  ;;  %v859_v36 = vmax.f32 %v793_v42, 0.0  ;;  %v6087_v42 = vld [vmem:[%s7899_s5 + $0x210] sm:$0xff]  }
 0x35a   : > { %v2694_v14 = vadd.f32 %v2662_v53, %v853_v7  ;;  %v2663_v13 = vmax.f32 %v2623_v47, 0.0  ;;  %v5350_v15 = vadd.f32 %v5349_v59, %v5348_v25  ;;  %v5351_v18 = vpop.f32.mrb[126].mxu0  ;;  %v7535_v53 = vpack.c.bf16 %v2886_v0, %v2885_v38  ;;  %v3182_v38 = vld [vmem:[#allocation3 + $0x49] sm:$0xff] }
 0x35b   : > { %v5352_v10 = vpop.f32.mrb[127].mxu0  ;;  %4172 = vmatmul.mubr.bf16.gmra.mrb[148].mxu1 %v7511_v34  ;;  %v2949_v21 = vld [vmem:[#allocation3 + $0x150] sm:$0xff]  ;;  %v6088_v0 = vld [vmem:[%s7899_s5 + $0x218] sm:$0xff]  }
 0x35c   : > { %2727 = vst [vmem:[#allocation3 + $0x169] sm:$0xff] %v2694_v14  ;;  %v2695_v55 = vadd.f32 %v2663_v13, %v855_v40  ;;  %v2467_v1 = vadd.f32 %v5350_v15, %v2306_v56  ;;  %v5353_v33 = vadd.f32 %v5352_v10, %v5351_v18  ;;  %4325 = vmatmul.mubr.bf16.gmra.mrb[176].mxu0 %v7518_v27  ;;  %v2988_v18 = vld [vmem:[#allocation3 + $0x21] sm:$0xff] }
 0x35d   : > { %4179 = vmatprep.mubr.bf16.mxu1 %v7513_v4  ;;  %v2950_v31 = vld [vmem:[#allocation3 + $0x158] sm:$0xff]  ;;  %v3019_v10 = vpack.c.bf16 %v2988_v18, %v2987_v29  ;;  %v6092_v18 = vld [vmem:[%s7899_s5 + $0x238] sm:$0xff]  }
 0x35e   : > { %2728 = vst [vmem:[#allocation3 + $0x171] sm:$0xff] %v2695_v55  ;;  %v2628_v35 = vadd.f32 %v7368_v48, %v2467_v1  ;;  %v2470_v2 = vadd.f32 %v5353_v33, %v2309_v22  ;;  %v7529_v5 = vpack.c.bf16 %v2950_v31, %v2949_v21  ;;  %v7531_v49 = vpack.c.bf16 %v2695_v55, %v2694_v14  ;;  %v2887_v8 = vld [vmem:[#allocation3 + $0x152] sm:$0xff]  ;;  %v2888_v56 = vld [vmem:[#allocation3 + $0x15a] sm:$0xff] }
 0x35f   : > { %v7545_v59 = vpack.c.bf16 %v2888_v56, %v2887_v8  ;;  %v3181_v22 = vld [vmem:[#allocation3 + $0x39] sm:$0xff]  ;;  %v3180_v1 = vld [vmem:[#allocation3 + $0x31] sm:$0xff]  ;;  %v3187_v8 = vld [vmem:[#allocation3 + $0x81] sm:$0xff] }
 0x360   : > { %v2664_v60 = vmax.f32 %v2628_v35, 0.0  ;;  %v2631_v12 = vadd.f32 %v7376_v58, %v2470_v2  ;;  %4332 = vmatprep.mubr.bf16.mxu0 %v7529_v5  ;;  %v6086_v33 = vld [vmem:[%s7899_s5 + $0x208] sm:$0xff]   ;;  %v3116_v35 = vld [vmem:[#allocation3 + $0x30] sm:$0xff]  ;;  %v3120_v56 = vld [vmem:[#allocation3 + $0x60] sm:$0xff] }
 0x361   : > { %v3117_v21 = vld [vmem:[#allocation3 + $0x38] sm:$0xff] }
 0x362   : > { %v2696_v9 = vadd.f32 %v2664_v60, %v857_v45  ;;  %v2665_v7 = vmax.f32 %v2631_v12, 0.0  ;;  %v3183_v31 = vld [vmem:[#allocation3 + $0x51] sm:$0xff]  ;;  %v3148_v2 = vpack.c.bf16 %v3117_v21, %v3116_v35  ;;  %v3185_v12 = vld [vmem:[#allocation3 + $0x69] sm:$0xff] }
 0x363   : > { %4180 = vmatmul.mubr.bf16.gmra.mrb[152].mxu1 %v7529_v5  ;;  %v2951_v47 = vld [vmem:[#allocation3 + $0x168] sm:$0xff]  ;;  %v3213_v45 = vpack.c.bf16 %v3183_v31, %v3182_v38  ;;  %v3119_v60 = vld [vmem:[#allocation3 + $0x50] sm:$0xff]  ;;  %v3122_v29 = vld [vmem:[#allocation3 + $0x78] sm:$0xff] }
 0x364   : > { %2729 = vst [vmem:[#allocation3 + $0x181] sm:$0xff] %v2696_v9  ;;  %v2697_v48 = vadd.f32 %v2665_v7, %v859_v36  ;;  %4333 = vmatmul.mubr.bf16.gmra.mrb[180].mxu0 %v7535_v53  ;;  %4187 = vmatprep.mubr.bf16.mxu1 %v7531_v49  ;;  %v3118_v36 = vld [vmem:[#allocation3 + $0x48] sm:$0xff]  ;;  %v3194_v31 = vld [vmem:[#allocation3 + $0xd9] sm:$0xff] }
 0x365   : > { %v2952_v25 = vld [vmem:[#allocation3 + $0x170] sm:$0xff]  ;;  %v3184_v7 = vld [vmem:[#allocation3 + $0x61] sm:$0xff] }
 0x366   : > { %2730 = vst [vmem:[#allocation3 + $0x189] sm:$0xff] %v2697_v48  ;;  %v7540_v40 = vpack.c.bf16 %v2952_v25, %v2951_v47  ;;  %v7542_v58 = vpack.c.bf16 %v2697_v48, %v2696_v9  ;;  %v2889_v17 = vld [vmem:[#allocation3 + $0x16a] sm:$0xff]  ;;  %v2890_v37 = vld [vmem:[#allocation3 + $0x172] sm:$0xff]  ;;  %v3149_v9 = vpack.c.bf16 %v3119_v60, %v3118_v36  ;;  %v6091_v47 = vld [vmem:[%s7899_s5 + $0x230] sm:$0xff]  }
 0x367   : > { %v7553_v55 = vpack.c.bf16 %v2890_v37, %v2889_v17  ;;  %v6090_v48 = vld [vmem:[%s7899_s5 + $0x228] sm:$0xff]   ;;  %v3121_v25 = vld [vmem:[#allocation3 + $0x68] sm:$0xff]  ;;  %v3123_v17 = vld [vmem:[#allocation3 + $0x80] sm:$0xff] }
 0x368   : > { %4340 = vmatprep.mubr.bf16.mxu0 %v7540_v40  ;;  %v3189_v37 = vld [vmem:[#allocation3 + $0x99] sm:$0xff] }
 0x36b   : > { %4188 = vmatmul.mubr.bf16.gmra.mrb[156].mxu1 %v7540_v40  ;;  %v2953_v14 = vld [vmem:[#allocation3 + $0x180] sm:$0xff] }
 0x36c   : > { %4341 = vmatmul.mubr.bf16.gmra.mrb[184].mxu0 %v7545_v59  ;;  %4389 = vmatprep.mubr.bf16.mxu1 %v7263_v46  ;;  %v3212_v46 = vpack.c.bf16 %v3181_v22, %v3180_v1  ;;  %v3151_v22 = vpack.c.bf16 %v3123_v17, %v3122_v29 }
 0x36d   : > { %v2954_v13 = vld [vmem:[#allocation3 + $0x188] sm:$0xff] }
 0x36e   : > { %v7550_v15 = vpack.c.bf16 %v2954_v13, %v2953_v14  ;;  %v3150_v14 = vpack.c.bf16 %v3121_v25, %v3120_v56  ;;  %v3186_v13 = vld [vmem:[#allocation3 + $0x79] sm:$0xff] }
 0x370   : > { %4348 = vmatprep.mubr.bf16.mxu0 %v7550_v15 }
 0x373   : > { %4390 = vmatmul.mubr.bf16.vlgmr.msra.gmra.mrb[160].mxu1 %v3019_v10  ;;  %v3188_v10 = vld [vmem:[#allocation3 + $0x91] sm:$0xff] }
 0x374   : > { %4349 = vmatmul.mubr.bf16.gmra.mrb[188].mxu0 %v7553_v55  ;;  %5887 = vmatpush3.bf16.msra.mxu1 %v6097_v43  ;;  %v3216_v1 = vpack.c.bf16 %v3189_v37, %v3188_v10 }
 0x375   : > { %4397 = vmatprep.mubr.bf16.mxu1 %v7296_v11  ;;  %4550 = vmatprep.mubr.bf16.mxu0 %v3212_v46  ;;  %v6089_v11 = vld [vmem:[%s7899_s5 + $0x220] sm:$0xff]  }
 0x376   : > { %5888 = vmatprep.subr.bf16.mxu1 %v6086_v33 }
 0x378   : > { %5889 = vmatpush3.bf16.msra.mxu1 %v6086_v33  ;;  %v3191_v33 = vld [vmem:[#allocation3 + $0xb1] sm:$0xff] }
 0x379   : > { %5890 = vmatprep.subr.bf16.mxu1 %v6087_v42 }
 0x37b   : > { %4398 = vmatmul.mubr.bf16.gmra.mrb[164].mxu1 %v3212_v46  ;;  %v3190_v46 = vld [vmem:[#allocation3 + $0xa9] sm:$0xff] }
 0x37c   : > { %4551 = vmatmul.mubr.bf16.vlgmr.msra.gmra.mrb[192].mxu0 %v3148_v2  ;;  %4405 = vmatprep.mubr.bf16.mxu1 %v7329_v32  ;;  %v3214_v32 = vpack.c.bf16 %v3185_v12, %v3184_v7  ;;  %v3217_v43 = vpack.c.bf16 %v3191_v33, %v3190_v46 }
 0x37d   : > { %4558 = vmatprep.mubr.bf16.mxu0 %v3213_v45  ;;  %5891 = vmatpush3.bf16.msra.mxu1 %v6087_v42  ;;  %v3192_v42 = vld [vmem:[#allocation3 + $0xc1] sm:$0xff] }
 0x37e   : > { %5892 = vmatprep.subr.bf16.mxu1 %v6088_v0 }
 0x381   : > { %5893 = vmatpush3.bf16.msra.mxu1 %v6088_v0 }
 0x382   : > { %5894 = vmatprep.subr.bf16.mxu1 %v6089_v11 }
 0x383   : > { %4406 = vmatmul.mubr.bf16.gmra.mrb[168].mxu1 %v3213_v45 }
 0x384   : > { %4559 = vmatmul.mubr.bf16.gmra.mrb[196].mxu0 %v3149_v9  ;;  %4413 = vmatprep.mubr.bf16.mxu1 %v7356_v39  ;;  %v3215_v39 = vpack.c.bf16 %v3187_v8, %v3186_v13  ;;  %v3082_v13 = vld [vmem:[#allocation3 + $0x18a] sm:$0xff] }
 0x385   : > { %4566 = vmatprep.mubr.bf16.mxu0 %v3214_v32  ;;  %5895 = vmatpush3.bf16.msra.mxu1 %v6089_v11 }
 0x386   : > { %5896 = vmatprep.subr.bf16.mxu1 %v6090_v48 }
 0x389   : > { %5897 = vmatpush3.bf16.msra.mxu1 %v6090_v48 }
 0x38a   : > { %5898 = vmatprep.subr.bf16.mxu1 %v6091_v47 }
 0x38b   : > { %4414 = vmatmul.mubr.bf16.gmra.mrb[172].mxu1 %v3214_v32 }
 0x38c   : > { %4567 = vmatmul.mubr.bf16.gmra.mrb[200].mxu0 %v3150_v14  ;;  %4421 = vmatprep.mubr.bf16.mxu1 %v7378_v57  ;;  %v3193_v57 = vld [vmem:[#allocation3 + $0xc9] sm:$0xff] }
 0x38d   : > { %4574 = vmatprep.mubr.bf16.mxu0 %v3215_v39  ;;  %5899 = vmatpush3.bf16.msra.mxu1 %v6091_v47  ;;  %v3218_v21 = vpack.c.bf16 %v3193_v57, %v3192_v42  ;;  %v3081_v14 = vld [vmem:[#allocation3 + $0x182] sm:$0xff]  ;;  %v3210_v42 = vld [vmem:[#allocation3 + $0x199] sm:$0xff] }
 0x38e   : > { %5900 = vmatprep.subr.bf16.mxu1 %v6092_v18 }
 0x391   : > { %5901 = vmatpush3.bf16.msra.mxu1 %v6092_v18 }
 0x393   : > { %4422 = vmatmul.mubr.bf16.gmra.mrb[176].mxu1 %v3215_v39 }
 0x394   : > { %4575 = vmatmul.mubr.bf16.gmra.mrb[204].mxu0 %v3151_v22  ;;  %4429 = vmatprep.mubr.bf16.mxu1 %v7397_v62  ;;  %v3195_v62 = vld [vmem:[#allocation3 + $0xe1] sm:$0xff] }
 0x395   : > { %4582 = vmatprep.mubr.bf16.mxu0 %v3216_v1  ;;  %v3219_v35 = vpack.c.bf16 %v3195_v62, %v3194_v31 }
 0x39b   : > { %4430 = vmatmul.mubr.bf16.gmra.mrb[180].mxu1 %v3216_v1 }
 0x39c   : > { %4583 = vmatmul.mubr.bf16.gmra.mrb[208].mxu0 %v7366_v26  ;;  %4437 = vmatprep.mubr.bf16.mxu1 %v7414_v52  ;;  %v3196_v26 = vld [vmem:[#allocation3 + $0xf1] sm:$0xff] }
 0x39d   : > { %4590 = vmatprep.mubr.bf16.mxu0 %v3217_v43  ;;  %v3220_v52 = vpack.c.bf16 %v7421_v3, %v3196_v26  ;;  %v3245_v26 = vld [vmem:[#allocation3 + $0x3a] sm:$0xff] }
 0x3a3   : > { %4438 = vmatmul.mubr.bf16.gmra.mrb[184].mxu1 %v3217_v43 }
 0x3a4   : > { %4591 = vmatmul.mubr.bf16.gmra.mrb[212].mxu0 %v7391_v61  ;;  %4445 = vmatprep.mubr.bf16.mxu1 %v7435_v28  ;;  %v7608_v61 = vld [vmem:[%s7900_s6] ss:$0 sm:$0xff] }
 0x3a5   : > { %4598 = vmatprep.mubr.bf16.mxu0 %v3218_v21 }
 0x3ab   : > { %4446 = vmatmul.mubr.bf16.gmra.mrb[188].mxu1 %v3218_v21  ;;  %v3211_v21 = vld [vmem:[#allocation3 + $0x1a1] sm:$0xff] }
 0x3ac   : > { %4599 = vmatmul.mubr.bf16.gmra.mrb[216].mxu0 %v7408_v51  ;;  %4453 = vmatprep.mubr.bf16.mxu1 %v7454_v41  ;;  %v4070_v41 = vadd.f32 %v7470_v54, %v7608_v61 }
 0x3ad   : > { %4606 = vmatprep.mubr.bf16.mxu0 %v3219_v35 }
 0x3b3   : > { %4454 = vmatmul.mubr.bf16.gmra.mrb[192].mxu1 %v3219_v35  ;;  %v3244_v35 = vld [vmem:[#allocation3 + $0x32] sm:$0xff] }
 0x3b4   : > { %4607 = vmatmul.mubr.bf16.gmra.mrb[220].mxu0 %v7428_v50  ;;  %4461 = vmatprep.mubr.bf16.mxu1 %v7478_v16 }
 0x3b5   : > { %4614 = vmatprep.mubr.bf16.mxu0 %v3220_v52 }
 0x3bb   : > { %4462 = vmatmul.mubr.bf16.gmra.mrb[196].mxu1 %v3220_v52 }
 0x3bc   : > { %4615 = vmatmul.mubr.bf16.gmra.mrb[224].mxu0 %v7446_v63  ;;  %4469 = vmatprep.mubr.bf16.mxu1 %v7500_v6 }
 0x3bd   : > { %4622 = vmatprep.mubr.bf16.mxu0 %v7448_v20 }
 0x3c3   : > { %4470 = vmatmul.mubr.bf16.gmra.mrb[200].mxu1 %v7448_v20 }
 0x3c4   : > { %4623 = vmatmul.mubr.bf16.gmra.mrb[228].mxu0 %v7466_v44  ;;  %4477 = vmatprep.mubr.bf16.mxu1 %v7518_v27  ;;  %v4073_v27 = vadd.f32 %v7476_v23, %v7608_v61 }
 0x3c5   : > { %4630 = vmatprep.mubr.bf16.mxu0 %v7468_v30 }
 0x3cb   : > { %4478 = vmatmul.mubr.bf16.gmra.mrb[204].mxu1 %v7468_v30 }
 0x3cc   : > { %4631 = vmatmul.mubr.bf16.gmra.mrb[232].mxu0 %v7490_v19  ;;  %4485 = vmatprep.mubr.bf16.mxu1 %v7535_v53 }
 0x3cd   : > { %4638 = vmatprep.mubr.bf16.mxu0 %v7492_v24 }
 0x3ce   : > { %v5396_v51 = vpop.f32.mrb[100].mxu1 }
 0x3cf   : > { %v5502_v3 = vpop.f32.mrb[128].mxu0  ;;  %v5397_v50 = vpop.f32.mrb[101].mxu1 }
 0x3d0   : > { %v5398_v28 = vadd.f32 %v5397_v50, %v5396_v51  ;;  %v5503_v63 = vpop.f32.mrb[129].mxu0  ;;  %v5399_v20 = vpop.f32.mrb[102].mxu1 }
 0x3d1   : > { %v5504_v44 = vadd.f32 %v5503_v63, %v5502_v3  ;;  %v5505_v30 = vpop.f32.mrb[130].mxu0  ;;  %v5400_v16 = vpop.f32.mrb[103].mxu1  ;;  %v3227_v63 = vpack.c.bf16 %v3211_v21, %v3210_v42 }
 0x3d2   : > { %v5401_v19 = vadd.f32 %v5400_v16, %v5399_v20  ;;  %v5506_v6 = vpop.f32.mrb[131].mxu0  ;;  %v4078_v23 = vadd.f32 %v5398_v28, %v7608_v61 }
 0x3d3   : > { %v7614_v53 = vadd.f32 %v5504_v44, %v4070_v41  ;;  %v5507_v2 = vadd.f32 %v5506_v6, %v5505_v30  ;;  %4486 = vmatmul.mubr.bf16.gmra.mrb[208].mxu1 %v7492_v24  ;;  %v3276_v44 = vpack.c.bf16 %v3245_v26, %v3244_v35 }
 0x3d4   : > { %4639 = vmatmul.mubr.bf16.gmra.mrb[236].mxu0 %v7511_v34  ;;  %4493 = vmatprep.mubr.bf16.mxu1 %v7545_v59  ;;  %v4081_v34 = vadd.f32 %v5401_v19, %v7608_v61 }
 0x3d5   : > { %v7619_v38 = vadd.f32 %v5507_v2, %v4073_v27  ;;  %4646 = vmatprep.mubr.bf16.mxu0 %v7513_v4  ;;  %v3146_v27 = vld [vmem:[#allocation3 + $0x198] sm:$0xff] }
 0x3d6   : > { %v5402_v54 = vpop.f32.mrb[104].mxu1 }
 0x3d7   : > { %v5508_v0 = vpop.f32.mrb[132].mxu0  ;;  %v5403_v45 = vpop.f32.mrb[105].mxu1 }
 0x3d8   : > { %v5404_v11 = vadd.f32 %v5403_v45, %v5402_v54  ;;  %v5509_v60 = vpop.f32.mrb[133].mxu0  ;;  %v5405_v12 = vpop.f32.mrb[106].mxu1  ;;  %v3246_v54 = vld [vmem:[#allocation3 + $0x4a] sm:$0xff] }
 0x3d9   : > { %v5510_v36 = vadd.f32 %v5509_v60, %v5508_v0  ;;  %v5511_v9 = vpop.f32.mrb[134].mxu0  ;;  %v5406_v7 = vpop.f32.mrb[107].mxu1  ;;  %v3247_v0 = vld [vmem:[#allocation3 + $0x52] sm:$0xff]  ;;  %v3248_v60 = vld [vmem:[#allocation3 + $0x62] sm:$0xff] }
 0x3da   : > { %v5407_v24 = vadd.f32 %v5406_v7, %v5405_v12  ;;  %v5512_v48 = vpop.f32.mrb[135].mxu0  ;;  %v4086_v37 = vadd.f32 %v5404_v11, %v7608_v61  ;;  %v3249_v12 = vld [vmem:[#allocation3 + $0x6a] sm:$0xff] }
 0x3db   : > { %v7624_v59 = vadd.f32 %v5510_v36, %v4078_v23  ;;  %v5513_v32 = vadd.f32 %v5512_v48, %v5511_v9  ;;  %4494 = vmatmul.mubr.bf16.gmra.mrb[212].mxu1 %v7513_v4  ;;  %v6098_v7 = vld [vmem:[#allocation3 + $0x8] sm:$0xff] }
 0x3dc   : > { %4647 = vmatmul.mubr.bf16.gmra.mrb[240].mxu0 %v7529_v5  ;;  %4501 = vmatprep.mubr.bf16.mxu1 %v7553_v55  ;;  %v7633_v55 = vpack.c.bf16 %v3082_v13, %v3081_v14  ;;  %v4089_v1 = vadd.f32 %v5407_v24, %v7608_v61  ;;  %v3163_v24 = vpack.c.bf16 %v6098_v7, %v3146_v27 }
 0x3dd   : > { %v7629_v47 = vadd.f32 %v5513_v32, %v4081_v34  ;;  %4654 = vmatprep.mubr.bf16.mxu0 %v7531_v49  ;;  %v3277_v32 = vpack.c.bf16 %v3247_v0, %v3246_v54 }
 0x3de   : > { %v5408_v25 = vpop.f32.mrb[108].mxu1 }
 0x3df   : > { %v5514_v8 = vpop.f32.mrb[136].mxu0  ;;  %v5409_v56 = vpop.f32.mrb[109].mxu1 }
 0x3e0   : > { %v5410_v18 = vadd.f32 %v5409_v56, %v5408_v25  ;;  %v5515_v39 = vpop.f32.mrb[137].mxu0  ;;  %v5411_v17 = vpop.f32.mrb[110].mxu1  ;;  %v3278_v56 = vpack.c.bf16 %v3249_v12, %v3248_v60 }
 0x3e1   : > { %v5516_v29 = vadd.f32 %v5515_v39, %v5514_v8  ;;  %v5517_v4 = vpop.f32.mrb[138].mxu0  ;;  %v5412_v22 = vpop.f32.mrb[111].mxu1 }
 0x3e2   : > { %v5413_v5 = vadd.f32 %v5412_v22, %v5411_v17  ;;  %v5518_v10 = vpop.f32.mrb[139].mxu0 }
 0x3e3   : > { %v7636_v33 = vadd.f32 %v5516_v29, %v4086_v37  ;;  %v5519_v46 = vadd.f32 %v5518_v10, %v5517_v4  ;;  %4502 = vmatmul.mubr.bf16.gmra.mrb[216].mxu1 %v7531_v49  ;;  %v4094_v49 = vadd.f32 %v5410_v18, %v7608_v61  ;;  %v3250_v37 = vld [vmem:[#allocation3 + $0x7a] sm:$0xff]  ;;  %v3251_v29 = vld [vmem:[#allocation3 + $0x82] sm:$0xff] }
 0x3e4   : > { %4655 = vmatmul.mubr.bf16.gmra.mrb[244].mxu0 %v7540_v40  ;;  %4509 = vmatprep.mubr.bf16.mxu1 %v7633_v55  ;;  %v4097_v30 = vadd.f32 %v5413_v5, %v7608_v61  ;;  %v3252_v5 = vld [vmem:[#allocation3 + $0x92] sm:$0xff]  ;;  %v3253_v10 = vld [vmem:[#allocation3 + $0x9a] sm:$0xff]  ;;  %v3279_v35 = vpack.c.bf16 %v3251_v29, %v3250_v37 }
 0x3e5   : > { %v7641_v43 = vadd.f32 %v5519_v46, %v4089_v1  ;;  %4662 = vmatprep.mubr.bf16.mxu0 %v7542_v58 }
 0x3e6   : > { %v5414_v57 = vpop.f32.mrb[112].mxu1 }
 0x3e7   : > { %v5520_v62 = vpop.f32.mrb[140].mxu0  ;;  %v5415_v31 = vpop.f32.mrb[113].mxu1 }
 0x3e8   : > { %v5416_v52 = vadd.f32 %v5415_v31, %v5414_v57  ;;  %v5521_v51 = vpop.f32.mrb[141].mxu0  ;;  %v5417_v3 = vpop.f32.mrb[114].mxu1 }
 0x3e9   : > { %v5522_v50 = vadd.f32 %v5521_v51, %v5520_v62  ;;  %v5523_v40 = vpop.f32.mrb[142].mxu0  ;;  %v5418_v28 = vpop.f32.mrb[115].mxu1  ;;  %v3280_v51 = vpack.c.bf16 %v3253_v10, %v3252_v5 }
 0x3ea   : > { %v5419_v20 = vadd.f32 %v5418_v28, %v5417_v3  ;;  %v5524_v41 = vpop.f32.mrb[143].mxu0 }
 0x3eb   : > { %v7646_v16 = vadd.f32 %v5522_v50, %v4094_v49  ;;  %v5525_v19 = vadd.f32 %v5524_v41, %v5523_v40  ;;  %4510 = vmatmul.mubr.bf16.gmra.mrb[220].mxu1 %v7542_v58  ;;  %v4102_v58 = vadd.f32 %v5416_v52, %v7608_v61 }
 0x3ec   : > { %4663 = vmatmul.mubr.bf16.gmra.mrb[248].mxu0 %v7550_v15  ;;  %5902 = vmatprep.mubr.bf16.mxu1 %v3276_v44  ;;  %v4105_v14 = vadd.f32 %v5419_v20, %v7608_v61  ;;  %v3255_v20 = vld [vmem:[#allocation3 + $0xb2] sm:$0xff] }
 0x3ed   : > { %v7650_v6 = vadd.f32 %v5525_v19, %v4097_v30  ;;  %4670 = vmatprep.mubr.bf16.mxu0 %v3227_v63  ;;  %v3254_v63 = vld [vmem:[#allocation3 + $0xaa] sm:$0xff]  ;;  %v3256_v30 = vld [vmem:[#allocation3 + $0xc2] sm:$0xff] }
 0x3ee   : > { %v5420_v2 = vpop.f32.mrb[116].mxu1  ;;  %v3257_v19 = vld [vmem:[#allocation3 + $0xca] sm:$0xff]  ;;  %v3281_v12 = vpack.c.bf16 %v3255_v20, %v3254_v63 }
 0x3ef   : > { %v5526_v45 = vpop.f32.mrb[144].mxu0  ;;  %v5421_v11 = vpop.f32.mrb[117].mxu1 }
 0x3f0   : > { %v5422_v23 = vadd.f32 %v5421_v11, %v5420_v2  ;;  %v5527_v36 = vpop.f32.mrb[145].mxu0  ;;  %v5423_v9 = vpop.f32.mrb[118].mxu1 }
 0x3f1   : > { %v5528_v15 = vadd.f32 %v5527_v36, %v5526_v45  ;;  %v5529_v48 = vpop.f32.mrb[146].mxu0  ;;  %v5424_v34 = vpop.f32.mrb[119].mxu1 }
 0x3f2   : > { %v5425_v25 = vadd.f32 %v5424_v34, %v5423_v9  ;;  %v5530_v8 = vpop.f32.mrb[147].mxu0  ;;  %v4110_v42 = vadd.f32 %v5422_v23, %v7608_v61  ;;  %v3282_v9 = vpack.c.bf16 %v3257_v19, %v3256_v30  ;;  %v3258_v34 = vld [vmem:[#allocation3 + $0xda] sm:$0xff] }
 0x3f3   : > { %v7654_v13 = vadd.f32 %v5528_v15, %v4102_v58  ;;  %v5531_v18 = vadd.f32 %v5530_v8, %v5529_v48  ;;  %5903 = vmatmul.mubr.bf16.vlgmr.msra.gmra.mrb[224].mxu1 %v3277_v32  ;;  %v3259_v32 = vld [vmem:[#allocation3 + $0xe2] sm:$0xff] }
 0x3f4   : > { %4671 = vmatmul.mubr.bf16.gmra.mrb[252].mxu0 %v3163_v24  ;;  %5906 = vmatprep.mubr.bf16.mxu1 %v3278_v56  ;;  %v4113_v3 = vadd.f32 %v5425_v25, %v7608_v61  ;;  %v3260_v56 = vld [vmem:[#allocation3 + $0xf2] sm:$0xff]  ;;  %v3283_v10 = vpack.c.bf16 %v3259_v32, %v3258_v34  ;;  %v3269_v32 = vld [vmem:[#allocation3 + $0x15a] sm:$0xff] }
 0x3f5   : > { %v7656_v39 = vadd.f32 %v5531_v18, %v4105_v14  ;;  %v3261_v14 = vld [vmem:[#allocation3 + $0xfa] sm:$0xff]  ;;  %v3268_v34 = vld [vmem:[#allocation3 + $0x152] sm:$0xff] }
 0x3f6   : > { %v5426_v17 = vpop.f32.mrb[120].mxu1 }
 0x3f7   : > { %v5532_v4 = vpop.f32.mrb[148].mxu0  ;;  %v5427_v22 = vpop.f32.mrb[121].mxu1 }
 0x3f8   : > { %v5428_v1 = vadd.f32 %v5427_v22, %v5426_v17  ;;  %v5533_v46 = vpop.f32.mrb[149].mxu0  ;;  %v5429_v57 = vpop.f32.mrb[122].mxu1 }
 0x3f9   : > { %v5534_v21 = vadd.f32 %v5533_v46, %v5532_v4  ;;  %v5535_v62 = vpop.f32.mrb[150].mxu0  ;;  %v5430_v31 = vpop.f32.mrb[123].mxu1 }
 0x3fa   : > { %v5431_v26 = vadd.f32 %v5430_v31, %v5429_v57  ;;  %v5536_v52 = vpop.f32.mrb[151].mxu0  ;;  %v4118_v0 = vadd.f32 %v5428_v1, %v7608_v61  ;;  %v3284_v57 = vpack.c.bf16 %v3261_v14, %v3260_v56 }
 0x3fb   : > { %v7660_v49 = vadd.f32 %v5534_v21, %v4110_v42  ;;  %v5537_v50 = vadd.f32 %v5536_v52, %v5535_v62  ;;  %5907 = vmatmul.mubr.bf16.gmra.mrb[228].mxu1 %v3279_v35  ;;  %v3263_v52 = vld [vmem:[#allocation3 + $0x112] sm:$0xff] }
 0x3fc   : > { %5910 = vmatprep.mubr.bf16.mxu1 %v3280_v51  ;;  %v4121_v7 = vadd.f32 %v5431_v26, %v7608_v61  ;;  %v3262_v26 = vld [vmem:[#allocation3 + $0x10a] sm:$0xff] }
 0x3fd   : > { %v7662_v40 = vadd.f32 %v5537_v50, %v4113_v3  ;;  %v3264_v50 = vld [vmem:[#allocation3 + $0x122] sm:$0xff] }
 0x3fe   : > { %v5432_v28 = vpop.f32.mrb[124].mxu1 }
 0x3ff   : > { %v5538_v41 = vpop.f32.mrb[152].mxu0  ;;  %v5433_v44 = vpop.f32.mrb[125].mxu1 }
 0x400   : > { %v5434_v27 = vadd.f32 %v5433_v44, %v5432_v28  ;;  %v5539_v2 = vpop.f32.mrb[153].mxu0  ;;  %v5435_v54 = vpop.f32.mrb[126].mxu1  ;;  %v3265_v28 = vld [vmem:[#allocation3 + $0x12a] sm:$0xff] }
 0x401   : > { %v5540_v45 = vadd.f32 %v5539_v2, %v5538_v41  ;;  %v5541_v11 = vpop.f32.mrb[154].mxu0  ;;  %v5436_v60 = vpop.f32.mrb[127].mxu1  ;;  %v3285_v2 = vpack.c.bf16 %v3263_v52, %v3262_v26 }
 0x402   : > { %v5437_v23 = vadd.f32 %v5436_v60, %v5435_v54  ;;  %v5542_v36 = vpop.f32.mrb[155].mxu0  ;;  %v4126_v29 = vadd.f32 %v5434_v27, %v7608_v61 }
 0x403   : > { %v7666_v24 = vadd.f32 %v5540_v45, %v4118_v0  ;;  %v5543_v58 = vadd.f32 %v5542_v36, %v5541_v11  ;;  %5911 = vmatmul.mubr.bf16.gmra.mrb[232].mxu1 %v3281_v12  ;;  %v3286_v45 = vpack.c.bf16 %v3265_v28, %v3264_v50 }
 0x404   : > { %5914 = vmatprep.mubr.bf16.mxu1 %v3282_v9  ;;  %v4129_v42 = vadd.f32 %v5437_v23, %v7608_v61  ;;  %v3266_v9 = vld [vmem:[#allocation3 + $0x13a] sm:$0xff] }
 0x405   : > { %v7668_v15 = vadd.f32 %v5543_v58, %v4121_v7  ;;  %v3267_v7 = vld [vmem:[#allocation3 + $0x142] sm:$0xff] }
 0x406   : > { %v5438_v48 = vpop.f32.mrb[128].mxu1 }
 0x407   : > { %v5544_v25 = vpop.f32.mrb[156].mxu0  ;;  %v5439_v8 = vpop.f32.mrb[129].mxu1 }
 0x408   : > { %v5440_v18 = vadd.f32 %v5439_v8, %v5438_v48  ;;  %v5545_v17 = vpop.f32.mrb[157].mxu0  ;;  %v5441_v37 = vpop.f32.mrb[130].mxu1 }
 0x409   : > { %v5546_v4 = vadd.f32 %v5545_v17, %v5544_v25  ;;  %v5547_v22 = vpop.f32.mrb[158].mxu0  ;;  %v5442_v5 = vpop.f32.mrb[131].mxu1 }
 0x40a   : > { %v5443_v1 = vadd.f32 %v5442_v5, %v5441_v37  ;;  %v5548_v46 = vpop.f32.mrb[159].mxu0  ;;  %v4134_v44 = vadd.f32 %v5440_v18, %v7608_v61  ;;  %v3288_v5 = vpack.c.bf16 %v3269_v32, %v3268_v34 }
 0x40b   : > { %v7672_v21 = vadd.f32 %v5546_v4, %v4126_v29  ;;  %v5549_v62 = vadd.f32 %v5548_v46, %v5547_v22  ;;  %5915 = vmatmul.mubr.bf16.gmra.mrb[236].mxu1 %v3283_v10  ;;  %v3287_v29 = vpack.c.bf16 %v3267_v7, %v3266_v9 }
 0x40c   : > { %5918 = vmatprep.mubr.bf16.mxu1 %v3284_v57  ;;  %v4137_v11 = vadd.f32 %v5443_v1, %v7608_v61 }
 0x40d   : > { %v7674_v31 = vadd.f32 %v5549_v62, %v4129_v42  ;;  %v3270_v62 = vld [vmem:[#allocation3 + $0x16a] sm:$0xff] }
 0x40e   : > { %v5444_v35 = vpop.f32.mrb[132].mxu1 }
 0x40f   : > { %v5550_v51 = vpop.f32.mrb[160].mxu0  ;;  %v5445_v3 = vpop.f32.mrb[133].mxu1 }
 0x410   : > { %v5446_v63 = vadd.f32 %v5445_v3, %v5444_v35  ;;  %v5551_v20 = vpop.f32.mrb[161].mxu0  ;;  %v5447_v41 = vpop.f32.mrb[134].mxu1  ;;  %v3271_v35 = vld [vmem:[#allocation3 + $0x172] sm:$0xff] }
 0x411   : > { %v5552_v30 = vadd.f32 %v5551_v20, %v5550_v51  ;;  %v5553_v19 = vpop.f32.mrb[162].mxu0  ;;  %v5448_v27 = vpop.f32.mrb[135].mxu1 }
 0x412   : > { %v5449_v54 = vadd.f32 %v5448_v27, %v5447_v41  ;;  %v5554_v0 = vpop.f32.mrb[163].mxu0  ;;  %v4142_v14 = vadd.f32 %v5446_v63, %v7608_v61 }
 0x413   : > { %v7678_v60 = vadd.f32 %v5552_v30, %v4134_v44  ;;  %v5555_v12 = vadd.f32 %v5554_v0, %v5553_v19  ;;  %5919 = vmatmul.mubr.bf16.gmra.mrb[240].mxu1 %v3285_v2  ;;  %v3289_v44 = vpack.c.bf16 %v3271_v35, %v3270_v62  ;;  %v3274_v0 = vld [vmem:[#allocation3 + $0x19a] sm:$0xff] }
 0x414   : > { %5922 = vmatprep.mubr.bf16.mxu1 %v3286_v45  ;;  %v4145_v10 = vadd.f32 %v5449_v54, %v7608_v61  ;;  %v3275_v45 = vld [vmem:[#allocation3 + $0x1a2] sm:$0xff] }
 0x415   : > { %v7680_v23 = vadd.f32 %v5555_v12, %v4137_v11  ;;  %v3291_v7 = vpack.c.bf16 %v3275_v45, %v3274_v0 }
 0x416   : > { %v5450_v36 = vpop.f32.mrb[136].mxu1 }
 0x417   : > { %v5556_v58 = vpop.f32.mrb[164].mxu0  ;;  %v5451_v48 = vpop.f32.mrb[137].mxu1 }
 0x418   : > { %v5452_v25 = vadd.f32 %v5451_v48, %v5450_v36  ;;  %v5557_v8 = vpop.f32.mrb[165].mxu0  ;;  %v5453_v56 = vpop.f32.mrb[138].mxu1 }
 0x419   : > { %v5558_v18 = vadd.f32 %v5557_v8, %v5556_v58  ;;  %v5559_v17 = vpop.f32.mrb[166].mxu0  ;;  %v5454_v37 = vpop.f32.mrb[139].mxu1 }
 0x41a   : > { %v5455_v4 = vadd.f32 %v5454_v37, %v5453_v56  ;;  %v5560_v22 = vpop.f32.mrb[167].mxu0  ;;  %v4150_v28 = vadd.f32 %v5452_v25, %v7608_v61 }
 0x41b   : > { %v7684_v1 = vadd.f32 %v5558_v18, %v4142_v14  ;;  %v5561_v46 = vadd.f32 %v5560_v22, %v5559_v17  ;;  %5923 = vmatmul.mubr.bf16.gmra.mrb[244].mxu1 %v3287_v29 }
 0x41c   : > { %5926 = vmatprep.mubr.bf16.mxu1 %v3288_v5  ;;  %v4153_v27 = vadd.f32 %v5455_v4, %v7608_v61 }
 0x41d   : > { %v7686_v57 = vadd.f32 %v5561_v46, %v4145_v10 }
 0x41e   : > { %v5456_v42 = vpop.f32.mrb[140].mxu1 }
 0x41f   : > { %v5562_v26 = vpop.f32.mrb[168].mxu0  ;;  %v5457_v52 = vpop.f32.mrb[141].mxu1 }
 0x420   : > { %v5458_v51 = vadd.f32 %v5457_v52, %v5456_v42  ;;  %v5563_v3 = vpop.f32.mrb[169].mxu0  ;;  %v5459_v50 = vpop.f32.mrb[142].mxu1 }
 0x421   : > { %v5564_v63 = vadd.f32 %v5563_v3, %v5562_v26  ;;  %v5565_v20 = vpop.f32.mrb[170].mxu0  ;;  %v5460_v41 = vpop.f32.mrb[143].mxu1 }
 0x422   : > { %v5461_v30 = vadd.f32 %v5460_v41, %v5459_v50  ;;  %v5566_v19 = vpop.f32.mrb[171].mxu0  ;;  %v4158_v32 = vadd.f32 %v5458_v51, %v7608_v61 }
 0x423   : > { %v7690_v2 = vadd.f32 %v5564_v63, %v4150_v28  ;;  %v5567_v54 = vadd.f32 %v5566_v19, %v5565_v20  ;;  %5927 = vmatmul.mubr.bf16.gmra.mrb[248].mxu1 %v3289_v44 }
 0x424   : > { %5930 = vmatprep.mubr.bf16.mxu1 %v7633_v55  ;;  %v4161_v55 = vadd.f32 %v5461_v30, %v7608_v61 }
 0x425   : > { %v7693_v11 = vadd.f32 %v5567_v54, %v4153_v27 }
 0x426   : > { %v5462_v12 = vpop.f32.mrb[144].mxu1 }
 0x427   : > { %v5568_v36 = vpop.f32.mrb[172].mxu0  ;;  %v5463_v9 = vpop.f32.mrb[145].mxu1 }
 0x428   : > { %v5464_v58 = vadd.f32 %v5463_v9, %v5462_v12  ;;  %v5569_v48 = vpop.f32.mrb[173].mxu0  ;;  %v5465_v34 = vpop.f32.mrb[146].mxu1 }
 0x429   : > { %v5570_v25 = vadd.f32 %v5569_v48, %v5568_v36  ;;  %v5571_v8 = vpop.f32.mrb[174].mxu0  ;;  %v5466_v56 = vpop.f32.mrb[147].mxu1 }
 0x42a   : > { %v5467_v14 = vadd.f32 %v5466_v56, %v5465_v34  ;;  %v5572_v18 = vpop.f32.mrb[175].mxu0  ;;  %v4166_v62 = vadd.f32 %v5464_v58, %v7608_v61 }
 0x42b   : > { %v7697_v17 = vadd.f32 %v5570_v25, %v4158_v32  ;;  %v5573_v37 = vadd.f32 %v5572_v18, %v5571_v8  ;;  %5931 = vmatmul.mubr.bf16.gmra.mrb[252].mxu1 %v3291_v7 }
 0x42c   : > { %v4169_v50 = vadd.f32 %v5467_v14, %v7608_v61 }
 0x42d   : > { %v7699_v29 = vadd.f32 %v5573_v37, %v4161_v55 }
 0x42e   : > { %v5468_v4 = vpop.f32.mrb[148].mxu1 }
 0x42f   : > { %v5574_v22 = vpop.f32.mrb[176].mxu0  ;;  %v5469_v5 = vpop.f32.mrb[149].mxu1 }
 0x430   : > { %v5470_v10 = vadd.f32 %v5469_v5, %v5468_v4  ;;  %v5575_v46 = vpop.f32.mrb[177].mxu0  ;;  %v5471_v42 = vpop.f32.mrb[150].mxu1 }
 0x431   : > { %v5576_v35 = vadd.f32 %v5575_v46, %v5574_v22  ;;  %v5577_v26 = vpop.f32.mrb[178].mxu0  ;;  %v5472_v52 = vpop.f32.mrb[151].mxu1 }
 0x432   : > { %v5473_v51 = vadd.f32 %v5472_v52, %v5471_v42  ;;  %v5578_v3 = vpop.f32.mrb[179].mxu0  ;;  %v4174_v0 = vadd.f32 %v5470_v10, %v7608_v61 }
 0x433   : > { %v7703_v28 = vadd.f32 %v5576_v35, %v4166_v62  ;;  %v5579_v63 = vadd.f32 %v5578_v3, %v5577_v26 }
 0x434   : > { %v4177_v58 = vadd.f32 %v5473_v51, %v7608_v61 }
 0x435   : > { %v7705_v20 = vadd.f32 %v5579_v63, %v4169_v50 }
 0x436   : > { %v5474_v41 = vpop.f32.mrb[152].mxu1 }
 0x437   : > { %v5580_v44 = vpop.f32.mrb[180].mxu0  ;;  %v5475_v30 = vpop.f32.mrb[153].mxu1 }
 0x438   : > { %v5476_v19 = vadd.f32 %v5475_v30, %v5474_v41  ;;  %v5581_v27 = vpop.f32.mrb[181].mxu0  ;;  %v5477_v54 = vpop.f32.mrb[154].mxu1 }
 0x439   : > { %v5582_v45 = vadd.f32 %v5581_v27, %v5580_v44  ;;  %v5583_v12 = vpop.f32.mrb[182].mxu0  ;;  %v5478_v36 = vpop.f32.mrb[155].mxu1 }
 0x43a   : > { %v5479_v9 = vadd.f32 %v5478_v36, %v5477_v54  ;;  %v5584_v7 = vpop.f32.mrb[183].mxu0  ;;  %v4182_v37 = vadd.f32 %v5476_v19, %v7608_v61 }
 0x43b   : > { %v7709_v48 = vadd.f32 %v5582_v45, %v4174_v0  ;;  %v5585_v34 = vadd.f32 %v5584_v7, %v5583_v12 }
 0x43c   : > { %v4185_v42 = vadd.f32 %v5479_v9, %v7608_v61 }
 0x43d   : > { %v7711_v32 = vadd.f32 %v5585_v34, %v4177_v58 }
 0x43e   : > { %v5480_v25 = vpop.f32.mrb[156].mxu1 }
 0x43f   : > { %v5586_v8 = vpop.f32.mrb[184].mxu0  ;;  %v5481_v56 = vpop.f32.mrb[157].mxu1 }
 0x440   : > { %v5482_v14 = vadd.f32 %v5481_v56, %v5480_v25  ;;  %v5587_v18 = vpop.f32.mrb[185].mxu0  ;;  %v5483_v55 = vpop.f32.mrb[158].mxu1 }
 0x441   : > { %v5588_v4 = vadd.f32 %v5587_v18, %v5586_v8  ;;  %v5589_v22 = vpop.f32.mrb[186].mxu0  ;;  %v5484_v5 = vpop.f32.mrb[159].mxu1 }
 0x442   : > { %v5485_v10 = vadd.f32 %v5484_v5, %v5483_v55  ;;  %v5590_v46 = vpop.f32.mrb[187].mxu0  ;;  %v4190_v44 = vadd.f32 %v5482_v14, %v7608_v61 }
 0x443   : > { %v7715_v62 = vadd.f32 %v5588_v4, %v4182_v37  ;;  %v5591_v35 = vadd.f32 %v5590_v46, %v5589_v22 }
 0x444   : > { %v4193_v12 = vadd.f32 %v5485_v10, %v7608_v61 }
 0x445   : > { %v7717_v26 = vadd.f32 %v5591_v35, %v4185_v42 }
 0x446   : > { %v5614_v52 = vpop.f32.mrb[160].mxu1 }
 0x447   : > { %v5592_v51 = vpop.f32.mrb[188].mxu0  ;;  %v5615_v3 = vpop.f32.mrb[161].mxu1 }
 0x448   : > { %v5593_v50 = vpop.f32.mrb[189].mxu0  ;;  %v5616_v63 = vadd.f32 %v5615_v3, %v5614_v52  ;;  %v5617_v41 = vpop.f32.mrb[162].mxu1 }
 0x449   : > { %v5594_v30 = vadd.f32 %v5593_v50, %v5592_v51  ;;  %v5595_v19 = vpop.f32.mrb[190].mxu0  ;;  %v5618_v27 = vpop.f32.mrb[163].mxu1 }
 0x44a   : > { %v4392_v54 = vadd.f32 %v5616_v63, %v7614_v53  ;;  %v5596_v0 = vpop.f32.mrb[191].mxu0  ;;  %v5619_v45 = vadd.f32 %v5618_v27, %v5617_v41 }
 0x44b   : > { %v7722_v36 = vadd.f32 %v5594_v30, %v4190_v44  ;;  %v5597_v9 = vadd.f32 %v5596_v0, %v5595_v19 }
 0x44c   : > { %v4395_v7 = vadd.f32 %v5619_v45, %v7619_v38 }
 0x44d   : > { %v7725_v58 = vadd.f32 %v5597_v9, %v4193_v12 }
 0x44e   : > { %v5620_v34 = vpop.f32.mrb[164].mxu1 }
 0x44f   : > { %v5726_v25 = vpop.f32.mrb[192].mxu0  ;;  %v5621_v8 = vpop.f32.mrb[165].mxu1 }
 0x450   : > { %v5622_v56 = vadd.f32 %v5621_v8, %v5620_v34  ;;  %v5727_v14 = vpop.f32.mrb[193].mxu0  ;;  %v5623_v18 = vpop.f32.mrb[166].mxu1 }
 0x451   : > { %v5728_v55 = vadd.f32 %v5727_v14, %v5726_v25  ;;  %v5729_v37 = vpop.f32.mrb[194].mxu0  ;;  %v5624_v53 = vpop.f32.mrb[167].mxu1 }
 0x452   : > { %v4400_v4 = vadd.f32 %v5622_v56, %v7624_v59  ;;  %v5625_v22 = vadd.f32 %v5624_v53, %v5623_v18  ;;  %v5730_v61 = vpop.f32.mrb[195].mxu0 }
 0x453   : > { %v5731_v5 = vadd.f32 %v5730_v61, %v5729_v37  ;;  %v7728_v10 = vadd.f32 %v5728_v55, %v4392_v54 }
 0x454   : > { %v4403_v38 = vadd.f32 %v5625_v22, %v7629_v47 }
 0x455   : > { %v7731_v46 = vadd.f32 %v5731_v5, %v4395_v7 }
 0x456   : > { %v5626_v42 = vpop.f32.mrb[168].mxu1 }
 0x457   : > { %v5732_v35 = vpop.f32.mrb[196].mxu0  ;;  %v5627_v52 = vpop.f32.mrb[169].mxu1 }
 0x458   : > { %v5628_v51 = vadd.f32 %v5627_v52, %v5626_v42  ;;  %v5733_v3 = vpop.f32.mrb[197].mxu0  ;;  %v5629_v50 = vpop.f32.mrb[170].mxu1 }
 0x459   : > { %v5734_v63 = vadd.f32 %v5733_v3, %v5732_v35  ;;  %v5735_v41 = vpop.f32.mrb[198].mxu0  ;;  %v5630_v44 = vpop.f32.mrb[171].mxu1 }
 0x45a   : > { %v4408_v59 = vadd.f32 %v5628_v51, %v7636_v33  ;;  %v5631_v30 = vadd.f32 %v5630_v44, %v5629_v50  ;;  %v5736_v19 = vpop.f32.mrb[199].mxu0 }
 0x45b   : > { %v5737_v27 = vadd.f32 %v5736_v19, %v5735_v41  ;;  %v7734_v54 = vadd.f32 %v5734_v63, %v4400_v4 }
 0x45c   : > { %v4411_v47 = vadd.f32 %v5631_v30, %v7641_v43 }
 0x45d   : > { %v7737_v0 = vadd.f32 %v5737_v27, %v4403_v38 }
 0x45e   : > { %v5632_v45 = vpop.f32.mrb[172].mxu1 }
 0x45f   : > { %v5738_v12 = vpop.f32.mrb[200].mxu0  ;;  %v5633_v9 = vpop.f32.mrb[173].mxu1 }
 0x460   : > { %v5634_v7 = vadd.f32 %v5633_v9, %v5632_v45  ;;  %v5739_v34 = vpop.f32.mrb[201].mxu0  ;;  %v5635_v25 = vpop.f32.mrb[174].mxu1 }
 0x461   : > { %v5740_v8 = vadd.f32 %v5739_v34, %v5738_v12  ;;  %v5741_v56 = vpop.f32.mrb[202].mxu0  ;;  %v5636_v14 = vpop.f32.mrb[175].mxu1 }
 0x462   : > { %v4416_v33 = vadd.f32 %v5634_v7, %v7646_v16  ;;  %v5637_v18 = vadd.f32 %v5636_v14, %v5635_v25  ;;  %v5742_v55 = vpop.f32.mrb[203].mxu0 }
 0x463   : > { %v5743_v37 = vadd.f32 %v5742_v55, %v5741_v56  ;;  %v7740_v53 = vadd.f32 %v5740_v8, %v4408_v59 }
 0x464   : > { %v4419_v43 = vadd.f32 %v5637_v18, %v7650_v6 }
 0x465   : > { %v7743_v4 = vadd.f32 %v5743_v37, %v4411_v47 }
 0x466   : > { %v5638_v22 = vpop.f32.mrb[176].mxu1 }
 0x467   : > { %v5744_v61 = vpop.f32.mrb[204].mxu0  ;;  %v5639_v5 = vpop.f32.mrb[177].mxu1 }
 0x468   : > { %v5640_v38 = vadd.f32 %v5639_v5, %v5638_v22  ;;  %v5745_v42 = vpop.f32.mrb[205].mxu0  ;;  %v5641_v35 = vpop.f32.mrb[178].mxu1 }
 0x469   : > { %v5746_v52 = vadd.f32 %v5745_v42, %v5744_v61  ;;  %v5747_v51 = vpop.f32.mrb[206].mxu0  ;;  %v5642_v3 = vpop.f32.mrb[179].mxu1 }
 0x46a   : > { %v4424_v16 = vadd.f32 %v5640_v38, %v7654_v13  ;;  %v5643_v50 = vadd.f32 %v5642_v3, %v5641_v35  ;;  %v5748_v63 = vpop.f32.mrb[207].mxu0 }
 0x46b   : > { %v5749_v41 = vadd.f32 %v5748_v63, %v5747_v51  ;;  %v7746_v44 = vadd.f32 %v5746_v52, %v4416_v33 }
 0x46c   : > { %v4427_v6 = vadd.f32 %v5643_v50, %v7656_v39 }
 0x46d   : > { %v7749_v59 = vadd.f32 %v5749_v41, %v4419_v43 }
 0x46e   : > { %v5644_v30 = vpop.f32.mrb[180].mxu1 }
 0x46f   : > { %v5750_v19 = vpop.f32.mrb[208].mxu0  ;;  %v5645_v27 = vpop.f32.mrb[181].mxu1 }
 0x470   : > { %v5646_v47 = vadd.f32 %v5645_v27, %v5644_v30  ;;  %v5751_v45 = vpop.f32.mrb[209].mxu0  ;;  %v5647_v12 = vpop.f32.mrb[182].mxu1 }
 0x471   : > { %v5752_v9 = vadd.f32 %v5751_v45, %v5750_v19  ;;  %v5753_v7 = vpop.f32.mrb[210].mxu0  ;;  %v5648_v34 = vpop.f32.mrb[183].mxu1 }
 0x472   : > { %v4432_v13 = vadd.f32 %v5646_v47, %v7660_v49  ;;  %v5649_v25 = vadd.f32 %v5648_v34, %v5647_v12  ;;  %v5754_v8 = vpop.f32.mrb[211].mxu0 }
 0x473   : > { %v5755_v56 = vadd.f32 %v5754_v8, %v5753_v7  ;;  %v7752_v14 = vadd.f32 %v5752_v9, %v4424_v16 }
 0x474   : > { %v4435_v39 = vadd.f32 %v5649_v25, %v7662_v40 }
 0x475   : > { %v7755_v33 = vadd.f32 %v5755_v56, %v4427_v6 }
 0x476   : > { %v5650_v18 = vpop.f32.mrb[184].mxu1 }
 0x477   : > { %v5756_v55 = vpop.f32.mrb[212].mxu0  ;;  %v5651_v37 = vpop.f32.mrb[185].mxu1 }
 0x478   : > { %v5652_v43 = vadd.f32 %v5651_v37, %v5650_v18  ;;  %v5757_v22 = vpop.f32.mrb[213].mxu0  ;;  %v5653_v61 = vpop.f32.mrb[186].mxu1 }
 0x479   : > { %v5758_v5 = vadd.f32 %v5757_v22, %v5756_v55  ;;  %v5759_v38 = vpop.f32.mrb[214].mxu0  ;;  %v5654_v42 = vpop.f32.mrb[187].mxu1 }
 0x47a   : > { %v4440_v49 = vadd.f32 %v5652_v43, %v7666_v24  ;;  %v5655_v35 = vadd.f32 %v5654_v42, %v5653_v61  ;;  %v5760_v52 = vpop.f32.mrb[215].mxu0 }
 0x47b   : > { %v5761_v51 = vadd.f32 %v5760_v52, %v5759_v38  ;;  %v7758_v3 = vadd.f32 %v5758_v5, %v4432_v13 }
 0x47c   : > { %v4443_v40 = vadd.f32 %v5655_v35, %v7668_v15 }
 0x47d   : > { %v7761_v16 = vadd.f32 %v5761_v51, %v4435_v39 }
 0x47e   : > { %v5656_v50 = vpop.f32.mrb[188].mxu1 }
 0x47f   : > { %v5762_v63 = vpop.f32.mrb[216].mxu0  ;;  %v5657_v41 = vpop.f32.mrb[189].mxu1 }
 0x480   : > { %v5658_v6 = vadd.f32 %v5657_v41, %v5656_v50  ;;  %v5763_v30 = vpop.f32.mrb[217].mxu0  ;;  %v5659_v19 = vpop.f32.mrb[190].mxu1 }
 0x481   : > { %v5764_v27 = vadd.f32 %v5763_v30, %v5762_v63  ;;  %v5765_v47 = vpop.f32.mrb[218].mxu0  ;;  %v5660_v45 = vpop.f32.mrb[191].mxu1 }
 0x482   : > { %v4448_v24 = vadd.f32 %v5658_v6, %v7672_v21  ;;  %v5661_v12 = vadd.f32 %v5660_v45, %v5659_v19  ;;  %v5766_v9 = vpop.f32.mrb[219].mxu0 }
 0x483   : > { %v5767_v7 = vadd.f32 %v5766_v9, %v5765_v47  ;;  %v7764_v34 = vadd.f32 %v5764_v27, %v4440_v49 }
 0x484   : > { %v4451_v15 = vadd.f32 %v5661_v12, %v7674_v31 }
 0x485   : > { %v7767_v13 = vadd.f32 %v5767_v7, %v4443_v40 }
 0x486   : > { %v5662_v25 = vpop.f32.mrb[192].mxu1 }
 0x487   : > { %v5768_v8 = vpop.f32.mrb[220].mxu0  ;;  %v5663_v56 = vpop.f32.mrb[193].mxu1 }
 0x488   : > { %v5664_v39 = vadd.f32 %v5663_v56, %v5662_v25  ;;  %v5769_v18 = vpop.f32.mrb[221].mxu0  ;;  %v5665_v55 = vpop.f32.mrb[194].mxu1 }
 0x489   : > { %v5770_v37 = vadd.f32 %v5769_v18, %v5768_v8  ;;  %v5771_v43 = vpop.f32.mrb[222].mxu0  ;;  %v5666_v22 = vpop.f32.mrb[195].mxu1 }
 0x48a   : > { %v4456_v21 = vadd.f32 %v5664_v39, %v7678_v60  ;;  %v5667_v61 = vadd.f32 %v5666_v22, %v5665_v55  ;;  %v5772_v5 = vpop.f32.mrb[223].mxu0 }
 0x48b   : > { %v5773_v38 = vadd.f32 %v5772_v5, %v5771_v43  ;;  %v7770_v42 = vadd.f32 %v5770_v37, %v4448_v24 }
 0x48c   : > { %v4459_v31 = vadd.f32 %v5667_v61, %v7680_v23 }
 0x48d   : > { %v7773_v49 = vadd.f32 %v5773_v38, %v4451_v15 }
 0x48e   : > { %v5668_v35 = vpop.f32.mrb[196].mxu1 }
 0x48f   : > { %v5774_v52 = vpop.f32.mrb[224].mxu0  ;;  %v5669_v51 = vpop.f32.mrb[197].mxu1 }
 0x490   : > { %v5670_v40 = vadd.f32 %v5669_v51, %v5668_v35  ;;  %v5775_v50 = vpop.f32.mrb[225].mxu0  ;;  %v5671_v63 = vpop.f32.mrb[198].mxu1 }
 0x491   : > { %v5776_v41 = vadd.f32 %v5775_v50, %v5774_v52  ;;  %v5777_v6 = vpop.f32.mrb[226].mxu0  ;;  %v5672_v30 = vpop.f32.mrb[199].mxu1 }
 0x492   : > { %v4464_v60 = vadd.f32 %v5670_v40, %v7684_v1  ;;  %v5673_v19 = vadd.f32 %v5672_v30, %v5671_v63  ;;  %v5778_v27 = vpop.f32.mrb[227].mxu0 }
 0x493   : > { %v5779_v47 = vadd.f32 %v5778_v27, %v5777_v6  ;;  %v7776_v45 = vadd.f32 %v5776_v41, %v4456_v21 }
 0x494   : > { %v4467_v23 = vadd.f32 %v5673_v19, %v7686_v57 }
 0x495   : > { %v7779_v24 = vadd.f32 %v5779_v47, %v4459_v31 }
 0x496   : > { %v5674_v12 = vpop.f32.mrb[200].mxu1 }
 0x497   : > { %v5780_v9 = vpop.f32.mrb[228].mxu0  ;;  %v5675_v7 = vpop.f32.mrb[201].mxu1 }
 0x498   : > { %v5676_v15 = vadd.f32 %v5675_v7, %v5674_v12  ;;  %v5781_v25 = vpop.f32.mrb[229].mxu0  ;;  %v5677_v8 = vpop.f32.mrb[202].mxu1 }
 0x499   : > { %v5782_v56 = vadd.f32 %v5781_v25, %v5780_v9  ;;  %v5783_v39 = vpop.f32.mrb[230].mxu0  ;;  %v5678_v18 = vpop.f32.mrb[203].mxu1 }
 0x49a   : > { %v4472_v1 = vadd.f32 %v5676_v15, %v7690_v2  ;;  %v5679_v55 = vadd.f32 %v5678_v18, %v5677_v8  ;;  %v5784_v37 = vpop.f32.mrb[231].mxu0 }
 0x49b   : > { %v5785_v43 = vadd.f32 %v5784_v37, %v5783_v39  ;;  %v7782_v22 = vadd.f32 %v5782_v56, %v4464_v60 }
 0x49c   : > { %v4475_v57 = vadd.f32 %v5679_v55, %v7693_v11 }
 0x49d   : > { %v7785_v21 = vadd.f32 %v5785_v43, %v4467_v23 }
 0x49e   : > { %v5680_v61 = vpop.f32.mrb[204].mxu1 }
 0x49f   : > { %v5786_v5 = vpop.f32.mrb[232].mxu0  ;;  %v5681_v38 = vpop.f32.mrb[205].mxu1 }
 0x4a0   : > { %v5682_v31 = vadd.f32 %v5681_v38, %v5680_v61  ;;  %v5787_v35 = vpop.f32.mrb[233].mxu0  ;;  %v5683_v52 = vpop.f32.mrb[206].mxu1 }
 0x4a1   : > { %v5788_v51 = vadd.f32 %v5787_v35, %v5786_v5  ;;  %v5789_v40 = vpop.f32.mrb[234].mxu0  ;;  %v5684_v50 = vpop.f32.mrb[207].mxu1 }
 0x4a2   : > { %v4480_v2 = vadd.f32 %v5682_v31, %v7697_v17  ;;  %v5685_v63 = vadd.f32 %v5684_v50, %v5683_v52  ;;  %v5790_v41 = vpop.f32.mrb[235].mxu0 }
 0x4a3   : > { %v5791_v6 = vadd.f32 %v5790_v41, %v5789_v40  ;;  %v7788_v30 = vadd.f32 %v5788_v51, %v4472_v1 }
 0x4a4   : > { %v4483_v11 = vadd.f32 %v5685_v63, %v7699_v29 }
 0x4a5   : > { %v7791_v60 = vadd.f32 %v5791_v6, %v4475_v57 }
 0x4a6   : > { %v5686_v19 = vpop.f32.mrb[208].mxu1 }
 0x4a7   : > { %v5792_v27 = vpop.f32.mrb[236].mxu0  ;;  %v5687_v47 = vpop.f32.mrb[209].mxu1 }
 0x4a8   : > { %v5688_v23 = vadd.f32 %v5687_v47, %v5686_v19  ;;  %v5793_v12 = vpop.f32.mrb[237].mxu0  ;;  %v5689_v9 = vpop.f32.mrb[210].mxu1 }
 0x4a9   : > { %v5794_v7 = vadd.f32 %v5793_v12, %v5792_v27  ;;  %v5795_v15 = vpop.f32.mrb[238].mxu0  ;;  %v5690_v25 = vpop.f32.mrb[211].mxu1 }
 0x4aa   : > { %v4488_v17 = vadd.f32 %v5688_v23, %v7703_v28  ;;  %v5691_v8 = vadd.f32 %v5690_v25, %v5689_v9  ;;  %v5796_v56 = vpop.f32.mrb[239].mxu0 }
 0x4ab   : > { %v5797_v39 = vadd.f32 %v5796_v56, %v5795_v15  ;;  %v7794_v18 = vadd.f32 %v5794_v7, %v4480_v2 }
 0x4ac   : > { %v4491_v29 = vadd.f32 %v5691_v8, %v7705_v20 }
 0x4ad   : > { %v7797_v1 = vadd.f32 %v5797_v39, %v4483_v11 }
 0x4ae   : > { %v5692_v55 = vpop.f32.mrb[212].mxu1 }
 0x4af   : > { %v5798_v37 = vpop.f32.mrb[240].mxu0  ;;  %v5693_v43 = vpop.f32.mrb[213].mxu1 }
 0x4b0   : > { %v5694_v57 = vadd.f32 %v5693_v43, %v5692_v55  ;;  %v5799_v61 = vpop.f32.mrb[241].mxu0  ;;  %v5695_v5 = vpop.f32.mrb[214].mxu1 }
 0x4b1   : > { %v5800_v38 = vadd.f32 %v5799_v61, %v5798_v37  ;;  %v5801_v31 = vpop.f32.mrb[242].mxu0  ;;  %v5696_v35 = vpop.f32.mrb[215].mxu1 }
 0x4b2   : > { %v4496_v28 = vadd.f32 %v5694_v57, %v7709_v48  ;;  %v5697_v52 = vadd.f32 %v5696_v35, %v5695_v5  ;;  %v5802_v51 = vpop.f32.mrb[243].mxu0 }
 0x4b3   : > { %v5803_v40 = vadd.f32 %v5802_v51, %v5801_v31  ;;  %v7800_v50 = vadd.f32 %v5800_v38, %v4488_v17 }
 0x4b4   : > { %v4499_v20 = vadd.f32 %v5697_v52, %v7711_v32 }
 0x4b5   : > { %v7803_v2 = vadd.f32 %v5803_v40, %v4491_v29 }
 0x4b6   : > { %v5698_v63 = vpop.f32.mrb[216].mxu1 }
 0x4b7   : > { %v5804_v41 = vpop.f32.mrb[244].mxu0  ;;  %v5699_v6 = vpop.f32.mrb[217].mxu1 }
 0x4b8   : > { %v5700_v11 = vadd.f32 %v5699_v6, %v5698_v63  ;;  %v5805_v19 = vpop.f32.mrb[245].mxu0  ;;  %v5701_v27 = vpop.f32.mrb[218].mxu1 }
 0x4b9   : > { %v5806_v47 = vadd.f32 %v5805_v19, %v5804_v41  ;;  %v5807_v23 = vpop.f32.mrb[246].mxu0  ;;  %v5702_v12 = vpop.f32.mrb[219].mxu1 }
 0x4ba   : > { %v4504_v48 = vadd.f32 %v5700_v11, %v7715_v62  ;;  %v5703_v9 = vadd.f32 %v5702_v12, %v5701_v27  ;;  %v5808_v7 = vpop.f32.mrb[247].mxu0 }
 0x4bb   : > { %v5809_v15 = vadd.f32 %v5808_v7, %v5807_v23  ;;  %v7806_v25 = vadd.f32 %v5806_v47, %v4496_v28 }
 0x4bc   : > { %v4507_v32 = vadd.f32 %v5703_v9, %v7717_v26 }
 0x4bd   : > { %v7809_v17 = vadd.f32 %v5809_v15, %v4499_v20 }
 0x4be   : > { %v5704_v8 = vpop.f32.mrb[220].mxu1 }
 0x4bf   : > { %v5810_v56 = vpop.f32.mrb[248].mxu0  ;;  %v5705_v39 = vpop.f32.mrb[221].mxu1 }
 0x4c0   : > { %v5706_v29 = vadd.f32 %v5705_v39, %v5704_v8  ;;  %v5811_v55 = vpop.f32.mrb[249].mxu0  ;;  %v5707_v37 = vpop.f32.mrb[222].mxu1 }
 0x4c1   : > { %v5812_v43 = vadd.f32 %v5811_v55, %v5810_v56  ;;  %v5813_v57 = vpop.f32.mrb[250].mxu0  ;;  %v5708_v61 = vpop.f32.mrb[223].mxu1 }
 0x4c2   : > { %v4512_v62 = vadd.f32 %v5706_v29, %v7722_v36  ;;  %v5709_v5 = vadd.f32 %v5708_v61, %v5707_v37  ;;  %v5814_v38 = vpop.f32.mrb[251].mxu0 }
 0x4c3   : > { %v5815_v31 = vadd.f32 %v5814_v38, %v5813_v57  ;;  %v7812_v35 = vadd.f32 %v5812_v43, %v4504_v48 }
 0x4c4   : > { %v4515_v26 = vadd.f32 %v5709_v5, %v7725_v58 }
 0x4c5   : > { %v7816_v28 = vadd.f32 %v5815_v31, %v4507_v32 }
 0x4c6   : > { %v5904_v52 = vpop.f32.mrb[224].mxu1 }
 0x4c7   : > { %v5816_v51 = vpop.f32.mrb[252].mxu0  ;;  %v4722_v40 = vadd.f32 %v5904_v52, %v7734_v54  ;;  %v4713_v20 = vpop.f32.mrb[225].mxu1 }
 0x4c8   : > { %v5817_v36 = vpop.f32.mrb[253].mxu0  ;;  %v4714_v63 = vadd.f32 %v4713_v20, %v7728_v10  ;;  %v5905_v58 = vpop.f32.mrb[226].mxu1 }
 0x4c9   : > { %v4842_v41 = vmax.f32 %v4722_v40, 0.0  ;;  %v5818_v6 = vadd.f32 %v5817_v36, %v5816_v51  ;;  %v5819_v11 = vpop.f32.mrb[254].mxu0  ;;  %v4725_v19 = vadd.f32 %v5905_v58, %v7737_v0  ;;  %v4716_v54 = vpop.f32.mrb[227].mxu1 }
 0x4ca   : > { %v4840_v27 = vmax.f32 %v4714_v63, 0.0  ;;  %v5820_v47 = vpop.f32.mrb[255].mxu0  ;;  %v4717_v23 = vadd.f32 %v4716_v54, %v7731_v46 }
 0x4cb   : > { %4874 = vst [vmem:[%s7822_s23 + $0x10] sm:$0xff] %v4842_v41  ;;  %v4843_v12 = vmax.f32 %v4725_v19, 0.0  ;;  %v5821_v48 = vadd.f32 %v5820_v47, %v5819_v11  ;;  %v7828_v9 = vadd.f32 %v5818_v6, %v4512_v62 }
 0x4cc   : > { %4872 = vst [vmem:[%s7822_s23] sm:$0xff] %v4840_v27  ;;  %v4841_v10 = vmax.f32 %v4717_v23, 0.0 }
 0x4cd   : > { %4875 = vst [vmem:[%s7822_s23 + $0x18] sm:$0xff] %v4843_v12  ;;  %v7832_v7 = vadd.f32 %v5821_v48, %v4515_v26 }
 0x4ce   : > { %4873 = vst [vmem:[%s7822_s23 + $0x8] sm:$0xff] %v4841_v10  ;;  %v5908_v0 = vpop.f32.mrb[228].mxu1 }
 0x4cf   : > { %v4738_v15 = vadd.f32 %v5908_v0, %v7746_v44  ;;  %v4729_v32 = vpop.f32.mrb[229].mxu1 }
 0x4d0   : > { %v4730_v46 = vadd.f32 %v4729_v32, %v7740_v53  ;;  %v5909_v8 = vpop.f32.mrb[230].mxu1 }
 0x4d1   : > { %v4846_v56 = vmax.f32 %v4738_v15, 0.0  ;;  %v4741_v39 = vadd.f32 %v5909_v8, %v7749_v59  ;;  %v4732_v29 = vpop.f32.mrb[231].mxu1 }
 0x4d2   : > { %v4844_v55 = vmax.f32 %v4730_v46, 0.0  ;;  %v4733_v37 = vadd.f32 %v4732_v29, %v7743_v4 }
 0x4d3   : > { %4878 = vst [vmem:[%s7822_s23 + $0x30] sm:$0xff] %v4846_v56  ;;  %v4847_v43 = vmax.f32 %v4741_v39, 0.0 }
 0x4d4   : > { %4876 = vst [vmem:[%s7822_s23 + $0x20] sm:$0xff] %v4844_v55  ;;  %v4845_v57 = vmax.f32 %v4733_v37, 0.0 }
 0x4d5   : > { %4879 = vst [vmem:[%s7822_s23 + $0x38] sm:$0xff] %v4847_v43 }
 0x4d6   : > { %4877 = vst [vmem:[%s7822_s23 + $0x28] sm:$0xff] %v4845_v57  ;;  %v5912_v44 = vpop.f32.mrb[232].mxu1 }
 0x4d7   : > { %v4754_v53 = vadd.f32 %v5912_v44, %v7758_v3  ;;  %v4745_v61 = vpop.f32.mrb[233].mxu1 }
 0x4d8   : > { %v4746_v59 = vadd.f32 %v4745_v61, %v7752_v14  ;;  %v5913_v62 = vpop.f32.mrb[234].mxu1 }
 0x4d9   : > { %v4850_v5 = vmax.f32 %v4754_v53, 0.0  ;;  %v4757_v4 = vadd.f32 %v5913_v62, %v7761_v16  ;;  %v4748_v38 = vpop.f32.mrb[235].mxu1 }
 0x4da   : > { %v4848_v31 = vmax.f32 %v4746_v59, 0.0  ;;  %v4749_v26 = vadd.f32 %v4748_v38, %v7755_v33 }
 0x4db   : > { %4882 = vst [vmem:[%s7822_s23 + $0x50] sm:$0xff] %v4850_v5  ;;  %v4851_v52 = vmax.f32 %v4757_v4, 0.0 }
 0x4dc   : > { %4880 = vst [vmem:[%s7822_s23 + $0x40] sm:$0xff] %v4848_v31  ;;  %v4849_v51 = vmax.f32 %v4749_v26, 0.0 }
 0x4dd   : > { %4883 = vst [vmem:[%s7822_s23 + $0x58] sm:$0xff] %v4851_v52 }
 0x4de   : > { %4881 = vst [vmem:[%s7822_s23 + $0x48] sm:$0xff] %v4849_v51  ;;  %v5916_v3 = vpop.f32.mrb[236].mxu1 }
 0x4df   : > { %v4770_v14 = vadd.f32 %v5916_v3, %v7770_v42  ;;  %v4761_v40 = vpop.f32.mrb[237].mxu1 }
 0x4e0   : > { %v4762_v16 = vadd.f32 %v4761_v40, %v7764_v34  ;;  %v5917_v20 = vpop.f32.mrb[238].mxu1 }
 0x4e1   : > { %v4854_v36 = vmax.f32 %v4770_v14, 0.0  ;;  %v4773_v33 = vadd.f32 %v5917_v20, %v7773_v49  ;;  %v4764_v63 = vpop.f32.mrb[239].mxu1 }
 0x4e2   : > { %v4852_v58 = vmax.f32 %v4762_v16, 0.0  ;;  %v4765_v41 = vadd.f32 %v4764_v63, %v7767_v13 }
 0x4e3   : > { %4886 = vst [vmem:[%s7822_s23 + $0x70] sm:$0xff] %v4854_v36  ;;  %v4855_v6 = vmax.f32 %v4773_v33, 0.0 }
 0x4e4   : > { %4884 = vst [vmem:[%s7822_s23 + $0x60] sm:$0xff] %v4852_v58  ;;  %v4853_v11 = vmax.f32 %v4765_v41, 0.0 }
 0x4e5   : > { %4887 = vst [vmem:[%s7822_s23 + $0x78] sm:$0xff] %v4855_v6 }
 0x4e6   : > { %4885 = vst [vmem:[%s7822_s23 + $0x68] sm:$0xff] %v4853_v11  ;;  %v5920_v42 = vpop.f32.mrb[240].mxu1 }
 0x4e7   : > { %v4786_v34 = vadd.f32 %v5920_v42, %v7782_v22  ;;  %v4777_v19 = vpop.f32.mrb[241].mxu1 }
 0x4e8   : > { %v4778_v49 = vadd.f32 %v4777_v19, %v7776_v45  ;;  %v5921_v54 = vpop.f32.mrb[242].mxu1 }
 0x4e9   : > { %v4858_v27 = vmax.f32 %v4786_v34, 0.0  ;;  %v4789_v13 = vadd.f32 %v5921_v54, %v7785_v21  ;;  %v4780_v47 = vpop.f32.mrb[243].mxu1 }
 0x4ea   : > { %v4856_v23 = vmax.f32 %v4778_v49, 0.0  ;;  %v4781_v12 = vadd.f32 %v4780_v47, %v7779_v24 }
 0x4eb   : > { %4890 = vst [vmem:[%s7822_s23 + $0x90] sm:$0xff] %v4858_v27  ;;  %v4859_v48 = vmax.f32 %v4789_v13, 0.0 }
 0x4ec   : > { %4888 = vst [vmem:[%s7822_s23 + $0x80] sm:$0xff] %v4856_v23  ;;  %v4857_v10 = vmax.f32 %v4781_v12, 0.0 }
 0x4ed   : > { %4891 = vst [vmem:[%s7822_s23 + $0x98] sm:$0xff] %v4859_v48 }
 0x4ee   : > { %4889 = vst [vmem:[%s7822_s23 + $0x88] sm:$0xff] %v4857_v10  ;;  %v5924_v22 = vpop.f32.mrb[244].mxu1 }
 0x4ef   : > { %v4802_v45 = vadd.f32 %v5924_v22, %v7794_v18  ;;  %v4793_v0 = vpop.f32.mrb[245].mxu1 }
 0x4f0   : > { %v4794_v21 = vadd.f32 %v4793_v0, %v7788_v30  ;;  %v5925_v15 = vpop.f32.mrb[246].mxu1 }
 0x4f1   : > { %v4862_v32 = vmax.f32 %v4802_v45, 0.0  ;;  %v4805_v24 = vadd.f32 %v5925_v15, %v7797_v1  ;;  %v4796_v46 = vpop.f32.mrb[247].mxu1 }
 0x4f2   : > { %v4860_v8 = vmax.f32 %v4794_v21, 0.0  ;;  %v4797_v56 = vadd.f32 %v4796_v46, %v7791_v60 }
 0x4f3   : > { %4894 = vst [vmem:[%s7822_s23 + $0xb0] sm:$0xff] %v4862_v32  ;;  %v4863_v39 = vmax.f32 %v4805_v24, 0.0 }
 0x4f4   : > { %4892 = vst [vmem:[%s7822_s23 + $0xa0] sm:$0xff] %v4860_v8  ;;  %v4861_v29 = vmax.f32 %v4797_v56, 0.0 }
 0x4f5   : > { %4895 = vst [vmem:[%s7822_s23 + $0xb8] sm:$0xff] %v4863_v39 }
 0x4f6   : > { %4893 = vst [vmem:[%s7822_s23 + $0xa8] sm:$0xff] %v4861_v29  ;;  %v5928_v18 = vpop.f32.mrb[248].mxu1 }
 0x4f7   : > { %v4818_v30 = vadd.f32 %v5928_v18, %v7806_v25  ;;  %v4809_v55 = vpop.f32.mrb[249].mxu1 }
 0x4f8   : > { %v4810_v1 = vadd.f32 %v4809_v55, %v7800_v50  ;;  %v5929_v37 = vpop.f32.mrb[250].mxu1 }
 0x4f9   : > { %v4866_v43 = vmax.f32 %v4818_v30, 0.0  ;;  %v4821_v60 = vadd.f32 %v5929_v37, %v7809_v17  ;;  %v4812_v57 = vpop.f32.mrb[251].mxu1 }
 0x4fa   : > { %v4864_v44 = vmax.f32 %v4810_v1, 0.0  ;;  %v4813_v53 = vadd.f32 %v4812_v57, %v7803_v2 }
 0x4fb   : > { %4898 = vst [vmem:[%s7822_s23 + $0xd0] sm:$0xff] %v4866_v43  ;;  %v4867_v61 = vmax.f32 %v4821_v60, 0.0 }
 0x4fc   : > { %4896 = vst [vmem:[%s7822_s23 + $0xc0] sm:$0xff] %v4864_v44  ;;  %v4865_v59 = vmax.f32 %v4813_v53, 0.0 }
 0x4fd   : > { %4899 = vst [vmem:[%s7822_s23 + $0xd8] sm:$0xff] %v4867_v61 }
 0x4fe   : > { %4897 = vst [vmem:[%s7822_s23 + $0xc8] sm:$0xff] %v4865_v59  ;;  %v5932_v25 = vpop.f32.mrb[252].mxu1 }
 0x4ff   : > { %v4834_v50 = vadd.f32 %v5932_v25, %v7828_v9  ;;  %v4825_v62 = vpop.f32.mrb[253].mxu1 }
 0x500   : > { %v4826_v17 = vadd.f32 %v4825_v62, %v7812_v35  ;;  %v5933_v5 = vpop.f32.mrb[254].mxu1 }
 0x501   : > { %v4870_v4 = vmax.f32 %v4834_v50, 0.0  ;;  %v4837_v2 = vadd.f32 %v5933_v5, %v7832_v7  ;;  %v4828_v38 = vpop.f32.mrb[255].mxu1 }
 0x502   : > { %v4868_v31 = vmax.f32 %v4826_v17, 0.0  ;;  %v4829_v26 = vadd.f32 %v4828_v38, %v7816_v28 }
 0x503   : > { %4902 = vst [vmem:[%s7822_s23 + $0xf0] sm:$0xff] %v4870_v4  ;;  %v4871_v52 = vmax.f32 %v4837_v2, 0.0 }
 0x504   : > { %4900 = vst [vmem:[%s7822_s23 + $0xe0] sm:$0xff] %v4868_v31  ;;  %v4869_v51 = vmax.f32 %v4829_v26, 0.0 }
 0x505   : > { %4903 = vst [vmem:[%s7822_s23 + $0xf8] sm:$0xff] %v4871_v52 }
 0x506   : > { %4901 = vst [vmem:[%s7822_s23 + $0xe8] sm:$0xff] %v4869_v51 }
 0x507 PF: > { %s17_s24 = sadd.s32 1, %s6105_s24  }
 0x508   : > { %p14_p4 = scmp.ge.s32.totalorder %s17_s24, 4  }
 0x50a   :  { %16 = sbr.rel (!%p14_p4) target bundleno = 1 (0x1), region = 84 }

</bundles_post_ra>
